<compile_context>
chip_gen: v7x
topology: tpu7x:2x2x1
jax: 0.10.0
libtpu: 0.0.40
codegen_flags: <defaults>
</compile_context>

<pallas_src>
import jax
import jax.numpy as jnp
from jax.experimental import pallas as pl
from jax.experimental.pallas import tpu as pltpu


# ----------------------------------------------------------------------------
# Fused Pallas kernel
# ----------------------------------------------------------------------------
# Column layout of every 8H-wide tensor, in blocks of H ("gate-major,
# direction-interleaved"):  [i_f, i_b, f_f, f_b, g_f, g_b, o_f, o_b]
# so gate slices [0:2H], [2H:4H], [4H:6H], [6H:8H] line up with the (B, 2H)
# state layout  h/c = [fwd | bwd].
def _bilstm_fused_kernel(
    x_ref,        # (T*B, F)   time-major flattened (batch-padded) input, f32
    wih1_ref,     # (2, F, 8H) layer-1 input weights, bf16: [fwd-padded, bwd-padded]
    b1_ref,       # (2, 1, 8H) layer-1 biases (b_ih+b_hh), f32, zeros in other dir's cols
    whh1_ref,     # (2H, 8H)   layer-1 block-diagonal recurrent weights, bf16
    wih2_ref,     # (4, H, 8H) layer-2 input weights, bf16:
                  #            [fwd<-h_f, fwd<-h_b, bwd<-h_f, bwd<-h_b]
    b2_ref,       # (2, 1, 8H) layer-2 biases, f32
    whh2_ref,     # (2H, 8H)   layer-2 block-diagonal recurrent weights, bf16
    fcw_ref,      # (2, H, O)  FC weight halves, bf16: [h_n[-2] half, h_n[-1] half]
    fcb_ref,      # (1, O)     FC bias, f32
    out_ref,      # (B, O)     f32
    xpf_ref,      # VMEM scratch (T, B, 8H) f32: fwd-direction hoisted projections
    xpb_ref,      # VMEM scratch (T, B, 8H) f32: bwd-direction hoisted projections
    hseqf_ref,    # VMEM scratch (T, B, H)  f32: layer-1 fwd hidden sequence
    hseqb_ref,    # VMEM scratch (T, B, H)  f32: layer-1 bwd hidden sequence
):
    TB = x_ref.shape[0]
    B = out_ref.shape[0]
    T = TB // B
    H = whh1_ref.shape[-1] // 8
    f32, bf16 = jnp.float32, jnp.bfloat16

    def run_bidir(whh, write_hseq):
        """Lockstep fwd+bwd recurrence; one block-diagonal MXU push per step."""
        # h / c layout: [:, :H] = fwd state, [:, H:] = bwd state.
        h = jnp.zeros((B, 2 * H), f32)
        c = jnp.zeros((B, 2 * H), f32)
        for s in range(T):                          # static unroll (T small)
            tb = T - 1 - s                          # bwd-direction time index
            # single MXU push: all 8 gates, both directions (256 lanes)
            r = jnp.dot(h.astype(bf16), whh, preferred_element_type=f32)
            pre = r + xpf_ref[s] + xpb_ref[tb]      # (B, 8H)
            sg = jax.nn.sigmoid(pre)
            th = jnp.tanh(pre)
            gi = sg[:, 0 * H:2 * H]                 # [i_f | i_b]
            gf = sg[:, 2 * H:4 * H]                 # [f_f | f_b]
            gg = th[:, 4 * H:6 * H]                 # [g_f | g_b]
            go = sg[:, 6 * H:8 * H]                 # [o_f | o_b]
            c = gf * c + gi * gg
            h = go * jnp.tanh(c)
            if write_hseq:
                hseqf_ref[s] = h[:, :H]             # fwd output, time slot s
                hseqb_ref[tb] = h[:, H:]            # bwd output, time slot tb
        return h

    # ---------------------- layer-1 hoisted projections ---------------------
    x = x_ref[...].astype(bf16)                                     # (T*B, F)
    pf = jnp.dot(x, wih1_ref[0], preferred_element_type=f32) + b1_ref[0]
    pb = jnp.dot(x, wih1_ref[1], preferred_element_type=f32) + b1_ref[1]
    xpf_ref[...] = pf.reshape(T, B, 8 * H)
    xpb_ref[...] = pb.reshape(T, B, 8 * H)

    # ------------------------------ layer 1 ---------------------------------
    run_bidir(whh1_ref[...], write_hseq=True)

    # ---------------------- layer-2 hoisted projections ---------------------
    # layer-2 input = concat(h_fwd, h_bwd) expressed as split matmuls
    hf = hseqf_ref[...].reshape(TB, H).astype(bf16)
    hb = hseqb_ref[...].reshape(TB, H).astype(bf16)
    pf = (jnp.dot(hf, wih2_ref[0], preferred_element_type=f32)
          + jnp.dot(hb, wih2_ref[1], preferred_element_type=f32) + b2_ref[0])
    pb = (jnp.dot(hf, wih2_ref[2], preferred_element_type=f32)
          + jnp.dot(hb, wih2_ref[3], preferred_element_type=f32) + b2_ref[1])
    xpf_ref[...] = pf.reshape(T, B, 8 * H)          # scratch reused for layer 2
    xpb_ref[...] = pb.reshape(T, B, 8 * H)

    # ------------------------------ layer 2 ---------------------------------
    h2 = run_bidir(whh2_ref[...], write_hseq=False)

    # ------------------------------ FC head ---------------------------------
    out = (jnp.dot(h2[:, :H].astype(bf16), fcw_ref[0], preferred_element_type=f32)
           + jnp.dot(h2[:, H:].astype(bf16), fcw_ref[1], preferred_element_type=f32)
           + fcb_ref[...])
    out_ref[...] = out.astype(out_ref.dtype)


# ----------------------------------------------------------------------------
# Wrapper
# ----------------------------------------------------------------------------
def _full_spec(shape):
    n = len(shape)
    return pl.BlockSpec(shape, lambda i: (0,) * n)


@jax.jit
def bilstm_forward(x, kp):
    """Equivalent of BiLSTMModel.forward.  x: (batch, seq, input_size)."""
    B, T, F = x.shape
    H = kp["whh1"].shape[-1] // 8
    O = kp["fcb"].shape[-1]
    B_pad = max(8, ((B + 7) // 8) * 8)          # pad batch to a full sublane tile

    # (B, T, F) -> time-major padded (T*B_pad, F): the whole input projection
    # becomes two lane-dense bulk matmuls inside the kernel.
    x_tm = jnp.transpose(x, (1, 0, 2)).astype(jnp.float32)
    x_tm = jnp.pad(x_tm, ((0, 0), (0, B_pad - B), (0, 0)))
    x2 = x_tm.reshape(T * B_pad, F)

    args = (x2, kp["wih1"], kp["b1"], kp["whh1"],
            kp["wih2"], kp["b2"], kp["whh2"], kp["fcw"], kp["fcb"])

    out = pl.pallas_call(
        _bilstm_fused_kernel,
        out_shape=jax.ShapeDtypeStruct((B_pad, O), jnp.float32),
        grid_spec=pltpu.PrefetchScalarGridSpec(
            num_scalar_prefetch=0,
            grid=(1,),
            in_specs=[_full_spec(a.shape) for a in args],
            out_specs=_full_spec((B_pad, O)),
            scratch_shapes=[
                pltpu.VMEM((T, B_pad, 8 * H), jnp.float32),   # fwd projections
                pltpu.VMEM((T, B_pad, 8 * H), jnp.float32),   # bwd projections
                pltpu.VMEM((T, B_pad, H), jnp.float32),       # layer-1 fwd hidden seq
                pltpu.VMEM((T, B_pad, H), jnp.float32),       # layer-1 bwd hidden seq
            ],
        ),
        compiler_params=pltpu.CompilerParams(
            dimension_semantics=("arbitrary",)),
    )(*args)
    return out[:B]


# ----------------------------------------------------------------------------
# Parameters: torch-layout init + re-layout for the fused kernel
# ----------------------------------------------------------------------------
def init_torch_params(key, input_size, hidden_size, output_size, num_layers=2):
    """PyTorch-layout params with U(-1/sqrt(H), 1/sqrt(H)) init."""
    H = hidden_size
    bound = 1.0 / (float(H) ** 0.5)
    keys = iter(jax.random.split(key, num_layers * 2 * 4 + 2))

    def uni(shape):
        return jax.random.uniform(next(keys), shape, jnp.float32, -bound, bound)

    layers = []
    for l in range(num_layers):
        in_feat = input_size if l == 0 else 2 * H
        layer = {}
        for d in ("fwd", "bwd"):
            layer[d] = (uni((4 * H, in_feat)),   # w_ih
                        uni((4 * H, H)),          # w_hh
                        uni((4 * H,)),            # b_ih
                        uni((4 * H,)))            # b_hh
        layers.append(layer)
    return {"layers": layers,
            "fc_w": uni((output_size, 2 * H)),
            "fc_b": uni((output_size,))}


def make_kernel_params(tp, hidden_size):
    """Re-layout: gate-major direction-interleaved 8H columns, block-diagonal
    W_hh, weights in bf16 (biases stay f32)."""
    H = hidden_size
    layers = tp["layers"]
    assert len(layers) == 2, "fused kernel is specialized to num_layers=2"
    l1, l2 = layers
    f32, bf16 = jnp.float32, jnp.bfloat16

    def col(g, d):                     # column block for gate g, direction d
        j = 2 * g + d
        return slice(j * H, (j + 1) * H)

    def pad_ih(w_ih, d):
        # torch (4H, in) -> (in, 8H), zeros in the other direction's columns.
        in_feat = w_ih.shape[1]
        W = jnp.zeros((in_feat, 8 * H), f32)
        for g in range(4):
            W = W.at[:, col(g, d)].set(w_ih[g * H:(g + 1) * H, :].T)
        return W

    def pad_b(b_ih, b_hh, d):
        b = b_ih + b_hh
        out = jnp.zeros((1, 8 * H), f32)
        for g in range(4):
            out = out.at[0, col(g, d)].set(b[g * H:(g + 1) * H])
        return out

    def blockdiag_hh(w_hh_f, w_hh_b):
        # rows [0:H] <- h_fwd, rows [H:2H] <- h_bwd; zero cross blocks.
        W = jnp.zeros((2 * H, 8 * H), f32)
        for g in range(4):
            W = W.at[:H, col(g, 0)].set(w_hh_f[g * H:(g + 1) * H, :].T)
            W = W.at[H:, col(g, 1)].set(w_hh_b[g * H:(g + 1) * H, :].T)
        return W

    wih1 = jnp.stack([pad_ih(l1["fwd"][0], 0),
                      pad_ih(l1["bwd"][0], 1)]).astype(bf16)            # (2,F,8H)
    b1 = jnp.stack([pad_b(l1["fwd"][2], l1["fwd"][3], 0),
                    pad_b(l1["bwd"][2], l1["bwd"][3], 1)])              # (2,1,8H)
    whh1 = blockdiag_hh(l1["fwd"][1], l1["bwd"][1]).astype(bf16)        # (2H,8H)

    # layer-2 input features = concat(h_fwd, h_bwd): split each direction's
    # W_ih into the half that multiplies h_fwd and the half for h_bwd.
    wih2 = jnp.stack([pad_ih(l2["fwd"][0][:, :H], 0),
                      pad_ih(l2["fwd"][0][:, H:], 0),
                      pad_ih(l2["bwd"][0][:, :H], 1),
                      pad_ih(l2["bwd"][0][:, H:], 1)]).astype(bf16)     # (4,H,8H)
    b2 = jnp.stack([pad_b(l2["fwd"][2], l2["fwd"][3], 0),
                    pad_b(l2["bwd"][2], l2["bwd"][3], 1)])              # (2,1,8H)
    whh2 = blockdiag_hh(l2["fwd"][1], l2["bwd"][1]).astype(bf16)        # (2H,8H)

    fcw = jnp.stack([tp["fc_w"][:, :H].T,
                     tp["fc_w"][:, H:].T]).astype(bf16)                 # (2,H,O)
    return {"wih1": wih1, "b1": b1, "whh1": whh1,
            "wih2": wih2, "b2": b2, "whh2": whh2,
            "fcw": fcw, "fcb": tp["fc_b"][None, :]}


# ----------------------------------------------------------------------------
# Pure-JAX reference (PyTorch semantics) for a numerical sanity check
# ----------------------------------------------------------------------------
def _lstm_dir_ref(x_seq, w_ih, w_hh, b_ih, b_hh):
    T, B, _ = x_seq.shape
    H = w_hh.shape[1]

    def step(carry, x_t):
        h, c = carry
        g = x_t @ w_ih.T + h @ w_hh.T + b_ih + b_hh
        i = jax.nn.sigmoid(g[:, 0 * H:1 * H])
        f = jax.nn.sigmoid(g[:, 1 * H:2 * H])
        gg = jnp.tanh(g[:, 2 * H:3 * H])
        o = jax.nn.sigmoid(g[:, 3 * H:4 * H])
        c = f * c + i * gg
        h = o * jnp.tanh(c)
        return (h, c), h

    init = (jnp.zeros((B, H), jnp.float32), jnp.zeros((B, H), jnp.float32))
    (h_final, _), hs = jax.lax.scan(step, init, x_seq)
    return hs, h_final


def bilstm_forward_ref(x, tp):
    layer_in = jnp.transpose(x, (1, 0, 2)).astype(jnp.float32)
    hf_final = hb_final = None
    for layer in tp["layers"]:
        hs_f, hf_final = _lstm_dir_ref(layer_in, *layer["fwd"])
        hs_b_rev, hb_final = _lstm_dir_ref(jnp.flip(layer_in, 0), *layer["bwd"])
        layer_in = jnp.concatenate([hs_f, jnp.flip(hs_b_rev, 0)], axis=-1)
    h_cat = jnp.concatenate([hf_final, hb_final], axis=-1)
    return h_cat @ tp["fc_w"].T + tp["fc_b"]


# ----------------------------------------------------------------------------
if __name__ == "__main__":
    batch, seq, input_size, hidden_size, output_size = 2, 8, 16, 32, 8

    key = jax.random.PRNGKey(0)
    k_param, k_x = jax.random.split(key)
    tp = init_torch_params(k_param, input_size, hidden_size, output_size,
                           num_layers=2)
    kp = make_kernel_params(tp, hidden_size)
    x = jax.random.normal(k_x, (batch, seq, input_size), jnp.float32)

    out = jax.block_until_ready(bilstm_forward(x, kp))
    ref = jax.block_until_ready(bilstm_forward_ref(x, tp))

    assert out.shape == (batch, output_size), out.shape
    err = float(jnp.max(jnp.abs(out - ref)))
    # bf16 matmul operands (with f32 accumulation) widen the tolerance vs the
    # pure-f32 reference; structural bugs (gate order, time alignment, FC
    # halves) would produce errors orders of magnitude larger than this.
    assert err < 2e-2, f"max abs err {err}"

    print("KERNEL_OK")
</pallas_src>

<mosaic_0001>
module attributes {stable_mosaic.version = 11 : i64} {
  func.func @_bilstm_fused_kernel(%arg0: i32, %arg1: memref<64x16xf32, #tpu.memory_space<vmem>>, %arg2: memref<2x16x256xbf16, #tpu.memory_space<vmem>>, %arg3: memref<2x1x256xf32, #tpu.memory_space<vmem>>, %arg4: memref<64x256xbf16, #tpu.memory_space<vmem>>, %arg5: memref<4x32x256xbf16, #tpu.memory_space<vmem>>, %arg6: memref<2x1x256xf32, #tpu.memory_space<vmem>>, %arg7: memref<64x256xbf16, #tpu.memory_space<vmem>>, %arg8: memref<2x32x8xbf16, #tpu.memory_space<vmem>>, %arg9: memref<1x8xf32, #tpu.memory_space<vmem>>, %arg10: memref<8x8xf32, #tpu.memory_space<vmem>>, %arg11: memref<8x8x256xf32, #tpu.memory_space<vmem>>, %arg12: memref<8x8x256xf32, #tpu.memory_space<vmem>>, %arg13: memref<8x8x32xf32, #tpu.memory_space<vmem>>, %arg14: memref<8x8x32xf32, #tpu.memory_space<vmem>>) attributes {dimension_semantics = [#tpu.dimension_semantics<arbitrary>], iteration_bounds = array<i64: 1>, scalar_prefetch = 0 : i64, scratch_operands = 4 : i64, tpu.core_type = #tpu.core_type<tc>, window_params = [{pipeline_mode = #tpu.pipeline_mode<synchronous>, transform_indices = @transform_0, window_bounds = array<i64: 64, 16>}, {pipeline_mode = #tpu.pipeline_mode<synchronous>, transform_indices = @transform_1, window_bounds = array<i64: 2, 16, 256>}, {pipeline_mode = #tpu.pipeline_mode<synchronous>, transform_indices = @transform_2, window_bounds = array<i64: 2, 1, 256>}, {pipeline_mode = #tpu.pipeline_mode<synchronous>, transform_indices = @transform_3, window_bounds = array<i64: 64, 256>}, {pipeline_mode = #tpu.pipeline_mode<synchronous>, transform_indices = @transform_4, window_bounds = array<i64: 4, 32, 256>}, {pipeline_mode = #tpu.pipeline_mode<synchronous>, transform_indices = @transform_5, window_bounds = array<i64: 2, 1, 256>}, {pipeline_mode = #tpu.pipeline_mode<synchronous>, transform_indices = @transform_6, window_bounds = array<i64: 64, 256>}, {pipeline_mode = #tpu.pipeline_mode<synchronous>, transform_indices = @transform_7, window_bounds = array<i64: 2, 32, 8>}, {pipeline_mode = #tpu.pipeline_mode<synchronous>, transform_indices = @transform_8, window_bounds = array<i64: 1, 8>}, {pipeline_mode = #tpu.pipeline_mode<synchronous>, transform_indices = @transform_9, window_bounds = array<i64: 8, 8>}]} {
    %c0 = arith.constant 0 : index
    %c0_0 = arith.constant 0 : index
    %0 = vector.load %arg1[%c0, %c0_0] : memref<64x16xf32, #tpu.memory_space<vmem>>, vector<64x16xf32>
    %1 = arith.truncf %0 : vector<64x16xf32> to vector<64x16xbf16>
    %c0_1 = arith.constant 0 : index
    %c0_2 = arith.constant 0 : index
    %c0_3 = arith.constant 0 : index
    %2 = vector.load %arg2[%c0_1, %c0_2, %c0_3] : memref<2x16x256xbf16, #tpu.memory_space<vmem>>, vector<1x16x256xbf16>
    %3 = vector.shape_cast %2 : vector<1x16x256xbf16> to vector<16x256xbf16>
    %cst = arith.constant dense<0.000000e+00> : vector<64x256xf32>
    %4 = tpu.matmul %1, %3, %cst {dimension_numbers = #tpu.dot_dimension_numbers<[1], [0], [0], [1], [0, 0, 1, 1], [], []>} : vector<64x16xbf16>, vector<16x256xbf16>, vector<64x256xf32> -> vector<64x256xf32>
    %c0_4 = arith.constant 0 : index
    %c0_5 = arith.constant 0 : index
    %c0_6 = arith.constant 0 : index
    %5 = vector.load %arg3[%c0_4, %c0_5, %c0_6] : memref<2x1x256xf32, #tpu.memory_space<vmem>>, vector<1x1x256xf32>
    %6 = vector.shape_cast %5 : vector<1x1x256xf32> to vector<1x256xf32>
    %7 = vector.broadcast %6 : vector<1x256xf32> to vector<64x256xf32>
    %8 = arith.addf %4, %7 : vector<64x256xf32>
    %c1 = arith.constant 1 : index
    %c0_7 = arith.constant 0 : index
    %c0_8 = arith.constant 0 : index
    %9 = vector.load %arg2[%c1, %c0_7, %c0_8] : memref<2x16x256xbf16, #tpu.memory_space<vmem>>, vector<1x16x256xbf16>
    %10 = vector.shape_cast %9 : vector<1x16x256xbf16> to vector<16x256xbf16>
    %cst_9 = arith.constant dense<0.000000e+00> : vector<64x256xf32>
    %11 = tpu.matmul %1, %10, %cst_9 {dimension_numbers = #tpu.dot_dimension_numbers<[1], [0], [0], [1], [0, 0, 1, 1], [], []>} : vector<64x16xbf16>, vector<16x256xbf16>, vector<64x256xf32> -> vector<64x256xf32>
    %c1_10 = arith.constant 1 : index
    %c0_11 = arith.constant 0 : index
    %c0_12 = arith.constant 0 : index
    %12 = vector.load %arg3[%c1_10, %c0_11, %c0_12] : memref<2x1x256xf32, #tpu.memory_space<vmem>>, vector<1x1x256xf32>
    %13 = vector.shape_cast %12 : vector<1x1x256xf32> to vector<1x256xf32>
    %14 = vector.broadcast %13 : vector<1x256xf32> to vector<64x256xf32>
    %15 = arith.addf %11, %14 : vector<64x256xf32>
    %16 = vector.shape_cast %8 : vector<64x256xf32> to vector<8x8x256xf32>
    %c0_13 = arith.constant 0 : index
    %c0_14 = arith.constant 0 : index
    %c0_15 = arith.constant 0 : index
    %17 = vector.load %arg11[%c0_13, %c0_14, %c0_15] : memref<8x8x256xf32, #tpu.memory_space<vmem>>, vector<8x8x256xf32>
    tpu.vector_store %arg11[%c0_13, %c0_14, %c0_15], %16 {strides = array<i32>} : memref<8x8x256xf32, #tpu.memory_space<vmem>>, vector<8x8x256xf32>,
    %18 = vector.shape_cast %15 : vector<64x256xf32> to vector<8x8x256xf32>
    %c0_16 = arith.constant 0 : index
    %c0_17 = arith.constant 0 : index
    %c0_18 = arith.constant 0 : index
    %19 = vector.load %arg12[%c0_16, %c0_17, %c0_18] : memref<8x8x256xf32, #tpu.memory_space<vmem>>, vector<8x8x256xf32>
    tpu.vector_store %arg12[%c0_16, %c0_17, %c0_18], %18 {strides = array<i32>} : memref<8x8x256xf32, #tpu.memory_space<vmem>>, vector<8x8x256xf32>,
    %c0_19 = arith.constant 0 : index
    %c0_20 = arith.constant 0 : index
    %20 = vector.load %arg4[%c0_19, %c0_20] : memref<64x256xbf16, #tpu.memory_space<vmem>>, vector<64x256xbf16>
    %cst_21 = arith.constant 0.000000e+00 : f32
    %21 = vector.broadcast %cst_21 : f32 to vector<8x64xf32>
    %cst_22 = arith.constant 0.000000e+00 : f32
    %22 = vector.broadcast %cst_22 : f32 to vector<8x64xf32>
    %23 = arith.truncf %21 : vector<8x64xf32> to vector<8x64xbf16>
    %cst_23 = arith.constant dense<0.000000e+00> : vector<8x256xf32>
    %24 = tpu.matmul %23, %20, %cst_23 {dimension_numbers = #tpu.dot_dimension_numbers<[1], [0], [0], [1], [0, 0, 1, 1], [], []>} : vector<8x64xbf16>, vector<64x256xbf16>, vector<8x256xf32> -> vector<8x256xf32>
    %c0_24 = arith.constant 0 : index
    %c0_25 = arith.constant 0 : index
    %c0_26 = arith.constant 0 : index
    %25 = vector.load %arg11[%c0_24, %c0_25, %c0_26] : memref<8x8x256xf32, #tpu.memory_space<vmem>>, vector<1x8x256xf32>
    %26 = vector.shape_cast %25 : vector<1x8x256xf32> to vector<8x256xf32>
    %27 = arith.addf %24, %26 : vector<8x256xf32>
    %c7 = arith.constant 7 : index
    %c0_27 = arith.constant 0 : index
    %c0_28 = arith.constant 0 : index
    %28 = vector.load %arg12[%c7, %c0_27, %c0_28] : memref<8x8x256xf32, #tpu.memory_space<vmem>>, vector<1x8x256xf32>
    %29 = vector.shape_cast %28 : vector<1x8x256xf32> to vector<8x256xf32>
    %30 = arith.addf %27, %29 : vector<8x256xf32>
    %31 = arith.negf %30 : vector<8x256xf32>
    %32 = math.exp %31 : vector<8x256xf32>
    %cst_29 = arith.constant 1.000000e+00 : f32
    %33 = vector.broadcast %cst_29 : f32 to vector<8x256xf32>
    %34 = arith.addf %33, %32 : vector<8x256xf32>
    %35 = arith.divf %33, %34 : vector<8x256xf32>
    %36 = math.tanh %30 : vector<8x256xf32>
    %37 = vector.extract_strided_slice %35 {offsets = [0, 0], sizes = [8, 64], strides = [1, 1]} : vector<8x256xf32> to vector<8x64xf32>
    %38 = vector.extract_strided_slice %35 {offsets = [0, 64], sizes = [8, 64], strides = [1, 1]} : vector<8x256xf32> to vector<8x64xf32>
    %39 = vector.extract_strided_slice %36 {offsets = [0, 128], sizes = [8, 64], strides = [1, 1]} : vector<8x256xf32> to vector<8x64xf32>
    %40 = vector.extract_strided_slice %35 {offsets = [0, 192], sizes = [8, 64], strides = [1, 1]} : vector<8x256xf32> to vector<8x64xf32>
    %41 = arith.mulf %38, %22 : vector<8x64xf32>
    %42 = arith.mulf %37, %39 : vector<8x64xf32>
    %43 = arith.addf %41, %42 : vector<8x64xf32>
    %44 = math.tanh %43 : vector<8x64xf32>
    %45 = arith.mulf %40, %44 : vector<8x64xf32>
    %46 = vector.extract_strided_slice %45 {offsets = [0, 0], sizes = [8, 32], strides = [1, 1]} : vector<8x64xf32> to vector<8x32xf32>
    %c0_30 = arith.constant 0 : index
    %c0_31 = arith.constant 0 : index
    %c0_32 = arith.constant 0 : index
    %47 = vector.load %arg13[%c0_30, %c0_31, %c0_32] : memref<8x8x32xf32, #tpu.memory_space<vmem>>, vector<1x8x32xf32>
    %48 = vector.shape_cast %47 : vector<1x8x32xf32> to vector<8x32xf32>
    %49 = vector.shape_cast %46 : vector<8x32xf32> to vector<1x8x32xf32>
    tpu.vector_store %arg13[%c0_30, %c0_31, %c0_32], %49 {strides = array<i32>} : memref<8x8x32xf32, #tpu.memory_space<vmem>>, vector<1x8x32xf32>,
    %50 = vector.extract_strided_slice %45 {offsets = [0, 32], sizes = [8, 32], strides = [1, 1]} : vector<8x64xf32> to vector<8x32xf32>
    %c7_33 = arith.constant 7 : index
    %c0_34 = arith.constant 0 : index
    %c0_35 = arith.constant 0 : index
    %51 = vector.load %arg14[%c7_33, %c0_34, %c0_35] : memref<8x8x32xf32, #tpu.memory_space<vmem>>, vector<1x8x32xf32>
    %52 = vector.shape_cast %51 : vector<1x8x32xf32> to vector<8x32xf32>
    %53 = vector.shape_cast %50 : vector<8x32xf32> to vector<1x8x32xf32>
    tpu.vector_store %arg14[%c7_33, %c0_34, %c0_35], %53 {strides = array<i32>} : memref<8x8x32xf32, #tpu.memory_space<vmem>>, vector<1x8x32xf32>,
    %54 = arith.truncf %45 : vector<8x64xf32> to vector<8x64xbf16>
    %cst_36 = arith.constant dense<0.000000e+00> : vector<8x256xf32>
    %55 = tpu.matmul %54, %20, %cst_36 {dimension_numbers = #tpu.dot_dimension_numbers<[1], [0], [0], [1], [0, 0, 1, 1], [], []>} : vector<8x64xbf16>, vector<64x256xbf16>, vector<8x256xf32> -> vector<8x256xf32>
    %c1_37 = arith.constant 1 : index
    %c0_38 = arith.constant 0 : index
    %c0_39 = arith.constant 0 : index
    %56 = vector.load %arg11[%c1_37, %c0_38, %c0_39] : memref<8x8x256xf32, #tpu.memory_space<vmem>>, vector<1x8x256xf32>
    %57 = vector.shape_cast %56 : vector<1x8x256xf32> to vector<8x256xf32>
    %58 = arith.addf %55, %57 : vector<8x256xf32>
    %c6 = arith.constant 6 : index
    %c0_40 = arith.constant 0 : index
    %c0_41 = arith.constant 0 : index
    %59 = vector.load %arg12[%c6, %c0_40, %c0_41] : memref<8x8x256xf32, #tpu.memory_space<vmem>>, vector<1x8x256xf32>
    %60 = vector.shape_cast %59 : vector<1x8x256xf32> to vector<8x256xf32>
    %61 = arith.addf %58, %60 : vector<8x256xf32>
    %62 = arith.negf %61 : vector<8x256xf32>
    %63 = math.exp %62 : vector<8x256xf32>
    %cst_42 = arith.constant 1.000000e+00 : f32
    %64 = vector.broadcast %cst_42 : f32 to vector<8x256xf32>
    %65 = arith.addf %64, %63 : vector<8x256xf32>
    %66 = arith.divf %64, %65 : vector<8x256xf32>
    %67 = math.tanh %61 : vector<8x256xf32>
    %68 = vector.extract_strided_slice %66 {offsets = [0, 0], sizes = [8, 64], strides = [1, 1]} : vector<8x256xf32> to vector<8x64xf32>
    %69 = vector.extract_strided_slice %66 {offsets = [0, 64], sizes = [8, 64], strides = [1, 1]} : vector<8x256xf32> to vector<8x64xf32>
    %70 = vector.extract_strided_slice %67 {offsets = [0, 128], sizes = [8, 64], strides = [1, 1]} : vector<8x256xf32> to vector<8x64xf32>
    %71 = vector.extract_strided_slice %66 {offsets = [0, 192], sizes = [8, 64], strides = [1, 1]} : vector<8x256xf32> to vector<8x64xf32>
    %72 = arith.mulf %69, %43 : vector<8x64xf32>
    %73 = arith.mulf %68, %70 : vector<8x64xf32>
    %74 = arith.addf %72, %73 : vector<8x64xf32>
    %75 = math.tanh %74 : vector<8x64xf32>
    %76 = arith.mulf %71, %75 : vector<8x64xf32>
    %77 = vector.extract_strided_slice %76 {offsets = [0, 0], sizes = [8, 32], strides = [1, 1]} : vector<8x64xf32> to vector<8x32xf32>
    %c1_43 = arith.constant 1 : index
    %c0_44 = arith.constant 0 : index
    %c0_45 = arith.constant 0 : index
    %78 = vector.load %arg13[%c1_43, %c0_44, %c0_45] : memref<8x8x32xf32, #tpu.memory_space<vmem>>, vector<1x8x32xf32>
    %79 = vector.shape_cast %78 : vector<1x8x32xf32> to vector<8x32xf32>
    %80 = vector.shape_cast %77 : vector<8x32xf32> to vector<1x8x32xf32>
    tpu.vector_store %arg13[%c1_43, %c0_44, %c0_45], %80 {strides = array<i32>} : memref<8x8x32xf32, #tpu.memory_space<vmem>>, vector<1x8x32xf32>,
    %81 = vector.extract_strided_slice %76 {offsets = [0, 32], sizes = [8, 32], strides = [1, 1]} : vector<8x64xf32> to vector<8x32xf32>
    %c6_46 = arith.constant 6 : index
    %c0_47 = arith.constant 0 : index
    %c0_48 = arith.constant 0 : index
    %82 = vector.load %arg14[%c6_46, %c0_47, %c0_48] : memref<8x8x32xf32, #tpu.memory_space<vmem>>, vector<1x8x32xf32>
    %83 = vector.shape_cast %82 : vector<1x8x32xf32> to vector<8x32xf32>
    %84 = vector.shape_cast %81 : vector<8x32xf32> to vector<1x8x32xf32>
    tpu.vector_store %arg14[%c6_46, %c0_47, %c0_48], %84 {strides = array<i32>} : memref<8x8x32xf32, #tpu.memory_space<vmem>>, vector<1x8x32xf32>,
    %85 = arith.truncf %76 : vector<8x64xf32> to vector<8x64xbf16>
    %cst_49 = arith.constant dense<0.000000e+00> : vector<8x256xf32>
    %86 = tpu.matmul %85, %20, %cst_49 {dimension_numbers = #tpu.dot_dimension_numbers<[1], [0], [0], [1], [0, 0, 1, 1], [], []>} : vector<8x64xbf16>, vector<64x256xbf16>, vector<8x256xf32> -> vector<8x256xf32>
    %c2 = arith.constant 2 : index
    %c0_50 = arith.constant 0 : index
    %c0_51 = arith.constant 0 : index
    %87 = vector.load %arg11[%c2, %c0_50, %c0_51] : memref<8x8x256xf32, #tpu.memory_space<vmem>>, vector<1x8x256xf32>
    %88 = vector.shape_cast %87 : vector<1x8x256xf32> to vector<8x256xf32>
    %89 = arith.addf %86, %88 : vector<8x256xf32>
    %c5 = arith.constant 5 : index
    %c0_52 = arith.constant 0 : index
    %c0_53 = arith.constant 0 : index
    %90 = vector.load %arg12[%c5, %c0_52, %c0_53] : memref<8x8x256xf32, #tpu.memory_space<vmem>>, vector<1x8x256xf32>
    %91 = vector.shape_cast %90 : vector<1x8x256xf32> to vector<8x256xf32>
    %92 = arith.addf %89, %91 : vector<8x256xf32>
    %93 = arith.negf %92 : vector<8x256xf32>
    %94 = math.exp %93 : vector<8x256xf32>
    %cst_54 = arith.constant 1.000000e+00 : f32
    %95 = vector.broadcast %cst_54 : f32 to vector<8x256xf32>
    %96 = arith.addf %95, %94 : vector<8x256xf32>
    %97 = arith.divf %95, %96 : vector<8x256xf32>
    %98 = math.tanh %92 : vector<8x256xf32>
    %99 = vector.extract_strided_slice %97 {offsets = [0, 0], sizes = [8, 64], strides = [1, 1]} : vector<8x256xf32> to vector<8x64xf32>
    %100 = vector.extract_strided_slice %97 {offsets = [0, 64], sizes = [8, 64], strides = [1, 1]} : vector<8x256xf32> to vector<8x64xf32>
    %101 = vector.extract_strided_slice %98 {offsets = [0, 128], sizes = [8, 64], strides = [1, 1]} : vector<8x256xf32> to vector<8x64xf32>
    %102 = vector.extract_strided_slice %97 {offsets = [0, 192], sizes = [8, 64], strides = [1, 1]} : vector<8x256xf32> to vector<8x64xf32>
    %103 = arith.mulf %100, %74 : vector<8x64xf32>
    %104 = arith.mulf %99, %101 : vector<8x64xf32>
    %105 = arith.addf %103, %104 : vector<8x64xf32>
    %106 = math.tanh %105 : vector<8x64xf32>
    %107 = arith.mulf %102, %106 : vector<8x64xf32>
    %108 = vector.extract_strided_slice %107 {offsets = [0, 0], sizes = [8, 32], strides = [1, 1]} : vector<8x64xf32> to vector<8x32xf32>
    %c2_55 = arith.constant 2 : index
    %c0_56 = arith.constant 0 : index
    %c0_57 = arith.constant 0 : index
    %109 = vector.load %arg13[%c2_55, %c0_56, %c0_57] : memref<8x8x32xf32, #tpu.memory_space<vmem>>, vector<1x8x32xf32>
    %110 = vector.shape_cast %109 : vector<1x8x32xf32> to vector<8x32xf32>
    %111 = vector.shape_cast %108 : vector<8x32xf32> to vector<1x8x32xf32>
    tpu.vector_store %arg13[%c2_55, %c0_56, %c0_57], %111 {strides = array<i32>} : memref<8x8x32xf32, #tpu.memory_space<vmem>>, vector<1x8x32xf32>,
    %112 = vector.extract_strided_slice %107 {offsets = [0, 32], sizes = [8, 32], strides = [1, 1]} : vector<8x64xf32> to vector<8x32xf32>
    %c5_58 = arith.constant 5 : index
    %c0_59 = arith.constant 0 : index
    %c0_60 = arith.constant 0 : index
    %113 = vector.load %arg14[%c5_58, %c0_59, %c0_60] : memref<8x8x32xf32, #tpu.memory_space<vmem>>, vector<1x8x32xf32>
    %114 = vector.shape_cast %113 : vector<1x8x32xf32> to vector<8x32xf32>
    %115 = vector.shape_cast %112 : vector<8x32xf32> to vector<1x8x32xf32>
    tpu.vector_store %arg14[%c5_58, %c0_59, %c0_60], %115 {strides = array<i32>} : memref<8x8x32xf32, #tpu.memory_space<vmem>>, vector<1x8x32xf32>,
    %116 = arith.truncf %107 : vector<8x64xf32> to vector<8x64xbf16>
    %cst_61 = arith.constant dense<0.000000e+00> : vector<8x256xf32>
    %117 = tpu.matmul %116, %20, %cst_61 {dimension_numbers = #tpu.dot_dimension_numbers<[1], [0], [0], [1], [0, 0, 1, 1], [], []>} : vector<8x64xbf16>, vector<64x256xbf16>, vector<8x256xf32> -> vector<8x256xf32>
    %c3 = arith.constant 3 : index
    %c0_62 = arith.constant 0 : index
    %c0_63 = arith.constant 0 : index
    %118 = vector.load %arg11[%c3, %c0_62, %c0_63] : memref<8x8x256xf32, #tpu.memory_space<vmem>>, vector<1x8x256xf32>
    %119 = vector.shape_cast %118 : vector<1x8x256xf32> to vector<8x256xf32>
    %120 = arith.addf %117, %119 : vector<8x256xf32>
    %c4 = arith.constant 4 : index
    %c0_64 = arith.constant 0 : index
    %c0_65 = arith.constant 0 : index
    %121 = vector.load %arg12[%c4, %c0_64, %c0_65] : memref<8x8x256xf32, #tpu.memory_space<vmem>>, vector<1x8x256xf32>
    %122 = vector.shape_cast %121 : vector<1x8x256xf32> to vector<8x256xf32>
    %123 = arith.addf %120, %122 : vector<8x256xf32>
    %124 = arith.negf %123 : vector<8x256xf32>
    %125 = math.exp %124 : vector<8x256xf32>
    %cst_66 = arith.constant 1.000000e+00 : f32
    %126 = vector.broadcast %cst_66 : f32 to vector<8x256xf32>
    %127 = arith.addf %126, %125 : vector<8x256xf32>
    %128 = arith.divf %126, %127 : vector<8x256xf32>
    %129 = math.tanh %123 : vector<8x256xf32>
    %130 = vector.extract_strided_slice %128 {offsets = [0, 0], sizes = [8, 64], strides = [1, 1]} : vector<8x256xf32> to vector<8x64xf32>
    %131 = vector.extract_strided_slice %128 {offsets = [0, 64], sizes = [8, 64], strides = [1, 1]} : vector<8x256xf32> to vector<8x64xf32>
    %132 = vector.extract_strided_slice %129 {offsets = [0, 128], sizes = [8, 64], strides = [1, 1]} : vector<8x256xf32> to vector<8x64xf32>
    %133 = vector.extract_strided_slice %128 {offsets = [0, 192], sizes = [8, 64], strides = [1, 1]} : vector<8x256xf32> to vector<8x64xf32>
    %134 = arith.mulf %131, %105 : vector<8x64xf32>
    %135 = arith.mulf %130, %132 : vector<8x64xf32>
    %136 = arith.addf %134, %135 : vector<8x64xf32>
    %137 = math.tanh %136 : vector<8x64xf32>
    %138 = arith.mulf %133, %137 : vector<8x64xf32>
    %139 = vector.extract_strided_slice %138 {offsets = [0, 0], sizes = [8, 32], strides = [1, 1]} : vector<8x64xf32> to vector<8x32xf32>
    %c3_67 = arith.constant 3 : index
    %c0_68 = arith.constant 0 : index
    %c0_69 = arith.constant 0 : index
    %140 = vector.load %arg13[%c3_67, %c0_68, %c0_69] : memref<8x8x32xf32, #tpu.memory_space<vmem>>, vector<1x8x32xf32>
    %141 = vector.shape_cast %140 : vector<1x8x32xf32> to vector<8x32xf32>
    %142 = vector.shape_cast %139 : vector<8x32xf32> to vector<1x8x32xf32>
    tpu.vector_store %arg13[%c3_67, %c0_68, %c0_69], %142 {strides = array<i32>} : memref<8x8x32xf32, #tpu.memory_space<vmem>>, vector<1x8x32xf32>,
    %143 = vector.extract_strided_slice %138 {offsets = [0, 32], sizes = [8, 32], strides = [1, 1]} : vector<8x64xf32> to vector<8x32xf32>
    %c4_70 = arith.constant 4 : index
    %c0_71 = arith.constant 0 : index
    %c0_72 = arith.constant 0 : index
    %144 = vector.load %arg14[%c4_70, %c0_71, %c0_72] : memref<8x8x32xf32, #tpu.memory_space<vmem>>, vector<1x8x32xf32>
    %145 = vector.shape_cast %144 : vector<1x8x32xf32> to vector<8x32xf32>
    %146 = vector.shape_cast %143 : vector<8x32xf32> to vector<1x8x32xf32>
    tpu.vector_store %arg14[%c4_70, %c0_71, %c0_72], %146 {strides = array<i32>} : memref<8x8x32xf32, #tpu.memory_space<vmem>>, vector<1x8x32xf32>,
    %147 = arith.truncf %138 : vector<8x64xf32> to vector<8x64xbf16>
    %cst_73 = arith.constant dense<0.000000e+00> : vector<8x256xf32>
    %148 = tpu.matmul %147, %20, %cst_73 {dimension_numbers = #tpu.dot_dimension_numbers<[1], [0], [0], [1], [0, 0, 1, 1], [], []>} : vector<8x64xbf16>, vector<64x256xbf16>, vector<8x256xf32> -> vector<8x256xf32>
    %c4_74 = arith.constant 4 : index
    %c0_75 = arith.constant 0 : index
    %c0_76 = arith.constant 0 : index
    %149 = vector.load %arg11[%c4_74, %c0_75, %c0_76] : memref<8x8x256xf32, #tpu.memory_space<vmem>>, vector<1x8x256xf32>
    %150 = vector.shape_cast %149 : vector<1x8x256xf32> to vector<8x256xf32>
    %151 = arith.addf %148, %150 : vector<8x256xf32>
    %c3_77 = arith.constant 3 : index
    %c0_78 = arith.constant 0 : index
    %c0_79 = arith.constant 0 : index
    %152 = vector.load %arg12[%c3_77, %c0_78, %c0_79] : memref<8x8x256xf32, #tpu.memory_space<vmem>>, vector<1x8x256xf32>
    %153 = vector.shape_cast %152 : vector<1x8x256xf32> to vector<8x256xf32>
    %154 = arith.addf %151, %153 : vector<8x256xf32>
    %155 = arith.negf %154 : vector<8x256xf32>
    %156 = math.exp %155 : vector<8x256xf32>
    %cst_80 = arith.constant 1.000000e+00 : f32
    %157 = vector.broadcast %cst_80 : f32 to vector<8x256xf32>
    %158 = arith.addf %157, %156 : vector<8x256xf32>
    %159 = arith.divf %157, %158 : vector<8x256xf32>
    %160 = math.tanh %154 : vector<8x256xf32>
    %161 = vector.extract_strided_slice %159 {offsets = [0, 0], sizes = [8, 64], strides = [1, 1]} : vector<8x256xf32> to vector<8x64xf32>
    %162 = vector.extract_strided_slice %159 {offsets = [0, 64], sizes = [8, 64], strides = [1, 1]} : vector<8x256xf32> to vector<8x64xf32>
    %163 = vector.extract_strided_slice %160 {offsets = [0, 128], sizes = [8, 64], strides = [1, 1]} : vector<8x256xf32> to vector<8x64xf32>
    %164 = vector.extract_strided_slice %159 {offsets = [0, 192], sizes = [8, 64], strides = [1, 1]} : vector<8x256xf32> to vector<8x64xf32>
    %165 = arith.mulf %162, %136 : vector<8x64xf32>
    %166 = arith.mulf %161, %163 : vector<8x64xf32>
    %167 = arith.addf %165, %166 : vector<8x64xf32>
    %168 = math.tanh %167 : vector<8x64xf32>
    %169 = arith.mulf %164, %168 : vector<8x64xf32>
    %170 = vector.extract_strided_slice %169 {offsets = [0, 0], sizes = [8, 32], strides = [1, 1]} : vector<8x64xf32> to vector<8x32xf32>
    %c4_81 = arith.constant 4 : index
    %c0_82 = arith.constant 0 : index
    %c0_83 = arith.constant 0 : index
    %171 = vector.load %arg13[%c4_81, %c0_82, %c0_83] : memref<8x8x32xf32, #tpu.memory_space<vmem>>, vector<1x8x32xf32>
    %172 = vector.shape_cast %171 : vector<1x8x32xf32> to vector<8x32xf32>
    %173 = vector.shape_cast %170 : vector<8x32xf32> to vector<1x8x32xf32>
    tpu.vector_store %arg13[%c4_81, %c0_82, %c0_83], %173 {strides = array<i32>} : memref<8x8x32xf32, #tpu.memory_space<vmem>>, vector<1x8x32xf32>,
    %174 = vector.extract_strided_slice %169 {offsets = [0, 32], sizes = [8, 32], strides = [1, 1]} : vector<8x64xf32> to vector<8x32xf32>
    %c3_84 = arith.constant 3 : index
    %c0_85 = arith.constant 0 : index
    %c0_86 = arith.constant 0 : index
    %175 = vector.load %arg14[%c3_84, %c0_85, %c0_86] : memref<8x8x32xf32, #tpu.memory_space<vmem>>, vector<1x8x32xf32>
    %176 = vector.shape_cast %175 : vector<1x8x32xf32> to vector<8x32xf32>
    %177 = vector.shape_cast %174 : vector<8x32xf32> to vector<1x8x32xf32>
    tpu.vector_store %arg14[%c3_84, %c0_85, %c0_86], %177 {strides = array<i32>} : memref<8x8x32xf32, #tpu.memory_space<vmem>>, vector<1x8x32xf32>,
    %178 = arith.truncf %169 : vector<8x64xf32> to vector<8x64xbf16>
    %cst_87 = arith.constant dense<0.000000e+00> : vector<8x256xf32>
    %179 = tpu.matmul %178, %20, %cst_87 {dimension_numbers = #tpu.dot_dimension_numbers<[1], [0], [0], [1], [0, 0, 1, 1], [], []>} : vector<8x64xbf16>, vector<64x256xbf16>, vector<8x256xf32> -> vector<8x256xf32>
    %c5_88 = arith.constant 5 : index
    %c0_89 = arith.constant 0 : index
    %c0_90 = arith.constant 0 : index
    %180 = vector.load %arg11[%c5_88, %c0_89, %c0_90] : memref<8x8x256xf32, #tpu.memory_space<vmem>>, vector<1x8x256xf32>
    %181 = vector.shape_cast %180 : vector<1x8x256xf32> to vector<8x256xf32>
    %182 = arith.addf %179, %181 : vector<8x256xf32>
    %c2_91 = arith.constant 2 : index
    %c0_92 = arith.constant 0 : index
    %c0_93 = arith.constant 0 : index
    %183 = vector.load %arg12[%c2_91, %c0_92, %c0_93] : memref<8x8x256xf32, #tpu.memory_space<vmem>>, vector<1x8x256xf32>
    %184 = vector.shape_cast %183 : vector<1x8x256xf32> to vector<8x256xf32>
    %185 = arith.addf %182, %184 : vector<8x256xf32>
    %186 = arith.negf %185 : vector<8x256xf32>
    %187 = math.exp %186 : vector<8x256xf32>
    %cst_94 = arith.constant 1.000000e+00 : f32
    %188 = vector.broadcast %cst_94 : f32 to vector<8x256xf32>
    %189 = arith.addf %188, %187 : vector<8x256xf32>
    %190 = arith.divf %188, %189 : vector<8x256xf32>
    %191 = math.tanh %185 : vector<8x256xf32>
    %192 = vector.extract_strided_slice %190 {offsets = [0, 0], sizes = [8, 64], strides = [1, 1]} : vector<8x256xf32> to vector<8x64xf32>
    %193 = vector.extract_strided_slice %190 {offsets = [0, 64], sizes = [8, 64], strides = [1, 1]} : vector<8x256xf32> to vector<8x64xf32>
    %194 = vector.extract_strided_slice %191 {offsets = [0, 128], sizes = [8, 64], strides = [1, 1]} : vector<8x256xf32> to vector<8x64xf32>
    %195 = vector.extract_strided_slice %190 {offsets = [0, 192], sizes = [8, 64], strides = [1, 1]} : vector<8x256xf32> to vector<8x64xf32>
    %196 = arith.mulf %193, %167 : vector<8x64xf32>
    %197 = arith.mulf %192, %194 : vector<8x64xf32>
    %198 = arith.addf %196, %197 : vector<8x64xf32>
    %199 = math.tanh %198 : vector<8x64xf32>
    %200 = arith.mulf %195, %199 : vector<8x64xf32>
    %201 = vector.extract_strided_slice %200 {offsets = [0, 0], sizes = [8, 32], strides = [1, 1]} : vector<8x64xf32> to vector<8x32xf32>
    %c5_95 = arith.constant 5 : index
    %c0_96 = arith.constant 0 : index
    %c0_97 = arith.constant 0 : index
    %202 = vector.load %arg13[%c5_95, %c0_96, %c0_97] : memref<8x8x32xf32, #tpu.memory_space<vmem>>, vector<1x8x32xf32>
    %203 = vector.shape_cast %202 : vector<1x8x32xf32> to vector<8x32xf32>
    %204 = vector.shape_cast %201 : vector<8x32xf32> to vector<1x8x32xf32>
    tpu.vector_store %arg13[%c5_95, %c0_96, %c0_97], %204 {strides = array<i32>} : memref<8x8x32xf32, #tpu.memory_space<vmem>>, vector<1x8x32xf32>,
    %205 = vector.extract_strided_slice %200 {offsets = [0, 32], sizes = [8, 32], strides = [1, 1]} : vector<8x64xf32> to vector<8x32xf32>
    %c2_98 = arith.constant 2 : index
    %c0_99 = arith.constant 0 : index
    %c0_100 = arith.constant 0 : index
    %206 = vector.load %arg14[%c2_98, %c0_99, %c0_100] : memref<8x8x32xf32, #tpu.memory_space<vmem>>, vector<1x8x32xf32>
    %207 = vector.shape_cast %206 : vector<1x8x32xf32> to vector<8x32xf32>
    %208 = vector.shape_cast %205 : vector<8x32xf32> to vector<1x8x32xf32>
    tpu.vector_store %arg14[%c2_98, %c0_99, %c0_100], %208 {strides = array<i32>} : memref<8x8x32xf32, #tpu.memory_space<vmem>>, vector<1x8x32xf32>,
    %209 = arith.truncf %200 : vector<8x64xf32> to vector<8x64xbf16>
    %cst_101 = arith.constant dense<0.000000e+00> : vector<8x256xf32>
    %210 = tpu.matmul %209, %20, %cst_101 {dimension_numbers = #tpu.dot_dimension_numbers<[1], [0], [0], [1], [0, 0, 1, 1], [], []>} : vector<8x64xbf16>, vector<64x256xbf16>, vector<8x256xf32> -> vector<8x256xf32>
    %c6_102 = arith.constant 6 : index
    %c0_103 = arith.constant 0 : index
    %c0_104 = arith.constant 0 : index
    %211 = vector.load %arg11[%c6_102, %c0_103, %c0_104] : memref<8x8x256xf32, #tpu.memory_space<vmem>>, vector<1x8x256xf32>
    %212 = vector.shape_cast %211 : vector<1x8x256xf32> to vector<8x256xf32>
    %213 = arith.addf %210, %212 : vector<8x256xf32>
    %c1_105 = arith.constant 1 : index
    %c0_106 = arith.constant 0 : index
    %c0_107 = arith.constant 0 : index
    %214 = vector.load %arg12[%c1_105, %c0_106, %c0_107] : memref<8x8x256xf32, #tpu.memory_space<vmem>>, vector<1x8x256xf32>
    %215 = vector.shape_cast %214 : vector<1x8x256xf32> to vector<8x256xf32>
    %216 = arith.addf %213, %215 : vector<8x256xf32>
    %217 = arith.negf %216 : vector<8x256xf32>
    %218 = math.exp %217 : vector<8x256xf32>
    %cst_108 = arith.constant 1.000000e+00 : f32
    %219 = vector.broadcast %cst_108 : f32 to vector<8x256xf32>
    %220 = arith.addf %219, %218 : vector<8x256xf32>
    %221 = arith.divf %219, %220 : vector<8x256xf32>
    %222 = math.tanh %216 : vector<8x256xf32>
    %223 = vector.extract_strided_slice %221 {offsets = [0, 0], sizes = [8, 64], strides = [1, 1]} : vector<8x256xf32> to vector<8x64xf32>
    %224 = vector.extract_strided_slice %221 {offsets = [0, 64], sizes = [8, 64], strides = [1, 1]} : vector<8x256xf32> to vector<8x64xf32>
    %225 = vector.extract_strided_slice %222 {offsets = [0, 128], sizes = [8, 64], strides = [1, 1]} : vector<8x256xf32> to vector<8x64xf32>
    %226 = vector.extract_strided_slice %221 {offsets = [0, 192], sizes = [8, 64], strides = [1, 1]} : vector<8x256xf32> to vector<8x64xf32>
    %227 = arith.mulf %224, %198 : vector<8x64xf32>
    %228 = arith.mulf %223, %225 : vector<8x64xf32>
    %229 = arith.addf %227, %228 : vector<8x64xf32>
    %230 = math.tanh %229 : vector<8x64xf32>
    %231 = arith.mulf %226, %230 : vector<8x64xf32>
    %232 = vector.extract_strided_slice %231 {offsets = [0, 0], sizes = [8, 32], strides = [1, 1]} : vector<8x64xf32> to vector<8x32xf32>
    %c6_109 = arith.constant 6 : index
    %c0_110 = arith.constant 0 : index
    %c0_111 = arith.constant 0 : index
    %233 = vector.load %arg13[%c6_109, %c0_110, %c0_111] : memref<8x8x32xf32, #tpu.memory_space<vmem>>, vector<1x8x32xf32>
    %234 = vector.shape_cast %233 : vector<1x8x32xf32> to vector<8x32xf32>
    %235 = vector.shape_cast %232 : vector<8x32xf32> to vector<1x8x32xf32>
    tpu.vector_store %arg13[%c6_109, %c0_110, %c0_111], %235 {strides = array<i32>} : memref<8x8x32xf32, #tpu.memory_space<vmem>>, vector<1x8x32xf32>,
    %236 = vector.extract_strided_slice %231 {offsets = [0, 32], sizes = [8, 32], strides = [1, 1]} : vector<8x64xf32> to vector<8x32xf32>
    %c1_112 = arith.constant 1 : index
    %c0_113 = arith.constant 0 : index
    %c0_114 = arith.constant 0 : index
    %237 = vector.load %arg14[%c1_112, %c0_113, %c0_114] : memref<8x8x32xf32, #tpu.memory_space<vmem>>, vector<1x8x32xf32>
    %238 = vector.shape_cast %237 : vector<1x8x32xf32> to vector<8x32xf32>
    %239 = vector.shape_cast %236 : vector<8x32xf32> to vector<1x8x32xf32>
    tpu.vector_store %arg14[%c1_112, %c0_113, %c0_114], %239 {strides = array<i32>} : memref<8x8x32xf32, #tpu.memory_space<vmem>>, vector<1x8x32xf32>,
    %240 = arith.truncf %231 : vector<8x64xf32> to vector<8x64xbf16>
    %cst_115 = arith.constant dense<0.000000e+00> : vector<8x256xf32>
    %241 = tpu.matmul %240, %20, %cst_115 {dimension_numbers = #tpu.dot_dimension_numbers<[1], [0], [0], [1], [0, 0, 1, 1], [], []>} : vector<8x64xbf16>, vector<64x256xbf16>, vector<8x256xf32> -> vector<8x256xf32>
    %c7_116 = arith.constant 7 : index
    %c0_117 = arith.constant 0 : index
    %c0_118 = arith.constant 0 : index
    %242 = vector.load %arg11[%c7_116, %c0_117, %c0_118] : memref<8x8x256xf32, #tpu.memory_space<vmem>>, vector<1x8x256xf32>
    %243 = vector.shape_cast %242 : vector<1x8x256xf32> to vector<8x256xf32>
    %244 = arith.addf %241, %243 : vector<8x256xf32>
    %c0_119 = arith.constant 0 : index
    %c0_120 = arith.constant 0 : index
    %c0_121 = arith.constant 0 : index
    %245 = vector.load %arg12[%c0_119, %c0_120, %c0_121] : memref<8x8x256xf32, #tpu.memory_space<vmem>>, vector<1x8x256xf32>
    %246 = vector.shape_cast %245 : vector<1x8x256xf32> to vector<8x256xf32>
    %247 = arith.addf %244, %246 : vector<8x256xf32>
    %248 = arith.negf %247 : vector<8x256xf32>
    %249 = math.exp %248 : vector<8x256xf32>
    %cst_122 = arith.constant 1.000000e+00 : f32
    %250 = vector.broadcast %cst_122 : f32 to vector<8x256xf32>
    %251 = arith.addf %250, %249 : vector<8x256xf32>
    %252 = arith.divf %250, %251 : vector<8x256xf32>
    %253 = math.tanh %247 : vector<8x256xf32>
    %254 = vector.extract_strided_slice %252 {offsets = [0, 0], sizes = [8, 64], strides = [1, 1]} : vector<8x256xf32> to vector<8x64xf32>
    %255 = vector.extract_strided_slice %252 {offsets = [0, 64], sizes = [8, 64], strides = [1, 1]} : vector<8x256xf32> to vector<8x64xf32>
    %256 = vector.extract_strided_slice %253 {offsets = [0, 128], sizes = [8, 64], strides = [1, 1]} : vector<8x256xf32> to vector<8x64xf32>
    %257 = vector.extract_strided_slice %252 {offsets = [0, 192], sizes = [8, 64], strides = [1, 1]} : vector<8x256xf32> to vector<8x64xf32>
    %258 = arith.mulf %255, %229 : vector<8x64xf32>
    %259 = arith.mulf %254, %256 : vector<8x64xf32>
    %260 = arith.addf %258, %259 : vector<8x64xf32>
    %261 = math.tanh %260 : vector<8x64xf32>
    %262 = arith.mulf %257, %261 : vector<8x64xf32>
    %263 = vector.extract_strided_slice %262 {offsets = [0, 0], sizes = [8, 32], strides = [1, 1]} : vector<8x64xf32> to vector<8x32xf32>
    %c7_123 = arith.constant 7 : index
    %c0_124 = arith.constant 0 : index
    %c0_125 = arith.constant 0 : index
    %264 = vector.load %arg13[%c7_123, %c0_124, %c0_125] : memref<8x8x32xf32, #tpu.memory_space<vmem>>, vector<1x8x32xf32>
    %265 = vector.shape_cast %264 : vector<1x8x32xf32> to vector<8x32xf32>
    %266 = vector.shape_cast %263 : vector<8x32xf32> to vector<1x8x32xf32>
    tpu.vector_store %arg13[%c7_123, %c0_124, %c0_125], %266 {strides = array<i32>} : memref<8x8x32xf32, #tpu.memory_space<vmem>>, vector<1x8x32xf32>,
    %267 = vector.extract_strided_slice %262 {offsets = [0, 32], sizes = [8, 32], strides = [1, 1]} : vector<8x64xf32> to vector<8x32xf32>
    %c0_126 = arith.constant 0 : index
    %c0_127 = arith.constant 0 : index
    %c0_128 = arith.constant 0 : index
    %268 = vector.load %arg14[%c0_126, %c0_127, %c0_128] : memref<8x8x32xf32, #tpu.memory_space<vmem>>, vector<1x8x32xf32>
    %269 = vector.shape_cast %268 : vector<1x8x32xf32> to vector<8x32xf32>
    %270 = vector.shape_cast %267 : vector<8x32xf32> to vector<1x8x32xf32>
    tpu.vector_store %arg14[%c0_126, %c0_127, %c0_128], %270 {strides = array<i32>} : memref<8x8x32xf32, #tpu.memory_space<vmem>>, vector<1x8x32xf32>,
    %c0_129 = arith.constant 0 : index
    %c0_130 = arith.constant 0 : index
    %c0_131 = arith.constant 0 : index
    %271 = vector.load %arg13[%c0_129, %c0_130, %c0_131] : memref<8x8x32xf32, #tpu.memory_space<vmem>>, vector<8x8x32xf32>
    %272 = vector.shape_cast %271 : vector<8x8x32xf32> to vector<64x32xf32>
    %273 = arith.truncf %272 : vector<64x32xf32> to vector<64x32xbf16>
    %c0_132 = arith.constant 0 : index
    %c0_133 = arith.constant 0 : index
    %c0_134 = arith.constant 0 : index
    %274 = vector.load %arg14[%c0_132, %c0_133, %c0_134] : memref<8x8x32xf32, #tpu.memory_space<vmem>>, vector<8x8x32xf32>
    %275 = vector.shape_cast %274 : vector<8x8x32xf32> to vector<64x32xf32>
    %276 = arith.truncf %275 : vector<64x32xf32> to vector<64x32xbf16>
    %c0_135 = arith.constant 0 : index
    %c0_136 = arith.constant 0 : index
    %c0_137 = arith.constant 0 : index
    %277 = vector.load %arg5[%c0_135, %c0_136, %c0_137] : memref<4x32x256xbf16, #tpu.memory_space<vmem>>, vector<1x32x256xbf16>
    %278 = vector.shape_cast %277 : vector<1x32x256xbf16> to vector<32x256xbf16>
    %cst_138 = arith.constant dense<0.000000e+00> : vector<64x256xf32>
    %279 = tpu.matmul %273, %278, %cst_138 {dimension_numbers = #tpu.dot_dimension_numbers<[1], [0], [0], [1], [0, 0, 1, 1], [], []>} : vector<64x32xbf16>, vector<32x256xbf16>, vector<64x256xf32> -> vector<64x256xf32>
    %c1_139 = arith.constant 1 : index
    %c0_140 = arith.constant 0 : index
    %c0_141 = arith.constant 0 : index
    %280 = vector.load %arg5[%c1_139, %c0_140, %c0_141] : memref<4x32x256xbf16, #tpu.memory_space<vmem>>, vector<1x32x256xbf16>
    %281 = vector.shape_cast %280 : vector<1x32x256xbf16> to vector<32x256xbf16>
    %cst_142 = arith.constant dense<0.000000e+00> : vector<64x256xf32>
    %282 = tpu.matmul %276, %281, %cst_142 {dimension_numbers = #tpu.dot_dimension_numbers<[1], [0], [0], [1], [0, 0, 1, 1], [], []>} : vector<64x32xbf16>, vector<32x256xbf16>, vector<64x256xf32> -> vector<64x256xf32>
    %283 = arith.addf %279, %282 : vector<64x256xf32>
    %c0_143 = arith.constant 0 : index
    %c0_144 = arith.constant 0 : index
    %c0_145 = arith.constant 0 : index
    %284 = vector.load %arg6[%c0_143, %c0_144, %c0_145] : memref<2x1x256xf32, #tpu.memory_space<vmem>>, vector<1x1x256xf32>
    %285 = vector.shape_cast %284 : vector<1x1x256xf32> to vector<1x256xf32>
    %286 = vector.broadcast %285 : vector<1x256xf32> to vector<64x256xf32>
    %287 = arith.addf %283, %286 : vector<64x256xf32>
    %c2_146 = arith.constant 2 : index
    %c0_147 = arith.constant 0 : index
    %c0_148 = arith.constant 0 : index
    %288 = vector.load %arg5[%c2_146, %c0_147, %c0_148] : memref<4x32x256xbf16, #tpu.memory_space<vmem>>, vector<1x32x256xbf16>
    %289 = vector.shape_cast %288 : vector<1x32x256xbf16> to vector<32x256xbf16>
    %cst_149 = arith.constant dense<0.000000e+00> : vector<64x256xf32>
    %290 = tpu.matmul %273, %289, %cst_149 {dimension_numbers = #tpu.dot_dimension_numbers<[1], [0], [0], [1], [0, 0, 1, 1], [], []>} : vector<64x32xbf16>, vector<32x256xbf16>, vector<64x256xf32> -> vector<64x256xf32>
    %c3_150 = arith.constant 3 : index
    %c0_151 = arith.constant 0 : index
    %c0_152 = arith.constant 0 : index
    %291 = vector.load %arg5[%c3_150, %c0_151, %c0_152] : memref<4x32x256xbf16, #tpu.memory_space<vmem>>, vector<1x32x256xbf16>
    %292 = vector.shape_cast %291 : vector<1x32x256xbf16> to vector<32x256xbf16>
    %cst_153 = arith.constant dense<0.000000e+00> : vector<64x256xf32>
    %293 = tpu.matmul %276, %292, %cst_153 {dimension_numbers = #tpu.dot_dimension_numbers<[1], [0], [0], [1], [0, 0, 1, 1], [], []>} : vector<64x32xbf16>, vector<32x256xbf16>, vector<64x256xf32> -> vector<64x256xf32>
    %294 = arith.addf %290, %293 : vector<64x256xf32>
    %c1_154 = arith.constant 1 : index
    %c0_155 = arith.constant 0 : index
    %c0_156 = arith.constant 0 : index
    %295 = vector.load %arg6[%c1_154, %c0_155, %c0_156] : memref<2x1x256xf32, #tpu.memory_space<vmem>>, vector<1x1x256xf32>
    %296 = vector.shape_cast %295 : vector<1x1x256xf32> to vector<1x256xf32>
    %297 = vector.broadcast %296 : vector<1x256xf32> to vector<64x256xf32>
    %298 = arith.addf %294, %297 : vector<64x256xf32>
    %299 = vector.shape_cast %287 : vector<64x256xf32> to vector<8x8x256xf32>
    %c0_157 = arith.constant 0 : index
    %c0_158 = arith.constant 0 : index
    %c0_159 = arith.constant 0 : index
    %300 = vector.load %arg11[%c0_157, %c0_158, %c0_159] : memref<8x8x256xf32, #tpu.memory_space<vmem>>, vector<8x8x256xf32>
    tpu.vector_store %arg11[%c0_157, %c0_158, %c0_159], %299 {strides = array<i32>} : memref<8x8x256xf32, #tpu.memory_space<vmem>>, vector<8x8x256xf32>,
    %301 = vector.shape_cast %298 : vector<64x256xf32> to vector<8x8x256xf32>
    %c0_160 = arith.constant 0 : index
    %c0_161 = arith.constant 0 : index
    %c0_162 = arith.constant 0 : index
    %302 = vector.load %arg12[%c0_160, %c0_161, %c0_162] : memref<8x8x256xf32, #tpu.memory_space<vmem>>, vector<8x8x256xf32>
    tpu.vector_store %arg12[%c0_160, %c0_161, %c0_162], %301 {strides = array<i32>} : memref<8x8x256xf32, #tpu.memory_space<vmem>>, vector<8x8x256xf32>,
    %c0_163 = arith.constant 0 : index
    %c0_164 = arith.constant 0 : index
    %303 = vector.load %arg7[%c0_163, %c0_164] : memref<64x256xbf16, #tpu.memory_space<vmem>>, vector<64x256xbf16>
    %cst_165 = arith.constant 0.000000e+00 : f32
    %304 = vector.broadcast %cst_165 : f32 to vector<8x64xf32>
    %cst_166 = arith.constant 0.000000e+00 : f32
    %305 = vector.broadcast %cst_166 : f32 to vector<8x64xf32>
    %306 = arith.truncf %304 : vector<8x64xf32> to vector<8x64xbf16>
    %cst_167 = arith.constant dense<0.000000e+00> : vector<8x256xf32>
    %307 = tpu.matmul %306, %303, %cst_167 {dimension_numbers = #tpu.dot_dimension_numbers<[1], [0], [0], [1], [0, 0, 1, 1], [], []>} : vector<8x64xbf16>, vector<64x256xbf16>, vector<8x256xf32> -> vector<8x256xf32>
    %c0_168 = arith.constant 0 : index
    %c0_169 = arith.constant 0 : index
    %c0_170 = arith.constant 0 : index
    %308 = vector.load %arg11[%c0_168, %c0_169, %c0_170] : memref<8x8x256xf32, #tpu.memory_space<vmem>>, vector<1x8x256xf32>
    %309 = vector.shape_cast %308 : vector<1x8x256xf32> to vector<8x256xf32>
    %310 = arith.addf %307, %309 : vector<8x256xf32>
    %c7_171 = arith.constant 7 : index
    %c0_172 = arith.constant 0 : index
    %c0_173 = arith.constant 0 : index
    %311 = vector.load %arg12[%c7_171, %c0_172, %c0_173] : memref<8x8x256xf32, #tpu.memory_space<vmem>>, vector<1x8x256xf32>
    %312 = vector.shape_cast %311 : vector<1x8x256xf32> to vector<8x256xf32>
    %313 = arith.addf %310, %312 : vector<8x256xf32>
    %314 = arith.negf %313 : vector<8x256xf32>
    %315 = math.exp %314 : vector<8x256xf32>
    %cst_174 = arith.constant 1.000000e+00 : f32
    %316 = vector.broadcast %cst_174 : f32 to vector<8x256xf32>
    %317 = arith.addf %316, %315 : vector<8x256xf32>
    %318 = arith.divf %316, %317 : vector<8x256xf32>
    %319 = math.tanh %313 : vector<8x256xf32>
    %320 = vector.extract_strided_slice %318 {offsets = [0, 0], sizes = [8, 64], strides = [1, 1]} : vector<8x256xf32> to vector<8x64xf32>
    %321 = vector.extract_strided_slice %318 {offsets = [0, 64], sizes = [8, 64], strides = [1, 1]} : vector<8x256xf32> to vector<8x64xf32>
    %322 = vector.extract_strided_slice %319 {offsets = [0, 128], sizes = [8, 64], strides = [1, 1]} : vector<8x256xf32> to vector<8x64xf32>
    %323 = vector.extract_strided_slice %318 {offsets = [0, 192], sizes = [8, 64], strides = [1, 1]} : vector<8x256xf32> to vector<8x64xf32>
    %324 = arith.mulf %321, %305 : vector<8x64xf32>
    %325 = arith.mulf %320, %322 : vector<8x64xf32>
    %326 = arith.addf %324, %325 : vector<8x64xf32>
    %327 = math.tanh %326 : vector<8x64xf32>
    %328 = arith.mulf %323, %327 : vector<8x64xf32>
    %329 = arith.truncf %328 : vector<8x64xf32> to vector<8x64xbf16>
    %cst_175 = arith.constant dense<0.000000e+00> : vector<8x256xf32>
    %330 = tpu.matmul %329, %303, %cst_175 {dimension_numbers = #tpu.dot_dimension_numbers<[1], [0], [0], [1], [0, 0, 1, 1], [], []>} : vector<8x64xbf16>, vector<64x256xbf16>, vector<8x256xf32> -> vector<8x256xf32>
    %c1_176 = arith.constant 1 : index
    %c0_177 = arith.constant 0 : index
    %c0_178 = arith.constant 0 : index
    %331 = vector.load %arg11[%c1_176, %c0_177, %c0_178] : memref<8x8x256xf32, #tpu.memory_space<vmem>>, vector<1x8x256xf32>
    %332 = vector.shape_cast %331 : vector<1x8x256xf32> to vector<8x256xf32>
    %333 = arith.addf %330, %332 : vector<8x256xf32>
    %c6_179 = arith.constant 6 : index
    %c0_180 = arith.constant 0 : index
    %c0_181 = arith.constant 0 : index
    %334 = vector.load %arg12[%c6_179, %c0_180, %c0_181] : memref<8x8x256xf32, #tpu.memory_space<vmem>>, vector<1x8x256xf32>
    %335 = vector.shape_cast %334 : vector<1x8x256xf32> to vector<8x256xf32>
    %336 = arith.addf %333, %335 : vector<8x256xf32>
    %337 = arith.negf %336 : vector<8x256xf32>
    %338 = math.exp %337 : vector<8x256xf32>
    %cst_182 = arith.constant 1.000000e+00 : f32
    %339 = vector.broadcast %cst_182 : f32 to vector<8x256xf32>
    %340 = arith.addf %339, %338 : vector<8x256xf32>
    %341 = arith.divf %339, %340 : vector<8x256xf32>
    %342 = math.tanh %336 : vector<8x256xf32>
    %343 = vector.extract_strided_slice %341 {offsets = [0, 0], sizes = [8, 64], strides = [1, 1]} : vector<8x256xf32> to vector<8x64xf32>
    %344 = vector.extract_strided_slice %341 {offsets = [0, 64], sizes = [8, 64], strides = [1, 1]} : vector<8x256xf32> to vector<8x64xf32>
    %345 = vector.extract_strided_slice %342 {offsets = [0, 128], sizes = [8, 64], strides = [1, 1]} : vector<8x256xf32> to vector<8x64xf32>
    %346 = vector.extract_strided_slice %341 {offsets = [0, 192], sizes = [8, 64], strides = [1, 1]} : vector<8x256xf32> to vector<8x64xf32>
    %347 = arith.mulf %344, %326 : vector<8x64xf32>
    %348 = arith.mulf %343, %345 : vector<8x64xf32>
    %349 = arith.addf %347, %348 : vector<8x64xf32>
    %350 = math.tanh %349 : vector<8x64xf32>
    %351 = arith.mulf %346, %350 : vector<8x64xf32>
    %352 = arith.truncf %351 : vector<8x64xf32> to vector<8x64xbf16>
    %cst_183 = arith.constant dense<0.000000e+00> : vector<8x256xf32>
    %353 = tpu.matmul %352, %303, %cst_183 {dimension_numbers = #tpu.dot_dimension_numbers<[1], [0], [0], [1], [0, 0, 1, 1], [], []>} : vector<8x64xbf16>, vector<64x256xbf16>, vector<8x256xf32> -> vector<8x256xf32>
    %c2_184 = arith.constant 2 : index
    %c0_185 = arith.constant 0 : index
    %c0_186 = arith.constant 0 : index
    %354 = vector.load %arg11[%c2_184, %c0_185, %c0_186] : memref<8x8x256xf32, #tpu.memory_space<vmem>>, vector<1x8x256xf32>
    %355 = vector.shape_cast %354 : vector<1x8x256xf32> to vector<8x256xf32>
    %356 = arith.addf %353, %355 : vector<8x256xf32>
    %c5_187 = arith.constant 5 : index
    %c0_188 = arith.constant 0 : index
    %c0_189 = arith.constant 0 : index
    %357 = vector.load %arg12[%c5_187, %c0_188, %c0_189] : memref<8x8x256xf32, #tpu.memory_space<vmem>>, vector<1x8x256xf32>
    %358 = vector.shape_cast %357 : vector<1x8x256xf32> to vector<8x256xf32>
    %359 = arith.addf %356, %358 : vector<8x256xf32>
    %360 = arith.negf %359 : vector<8x256xf32>
    %361 = math.exp %360 : vector<8x256xf32>
    %cst_190 = arith.constant 1.000000e+00 : f32
    %362 = vector.broadcast %cst_190 : f32 to vector<8x256xf32>
    %363 = arith.addf %362, %361 : vector<8x256xf32>
    %364 = arith.divf %362, %363 : vector<8x256xf32>
    %365 = math.tanh %359 : vector<8x256xf32>
    %366 = vector.extract_strided_slice %364 {offsets = [0, 0], sizes = [8, 64], strides = [1, 1]} : vector<8x256xf32> to vector<8x64xf32>
    %367 = vector.extract_strided_slice %364 {offsets = [0, 64], sizes = [8, 64], strides = [1, 1]} : vector<8x256xf32> to vector<8x64xf32>
    %368 = vector.extract_strided_slice %365 {offsets = [0, 128], sizes = [8, 64], strides = [1, 1]} : vector<8x256xf32> to vector<8x64xf32>
    %369 = vector.extract_strided_slice %364 {offsets = [0, 192], sizes = [8, 64], strides = [1, 1]} : vector<8x256xf32> to vector<8x64xf32>
    %370 = arith.mulf %367, %349 : vector<8x64xf32>
    %371 = arith.mulf %366, %368 : vector<8x64xf32>
    %372 = arith.addf %370, %371 : vector<8x64xf32>
    %373 = math.tanh %372 : vector<8x64xf32>
    %374 = arith.mulf %369, %373 : vector<8x64xf32>
    %375 = arith.truncf %374 : vector<8x64xf32> to vector<8x64xbf16>
    %cst_191 = arith.constant dense<0.000000e+00> : vector<8x256xf32>
    %376 = tpu.matmul %375, %303, %cst_191 {dimension_numbers = #tpu.dot_dimension_numbers<[1], [0], [0], [1], [0, 0, 1, 1], [], []>} : vector<8x64xbf16>, vector<64x256xbf16>, vector<8x256xf32> -> vector<8x256xf32>
    %c3_192 = arith.constant 3 : index
    %c0_193 = arith.constant 0 : index
    %c0_194 = arith.constant 0 : index
    %377 = vector.load %arg11[%c3_192, %c0_193, %c0_194] : memref<8x8x256xf32, #tpu.memory_space<vmem>>, vector<1x8x256xf32>
    %378 = vector.shape_cast %377 : vector<1x8x256xf32> to vector<8x256xf32>
    %379 = arith.addf %376, %378 : vector<8x256xf32>
    %c4_195 = arith.constant 4 : index
    %c0_196 = arith.constant 0 : index
    %c0_197 = arith.constant 0 : index
    %380 = vector.load %arg12[%c4_195, %c0_196, %c0_197] : memref<8x8x256xf32, #tpu.memory_space<vmem>>, vector<1x8x256xf32>
    %381 = vector.shape_cast %380 : vector<1x8x256xf32> to vector<8x256xf32>
    %382 = arith.addf %379, %381 : vector<8x256xf32>
    %383 = arith.negf %382 : vector<8x256xf32>
    %384 = math.exp %383 : vector<8x256xf32>
    %cst_198 = arith.constant 1.000000e+00 : f32
    %385 = vector.broadcast %cst_198 : f32 to vector<8x256xf32>
    %386 = arith.addf %385, %384 : vector<8x256xf32>
    %387 = arith.divf %385, %386 : vector<8x256xf32>
    %388 = math.tanh %382 : vector<8x256xf32>
    %389 = vector.extract_strided_slice %387 {offsets = [0, 0], sizes = [8, 64], strides = [1, 1]} : vector<8x256xf32> to vector<8x64xf32>
    %390 = vector.extract_strided_slice %387 {offsets = [0, 64], sizes = [8, 64], strides = [1, 1]} : vector<8x256xf32> to vector<8x64xf32>
    %391 = vector.extract_strided_slice %388 {offsets = [0, 128], sizes = [8, 64], strides = [1, 1]} : vector<8x256xf32> to vector<8x64xf32>
    %392 = vector.extract_strided_slice %387 {offsets = [0, 192], sizes = [8, 64], strides = [1, 1]} : vector<8x256xf32> to vector<8x64xf32>
    %393 = arith.mulf %390, %372 : vector<8x64xf32>
    %394 = arith.mulf %389, %391 : vector<8x64xf32>
    %395 = arith.addf %393, %394 : vector<8x64xf32>
    %396 = math.tanh %395 : vector<8x64xf32>
    %397 = arith.mulf %392, %396 : vector<8x64xf32>
    %398 = arith.truncf %397 : vector<8x64xf32> to vector<8x64xbf16>
    %cst_199 = arith.constant dense<0.000000e+00> : vector<8x256xf32>
    %399 = tpu.matmul %398, %303, %cst_199 {dimension_numbers = #tpu.dot_dimension_numbers<[1], [0], [0], [1], [0, 0, 1, 1], [], []>} : vector<8x64xbf16>, vector<64x256xbf16>, vector<8x256xf32> -> vector<8x256xf32>
    %c4_200 = arith.constant 4 : index
    %c0_201 = arith.constant 0 : index
    %c0_202 = arith.constant 0 : index
    %400 = vector.load %arg11[%c4_200, %c0_201, %c0_202] : memref<8x8x256xf32, #tpu.memory_space<vmem>>, vector<1x8x256xf32>
    %401 = vector.shape_cast %400 : vector<1x8x256xf32> to vector<8x256xf32>
    %402 = arith.addf %399, %401 : vector<8x256xf32>
    %c3_203 = arith.constant 3 : index
    %c0_204 = arith.constant 0 : index
    %c0_205 = arith.constant 0 : index
    %403 = vector.load %arg12[%c3_203, %c0_204, %c0_205] : memref<8x8x256xf32, #tpu.memory_space<vmem>>, vector<1x8x256xf32>
    %404 = vector.shape_cast %403 : vector<1x8x256xf32> to vector<8x256xf32>
    %405 = arith.addf %402, %404 : vector<8x256xf32>
    %406 = arith.negf %405 : vector<8x256xf32>
    %407 = math.exp %406 : vector<8x256xf32>
    %cst_206 = arith.constant 1.000000e+00 : f32
    %408 = vector.broadcast %cst_206 : f32 to vector<8x256xf32>
    %409 = arith.addf %408, %407 : vector<8x256xf32>
    %410 = arith.divf %408, %409 : vector<8x256xf32>
    %411 = math.tanh %405 : vector<8x256xf32>
    %412 = vector.extract_strided_slice %410 {offsets = [0, 0], sizes = [8, 64], strides = [1, 1]} : vector<8x256xf32> to vector<8x64xf32>
    %413 = vector.extract_strided_slice %410 {offsets = [0, 64], sizes = [8, 64], strides = [1, 1]} : vector<8x256xf32> to vector<8x64xf32>
    %414 = vector.extract_strided_slice %411 {offsets = [0, 128], sizes = [8, 64], strides = [1, 1]} : vector<8x256xf32> to vector<8x64xf32>
    %415 = vector.extract_strided_slice %410 {offsets = [0, 192], sizes = [8, 64], strides = [1, 1]} : vector<8x256xf32> to vector<8x64xf32>
    %416 = arith.mulf %413, %395 : vector<8x64xf32>
    %417 = arith.mulf %412, %414 : vector<8x64xf32>
    %418 = arith.addf %416, %417 : vector<8x64xf32>
    %419 = math.tanh %418 : vector<8x64xf32>
    %420 = arith.mulf %415, %419 : vector<8x64xf32>
    %421 = arith.truncf %420 : vector<8x64xf32> to vector<8x64xbf16>
    %cst_207 = arith.constant dense<0.000000e+00> : vector<8x256xf32>
    %422 = tpu.matmul %421, %303, %cst_207 {dimension_numbers = #tpu.dot_dimension_numbers<[1], [0], [0], [1], [0, 0, 1, 1], [], []>} : vector<8x64xbf16>, vector<64x256xbf16>, vector<8x256xf32> -> vector<8x256xf32>
    %c5_208 = arith.constant 5 : index
    %c0_209 = arith.constant 0 : index
    %c0_210 = arith.constant 0 : index
    %423 = vector.load %arg11[%c5_208, %c0_209, %c0_210] : memref<8x8x256xf32, #tpu.memory_space<vmem>>, vector<1x8x256xf32>
    %424 = vector.shape_cast %423 : vector<1x8x256xf32> to vector<8x256xf32>
    %425 = arith.addf %422, %424 : vector<8x256xf32>
    %c2_211 = arith.constant 2 : index
    %c0_212 = arith.constant 0 : index
    %c0_213 = arith.constant 0 : index
    %426 = vector.load %arg12[%c2_211, %c0_212, %c0_213] : memref<8x8x256xf32, #tpu.memory_space<vmem>>, vector<1x8x256xf32>
    %427 = vector.shape_cast %426 : vector<1x8x256xf32> to vector<8x256xf32>
    %428 = arith.addf %425, %427 : vector<8x256xf32>
    %429 = arith.negf %428 : vector<8x256xf32>
    %430 = math.exp %429 : vector<8x256xf32>
    %cst_214 = arith.constant 1.000000e+00 : f32
    %431 = vector.broadcast %cst_214 : f32 to vector<8x256xf32>
    %432 = arith.addf %431, %430 : vector<8x256xf32>
    %433 = arith.divf %431, %432 : vector<8x256xf32>
    %434 = math.tanh %428 : vector<8x256xf32>
    %435 = vector.extract_strided_slice %433 {offsets = [0, 0], sizes = [8, 64], strides = [1, 1]} : vector<8x256xf32> to vector<8x64xf32>
    %436 = vector.extract_strided_slice %433 {offsets = [0, 64], sizes = [8, 64], strides = [1, 1]} : vector<8x256xf32> to vector<8x64xf32>
    %437 = vector.extract_strided_slice %434 {offsets = [0, 128], sizes = [8, 64], strides = [1, 1]} : vector<8x256xf32> to vector<8x64xf32>
    %438 = vector.extract_strided_slice %433 {offsets = [0, 192], sizes = [8, 64], strides = [1, 1]} : vector<8x256xf32> to vector<8x64xf32>
    %439 = arith.mulf %436, %418 : vector<8x64xf32>
    %440 = arith.mulf %435, %437 : vector<8x64xf32>
    %441 = arith.addf %439, %440 : vector<8x64xf32>
    %442 = math.tanh %441 : vector<8x64xf32>
    %443 = arith.mulf %438, %442 : vector<8x64xf32>
    %444 = arith.truncf %443 : vector<8x64xf32> to vector<8x64xbf16>
    %cst_215 = arith.constant dense<0.000000e+00> : vector<8x256xf32>
    %445 = tpu.matmul %444, %303, %cst_215 {dimension_numbers = #tpu.dot_dimension_numbers<[1], [0], [0], [1], [0, 0, 1, 1], [], []>} : vector<8x64xbf16>, vector<64x256xbf16>, vector<8x256xf32> -> vector<8x256xf32>
    %c6_216 = arith.constant 6 : index
    %c0_217 = arith.constant 0 : index
    %c0_218 = arith.constant 0 : index
    %446 = vector.load %arg11[%c6_216, %c0_217, %c0_218] : memref<8x8x256xf32, #tpu.memory_space<vmem>>, vector<1x8x256xf32>
    %447 = vector.shape_cast %446 : vector<1x8x256xf32> to vector<8x256xf32>
    %448 = arith.addf %445, %447 : vector<8x256xf32>
    %c1_219 = arith.constant 1 : index
    %c0_220 = arith.constant 0 : index
    %c0_221 = arith.constant 0 : index
    %449 = vector.load %arg12[%c1_219, %c0_220, %c0_221] : memref<8x8x256xf32, #tpu.memory_space<vmem>>, vector<1x8x256xf32>
    %450 = vector.shape_cast %449 : vector<1x8x256xf32> to vector<8x256xf32>
    %451 = arith.addf %448, %450 : vector<8x256xf32>
    %452 = arith.negf %451 : vector<8x256xf32>
    %453 = math.exp %452 : vector<8x256xf32>
    %cst_222 = arith.constant 1.000000e+00 : f32
    %454 = vector.broadcast %cst_222 : f32 to vector<8x256xf32>
    %455 = arith.addf %454, %453 : vector<8x256xf32>
    %456 = arith.divf %454, %455 : vector<8x256xf32>
    %457 = math.tanh %451 : vector<8x256xf32>
    %458 = vector.extract_strided_slice %456 {offsets = [0, 0], sizes = [8, 64], strides = [1, 1]} : vector<8x256xf32> to vector<8x64xf32>
    %459 = vector.extract_strided_slice %456 {offsets = [0, 64], sizes = [8, 64], strides = [1, 1]} : vector<8x256xf32> to vector<8x64xf32>
    %460 = vector.extract_strided_slice %457 {offsets = [0, 128], sizes = [8, 64], strides = [1, 1]} : vector<8x256xf32> to vector<8x64xf32>
    %461 = vector.extract_strided_slice %456 {offsets = [0, 192], sizes = [8, 64], strides = [1, 1]} : vector<8x256xf32> to vector<8x64xf32>
    %462 = arith.mulf %459, %441 : vector<8x64xf32>
    %463 = arith.mulf %458, %460 : vector<8x64xf32>
    %464 = arith.addf %462, %463 : vector<8x64xf32>
    %465 = math.tanh %464 : vector<8x64xf32>
    %466 = arith.mulf %461, %465 : vector<8x64xf32>
    %467 = arith.truncf %466 : vector<8x64xf32> to vector<8x64xbf16>
    %cst_223 = arith.constant dense<0.000000e+00> : vector<8x256xf32>
    %468 = tpu.matmul %467, %303, %cst_223 {dimension_numbers = #tpu.dot_dimension_numbers<[1], [0], [0], [1], [0, 0, 1, 1], [], []>} : vector<8x64xbf16>, vector<64x256xbf16>, vector<8x256xf32> -> vector<8x256xf32>
    %c7_224 = arith.constant 7 : index
    %c0_225 = arith.constant 0 : index
    %c0_226 = arith.constant 0 : index
    %469 = vector.load %arg11[%c7_224, %c0_225, %c0_226] : memref<8x8x256xf32, #tpu.memory_space<vmem>>, vector<1x8x256xf32>
    %470 = vector.shape_cast %469 : vector<1x8x256xf32> to vector<8x256xf32>
    %471 = arith.addf %468, %470 : vector<8x256xf32>
    %c0_227 = arith.constant 0 : index
    %c0_228 = arith.constant 0 : index
    %c0_229 = arith.constant 0 : index
    %472 = vector.load %arg12[%c0_227, %c0_228, %c0_229] : memref<8x8x256xf32, #tpu.memory_space<vmem>>, vector<1x8x256xf32>
    %473 = vector.shape_cast %472 : vector<1x8x256xf32> to vector<8x256xf32>
    %474 = arith.addf %471, %473 : vector<8x256xf32>
    %475 = arith.negf %474 : vector<8x256xf32>
    %476 = math.exp %475 : vector<8x256xf32>
    %cst_230 = arith.constant 1.000000e+00 : f32
    %477 = vector.broadcast %cst_230 : f32 to vector<8x256xf32>
    %478 = arith.addf %477, %476 : vector<8x256xf32>
    %479 = arith.divf %477, %478 : vector<8x256xf32>
    %480 = math.tanh %474 : vector<8x256xf32>
    %481 = vector.extract_strided_slice %479 {offsets = [0, 0], sizes = [8, 64], strides = [1, 1]} : vector<8x256xf32> to vector<8x64xf32>
    %482 = vector.extract_strided_slice %479 {offsets = [0, 64], sizes = [8, 64], strides = [1, 1]} : vector<8x256xf32> to vector<8x64xf32>
    %483 = vector.extract_strided_slice %480 {offsets = [0, 128], sizes = [8, 64], strides = [1, 1]} : vector<8x256xf32> to vector<8x64xf32>
    %484 = vector.extract_strided_slice %479 {offsets = [0, 192], sizes = [8, 64], strides = [1, 1]} : vector<8x256xf32> to vector<8x64xf32>
    %485 = arith.mulf %482, %464 : vector<8x64xf32>
    %486 = arith.mulf %481, %483 : vector<8x64xf32>
    %487 = arith.addf %485, %486 : vector<8x64xf32>
    %488 = math.tanh %487 : vector<8x64xf32>
    %489 = arith.mulf %484, %488 : vector<8x64xf32>
    %490 = vector.extract_strided_slice %489 {offsets = [0, 0], sizes = [8, 32], strides = [1, 1]} : vector<8x64xf32> to vector<8x32xf32>
    %491 = arith.truncf %490 : vector<8x32xf32> to vector<8x32xbf16>
    %c0_231 = arith.constant 0 : index
    %c0_232 = arith.constant 0 : index
    %c0_233 = arith.constant 0 : index
    %492 = vector.load %arg8[%c0_231, %c0_232, %c0_233] : memref<2x32x8xbf16, #tpu.memory_space<vmem>>, vector<1x32x8xbf16>
    %493 = vector.shape_cast %492 : vector<1x32x8xbf16> to vector<32x8xbf16>
    %cst_234 = arith.constant dense<0.000000e+00> : vector<8x8xf32>
    %494 = tpu.matmul %491, %493, %cst_234 {dimension_numbers = #tpu.dot_dimension_numbers<[1], [0], [0], [1], [0, 0, 1, 1], [], []>} : vector<8x32xbf16>, vector<32x8xbf16>, vector<8x8xf32> -> vector<8x8xf32>
    %495 = vector.extract_strided_slice %489 {offsets = [0, 32], sizes = [8, 32], strides = [1, 1]} : vector<8x64xf32> to vector<8x32xf32>
    %496 = arith.truncf %495 : vector<8x32xf32> to vector<8x32xbf16>
    %c1_235 = arith.constant 1 : index
    %c0_236 = arith.constant 0 : index
    %c0_237 = arith.constant 0 : index
    %497 = vector.load %arg8[%c1_235, %c0_236, %c0_237] : memref<2x32x8xbf16, #tpu.memory_space<vmem>>, vector<1x32x8xbf16>
    %498 = vector.shape_cast %497 : vector<1x32x8xbf16> to vector<32x8xbf16>
    %cst_238 = arith.constant dense<0.000000e+00> : vector<8x8xf32>
    %499 = tpu.matmul %496, %498, %cst_238 {dimension_numbers = #tpu.dot_dimension_numbers<[1], [0], [0], [1], [0, 0, 1, 1], [], []>} : vector<8x32xbf16>, vector<32x8xbf16>, vector<8x8xf32> -> vector<8x8xf32>
    %500 = arith.addf %494, %499 : vector<8x8xf32>
    %c0_239 = arith.constant 0 : index
    %c0_240 = arith.constant 0 : index
    %501 = vector.load %arg9[%c0_239, %c0_240] : memref<1x8xf32, #tpu.memory_space<vmem>>, vector<1x8xf32>
    %502 = vector.broadcast %501 : vector<1x8xf32> to vector<8x8xf32>
    %503 = arith.addf %500, %502 : vector<8x8xf32>
    %c0_241 = arith.constant 0 : index
    %c0_242 = arith.constant 0 : index
    %504 = vector.load %arg10[%c0_241, %c0_242] : memref<8x8xf32, #tpu.memory_space<vmem>>, vector<8x8xf32>
    tpu.vector_store %arg10[%c0_241, %c0_242], %503 {strides = array<i32>} : memref<8x8xf32, #tpu.memory_space<vmem>>, vector<8x8xf32>,
    return
  }
  func.func @transform_0(%arg0: i32) -> (i32, i32) {
    %c0_i32 = arith.constant 0 : i32
    %c0_i32_0 = arith.constant 0 : i32
    %c0_i32_1 = arith.constant 0 : i32
    return %c0_i32, %c0_i32_0 : i32, i32
  }
  func.func @transform_1(%arg0: i32) -> (i32, i32, i32) {
    %c0_i32 = arith.constant 0 : i32
    %c0_i32_0 = arith.constant 0 : i32
    %c0_i32_1 = arith.constant 0 : i32
    %c0_i32_2 = arith.constant 0 : i32
    return %c0_i32, %c0_i32_0, %c0_i32_1 : i32, i32, i32
  }
  func.func @transform_2(%arg0: i32) -> (i32, i32, i32) {
    %c0_i32 = arith.constant 0 : i32
    %c0_i32_0 = arith.constant 0 : i32
    %c0_i32_1 = arith.constant 0 : i32
    %c0_i32_2 = arith.constant 0 : i32
    return %c0_i32, %c0_i32_0, %c0_i32_1 : i32, i32, i32
  }
  func.func @transform_3(%arg0: i32) -> (i32, i32) {
    %c0_i32 = arith.constant 0 : i32
    %c0_i32_0 = arith.constant 0 : i32
    %c0_i32_1 = arith.constant 0 : i32
    return %c0_i32, %c0_i32_0 : i32, i32
  }
  func.func @transform_4(%arg0: i32) -> (i32, i32, i32) {
    %c0_i32 = arith.constant 0 : i32
    %c0_i32_0 = arith.constant 0 : i32
    %c0_i32_1 = arith.constant 0 : i32
    %c0_i32_2 = arith.constant 0 : i32
    return %c0_i32, %c0_i32_0, %c0_i32_1 : i32, i32, i32
  }
  func.func @transform_5(%arg0: i32) -> (i32, i32, i32) {
    %c0_i32 = arith.constant 0 : i32
    %c0_i32_0 = arith.constant 0 : i32
    %c0_i32_1 = arith.constant 0 : i32
    %c0_i32_2 = arith.constant 0 : i32
    return %c0_i32, %c0_i32_0, %c0_i32_1 : i32, i32, i32
  }
  func.func @transform_6(%arg0: i32) -> (i32, i32) {
    %c0_i32 = arith.constant 0 : i32
    %c0_i32_0 = arith.constant 0 : i32
    %c0_i32_1 = arith.constant 0 : i32
    return %c0_i32, %c0_i32_0 : i32, i32
  }
  func.func @transform_7(%arg0: i32) -> (i32, i32, i32) {
    %c0_i32 = arith.constant 0 : i32
    %c0_i32_0 = arith.constant 0 : i32
    %c0_i32_1 = arith.constant 0 : i32
    %c0_i32_2 = arith.constant 0 : i32
    return %c0_i32, %c0_i32_0, %c0_i32_1 : i32, i32, i32
  }
  func.func @transform_8(%arg0: i32) -> (i32, i32) {
    %c0_i32 = arith.constant 0 : i32
    %c0_i32_0 = arith.constant 0 : i32
    %c0_i32_1 = arith.constant 0 : i32
    return %c0_i32, %c0_i32_0 : i32, i32
  }
  func.func @transform_9(%arg0: i32) -> (i32, i32) {
    %c0_i32 = arith.constant 0 : i32
    %c0_i32_0 = arith.constant 0 : i32
    %c0_i32_1 = arith.constant 0 : i32
    return %c0_i32, %c0_i32_0 : i32, i32
  }
}

</mosaic_0001>

<bundles_post_ra>
// kernel: bilstm_forward.1
= control target key start
LH: loop header
LB: loop body
LE: loop exit
PB: predicated region body
PF: predicated region fallthrough
CT: control target
= control target key end

     0   :  { %14 = vsyncpa [#allocation7], 0  ;;  %s3684_s0 = inlined_call_operand.vmem [shape: f32[64,16], index: 0, kind: input, shape index: {}]   ;;  %s3685_s1 = inlined_call_operand.hbm [shape: bf16[2,16,256], index: 1, kind: input, shape index: {}]   ;;  %s3686_s2 = inlined_call_operand.vmem [shape: f32[2,1,256], index: 2, kind: input, shape index: {}]   ;;  %s3687_s3 = inlined_call_operand.hbm [shape: bf16[64,256], index: 3, kind: input, shape index: {}]   ;;  %s3688_s4 = inlined_call_operand.vmem [shape: bf16[4,32,256], index: 4, kind: input, shape index: {}]   ;;  %s3689_s5 = inlined_call_operand.vmem [shape: f32[2,1,256], index: 5, kind: input, shape index: {}]   ;;  %s3690_s6 = inlined_call_operand.hbm [shape: bf16[64,256], index: 6, kind: input, shape index: {}]   ;;  %s3691_s7 = inlined_call_operand.vmem [shape: bf16[2,32,8], index: 7, kind: input, shape index: {}]   ;;  %s3692_s8 = inlined_call_operand.vmem [shape: f32[1,8], index: 8, kind: input, shape index: {}]   ;;  %s3693_s9 = inlined_call_operand.vmem [shape: f32[8,8], index: 9, kind: output, shape index: {}]  }
   0x1   :  { %15 = vsyncpa [#allocation9], 0  ;;  %s2914_s30 = smov [#allocation8]   ;;  %s2915_s11 = smov [#allocation6]  }
   0x2   :  { %s37_s10 = sshll.u32 %s2914_s30, 4  ;;  %s23_s12 = sshll.u32 %s2915_s11, 4  ;;  %s38_s10 = int_to_ptr.vmem [resolvable:$true] %s37_s10  ;;  %s2974_s12 = int_to_ptr.vmem [resolvable:$true] %s23_s12 }
   0x3   :  { %s2844_s15 = scalar_lea.hbm %s3687_s3, 1024 }
   0x4   :  { %p2845_p0 = scmp.ne.s32.totalorder %s3687_s3, %s2844_s15  ;;  %p2848_p1 = scmp.lt.u32.totalorder %s2844_s15, %s3687_s3 }
   0x6   :  { %p2850_p2 = pnand %p2848_p1, %p2845_p0 }
   0x8   :  { %2853 = shalt.err (!%p2850_p2)
}
   0x9   :  { %s2854_s20 = scalar_lea.vmem %s38_s10, 1024  ;;  %p2859_p4 = scmp.lt.s32.totalorder %s38_s10, %s38_s10 }
   0xa   :  { %p2855_p3 = scmp.ne.s32.totalorder %s38_s10, %s2854_s20  ;;  %p2860_p5 = scmp.lt.s32.totalorder %s2854_s20, %s2854_s20 }
   0xc   :  { %p2861_p6 = por %p2860_p5, %p2859_p4 }
   0xe   :  { %p2862_p7 = pnand %p2861_p6, %p2855_p3 }
  0x10   :  { %2865 = shalt.err (!%p2862_p7)
}
  0x11   :  { %s2916_s21 = smov 128   ;;  %s2917_s22 = smov 8  }
  0x12   :  { %43 = dma.hbm_to_vmem [thread:$0]  %s3687_s3, 1024, %s38_s10, [#allocation9], %s2916_s21, %s2916_s21, %s2917_s22  }
  0x13   :  { %s2866_s27 = scalar_lea.hbm %s3685_s1, 512 }
  0x14   :  { %p2867_p8 = scmp.ne.s32.totalorder %s3685_s1, %s2866_s27  ;;  %p2870_p9 = scmp.lt.u32.totalorder %s2866_s27, %s3685_s1 }
  0x16   :  { %p2872_p10 = pnand %p2870_p9, %p2867_p8 }
  0x18   :  { %2875 = shalt.err (!%p2872_p10)
}
  0x19   :  { %s2876_s13 = scalar_lea.vmem %s2974_s12, 512  ;;  %p2881_p12 = scmp.lt.s32.totalorder %s2974_s12, %s2974_s12 }
  0x1a   :  { %p2877_p11 = scmp.ne.s32.totalorder %s2974_s12, %s2876_s13  ;;  %p2882_p13 = scmp.lt.s32.totalorder %s2876_s13, %s2876_s13 }
  0x1c   :  { %p2883_p0 = por %p2882_p13, %p2881_p12 }
  0x1e   :  { %p2884_p1 = pnand %p2883_p0, %p2877_p11 }
  0x20   :  { %2887 = shalt.err (!%p2884_p1)
}
  0x21   :  { %29 = dma.hbm_to_vmem [thread:$0]  %s3685_s1, 512, %s2974_s12, [#allocation7], %s2916_s21, %s2916_s21, %s2917_s22  }
  0x22   :  { %s2918_s14 = smov [#allocation10]   ;;  %s2888_s18 = scalar_lea.hbm %s3690_s6, 1024 }
  0x23   :  { %s53_s15 = sshll.u32 %s2918_s14, 4  ;;  %p2889_p2 = scmp.ne.s32.totalorder %s3690_s6, %s2888_s18  ;;  %s54_s15 = int_to_ptr.vmem [resolvable:$true] %s53_s15 }
  0x24   :  { %p2892_p3 = scmp.lt.u32.totalorder %s2888_s18, %s3690_s6 }
  0x26   :  { %p2894_p4 = pnand %p2892_p3, %p2889_p2 }
  0x28   :  { %2897 = shalt.err (!%p2894_p4)
}
  0x29   :  { %s2898_s25 = scalar_lea.vmem %s54_s15, 1024  ;;  %p2903_p6 = scmp.lt.s32.totalorder %s54_s15, %s54_s15 }
  0x2a   :  { %p2899_p5 = scmp.ne.s32.totalorder %s54_s15, %s2898_s25  ;;  %p2904_p7 = scmp.lt.s32.totalorder %s2898_s25, %s2898_s25 }
  0x2c   :  { %p2905_p8 = por %p2904_p7, %p2903_p6 }
  0x2e   :  { %p2906_p9 = pnand %p2905_p8, %p2899_p5 }
  0x30   :  { %2909 = shalt.err (!%p2906_p9)
}
  0x31   :  { %59 = dma.hbm_to_vmem [thread:$0]  %s3690_s6, 1024, %s54_s15, [#allocation9], %s2916_s21, %s2916_s21, %s2917_s22  }
  0x32   :  { %2910 = dma.done.wait [#allocation7], 512  }
  0x33   :  { %2911 = vsyncadd [#allocation7], 4294966784 }
  0x34   :  { %2912 = dma.done.wait [#allocation9], 2048  }
  0x35   :  { %2913 = vsyncadd [#allocation9], 4294965248  ;;  %v2919_v0 = vmov 0   ;;  %v2594_v1 = vld [vmem:[#allocation6 + $0x4] ss:$8 sps:$4 sm:$0xff]   ;;  %vm110_vm0 = vcmask 130048   ;;  %v90_v25 = vlaneseq }
  0x36   :  { %155 = vmatprep.mubr.bf16.mxu0 %v2919_v0  ;;  %254 = vmatprep.mubr.bf16.mxu1 %v2919_v0  ;;  %v2596_v2 = vld [vmem:[#allocation6] ss:$8 sps:$4 sm:$0xff]   ;;  %v2597_v6 = vld [vmem:[#allocation6 + $0x14] ss:$8 sps:$4 sm:$0xff]   ;;  %v3034_v7 = vld [vmem:[#allocation8 + $0x4] ss:$8 sps:$4 sm:$0xff]  }
  0x37   :  { %v74_v3 = vld [vmem:[%s3684_s0] sm:$0xff]  ;;  %v75_v4 = vld [vmem:[%s3684_s0 + $0x8] sm:$0xff]  ;;  %123 = vmatprep.subr.bf16.mxu0 %v2594_v1  ;;  %222 = vmatprep.subr.bf16.mxu1 %v2597_v6  ;;  %v2601_v8 = vld [vmem:[#allocation6 + $0x10] ss:$8 sps:$4 sm:$0xff]   ;;  %v91_v26 = vshrl.u32 %v90_v25, 7  ;;  %vm377_vm1 = vcmask 523264  }
  0x38   :  { %v82_v5 = vpack.c.bf16 %v75_v4, %v74_v3  ;;  %124 = vmatpush1.bf16.msra.mxu0 %v2596_v2  ;;  %v3036_v9 = vld [vmem:[#allocation8] ss:$8 sps:$4 sm:$0xff]   ;;  %223 = vmatpush1.bf16.msra.mxu1 %v2601_v8  ;;  %v76_v10 = vld [vmem:[%s3684_s0 + $0x10] sm:$0xff]  ;;  %v77_v11 = vld [vmem:[%s3684_s0 + $0x18] sm:$0xff]  ;;  %s2921_s23 = smov 32   ;;  %vm453_vm2 = vcmask 261120  }
  0x39   :  { %381 = vmatprep.subr.bf16.mxu0 %v3034_v7  ;;  %v3046_v12 = vld [vmem:[#allocation8 + $0x14] ss:$8 sps:$4 sm:$0xff]   ;;  %v3050_v13 = vld [vmem:[#allocation8 + $0x10] ss:$8 sps:$4 sm:$0xff]   ;;  %v3053_v14 = vld [vmem:[#allocation8 + $0x24] ss:$8 sps:$4 sm:$0xff]   ;;  %470 = vmatprep.subr.bf16.mxu1 %v3034_v7  ;;  %v83_v15 = vpack.c.bf16 %v77_v11, %v76_v10 }
  0x3a   :  { %v3058_v16 = vld [vmem:[#allocation8 + $0x20] ss:$8 sps:$4 sm:$0xff]   ;;  %v3060_v17 = vld [vmem:[#allocation8 + $0x34] ss:$8 sps:$4 sm:$0xff]   ;;  %v3072_v20 = vld [vmem:[#allocation8 + $0x30] ss:$8 sps:$4 sm:$0xff]  }
  0x3b   :  { %2401 = vmatmul.mubr.msk.bf16.vlgmr.msra.gmra.mrb[0].mxu0 %vm110_vm0, %v82_v5  ;;  %2408 = vmatmul.mubr.msk.bf16.vlgmr.msra.gmra.mrb[0].mxu1 %vm110_vm0, %v82_v5  ;;  %v78_v18 = vld [vmem:[%s3684_s0 + $0x20] sm:$0xff]  ;;  %v79_v19 = vld [vmem:[%s3684_s0 + $0x28] sm:$0xff]  ;;  %v80_v22 = vld [vmem:[%s3684_s0 + $0x30] sm:$0xff]  ;;  %v3112_v27 = vsub.s32 0, %v91_v26  ;;  %v3120_v30 = vsub.s32 1, %v91_v26  ;;  %vm2923_vm3 = vmmov 0  }
  0x3c   :  { %382 = vmatpush1.bf16.msra.mxu0 %v3036_v9  ;;  %165 = vmatprep.mubr.bf16.mxu0 %v2919_v0  ;;  %v84_v21 = vpack.c.bf16 %v79_v19, %v78_v18  ;;  %v81_v23 = vld [vmem:[%s3684_s0 + $0x38] sm:$0xff]  ;;  %v2405_v28 = vld [vmem:[%s3686_s2 + $0x2] sm:$0x3]  ;;  %v88_v29 = vld [vmem:[%s3686_s2] sm:$0x3]  ;;  %s2920_s2 = smov 64  }
  0x3d   :  { %383 = vmatprep.subr.bf16.mxu0 %v3046_v12  ;;  %264 = vmatprep.mubr.bf16.mxu1 %v2919_v0  ;;  %v85_v24 = vpack.c.bf16 %v81_v23, %v80_v22  ;;  %v3125_v32 = vrot.slane %v2405_v28, %v3112_v27  ;;  %v93_v33 = vrot.slane %v88_v29, %v3112_v27  ;;  %vm2391_vm4 = vcmask 64512  }
  0x3e   :  { %471 = vmatpush1.bf16.msra.mxu1 %v3036_v9  ;;  %v3129_v35 = vrot.slane %v2405_v28, %v3120_v30  ;;  %v97_v36 = vrot.slane %v88_v29, %v3120_v30 }
  0x3f   :  { %472 = vmatprep.subr.bf16.mxu1 %v3046_v12 }
  0x40   :  { %384 = vmatpush1.bf16.msra.mxu0 %v3050_v13 }
  0x41   :  { %385 = vmatprep.subr.bf16.mxu0 %v3053_v14 }
  0x42   :  { %473 = vmatpush1.bf16.msra.mxu1 %v3050_v13 }
  0x43   :  { %2402 = vmatmul.mubr.msk.bf16.gmra.mrb[4].mxu0 %vm110_vm0, %v83_v15  ;;  %474 = vmatprep.subr.bf16.mxu1 %v3053_v14 }
  0x44   :  { %175 = vmatprep.mubr.bf16.mxu0 %v2919_v0  ;;  %386 = vmatpush1.bf16.msra.mxu0 %v3058_v16 }
  0x45   :  { %387 = vmatprep.subr.bf16.mxu0 %v3060_v17  ;;  %2409 = vmatmul.mubr.msk.bf16.gmra.mrb[4].mxu1 %vm110_vm0, %v83_v15 }
  0x46   :  { %274 = vmatprep.mubr.bf16.mxu1 %v2919_v0  ;;  %475 = vmatpush1.bf16.msra.mxu1 %v3058_v16 }
  0x47   :  { %476 = vmatprep.subr.bf16.mxu1 %v3060_v17 }
  0x48   :  { %388 = vmatpush1.bf16.msra.mxu0 %v3072_v20 }
  0x49   :  { %559 = vmatprep.subr.bf16.mxu0 %v3034_v7 }
  0x4a   :  { %477 = vmatpush1.bf16.msra.mxu1 %v3072_v20 }
  0x4b   :  { %2403 = vmatmul.mubr.msk.bf16.gmra.mrb[8].mxu0 %vm110_vm0, %v84_v21  ;;  %648 = vmatprep.subr.bf16.mxu1 %v3034_v7 }
  0x4c   :  { %185 = vmatprep.mubr.bf16.mxu0 %v2919_v0 }
  0x4d   :  { %2410 = vmatmul.mubr.msk.bf16.gmra.mrb[8].mxu1 %vm110_vm0, %v84_v21 }
  0x4e   :  { %284 = vmatprep.mubr.bf16.mxu1 %v2919_v0 }
  0x53   :  { %2404 = vmatmul.mubr.msk.bf16.gmra.mrb[12].mxu0 %vm110_vm0, %v85_v24 }
  0x54   :  { %413 = vmatprep.mubr.bf16.mxu0 %v2919_v0 }
  0x55   :  { %2411 = vmatmul.mubr.msk.bf16.gmra.mrb[12].mxu1 %vm110_vm0, %v85_v24 }
  0x56   :  { %502 = vmatprep.mubr.bf16.mxu1 %v2919_v0 }
  0x5b   :  { %414 = vmatmul.mubr.bf16.vlgmr.msra.gmra.mrb[16].mxu0 %v2919_v0 }
  0x5c   :  { %560 = vmatpush1.bf16.msra.mxu0 %v3036_v9  ;;  %591 = vmatprep.mubr.bf16.mxu0 %v2919_v0 }
  0x5d   :  { %561 = vmatprep.subr.bf16.mxu0 %v3046_v12 }
  0x60   :  { %562 = vmatpush1.bf16.msra.mxu0 %v3050_v13 }
  0x61   :  { %563 = vmatprep.subr.bf16.mxu0 %v3053_v14 }
  0x64   :  { %564 = vmatpush1.bf16.msra.mxu0 %v3058_v16 }
  0x65   :  { %565 = vmatprep.subr.bf16.mxu0 %v3060_v17 }
  0x68   :  { %566 = vmatpush1.bf16.msra.mxu0 %v3072_v20 }
  0x69   :  { %737 = vmatprep.subr.bf16.mxu0 %v3034_v7 }
 0x10e   :  { %v3122_v31 = vpop.f32.mrb[0].mxu0  ;;  %v256_v40 = vpop.f32.mrb[0].mxu1 }
 0x10f   :  { %v159_v34 = vpop.f32.mrb[1].mxu0  ;;  %v3137_v42 = vadd.f32 %v256_v40, %v3125_v32  ;;  %v258_v43 = vpop.f32.mrb[1].mxu1 }
 0x110   :  { %v161_v37 = vpop.f32.mrb[2].mxu0  ;;  %v3140_v44 = vadd.f32 %v258_v43, %v3129_v35  ;;  %v260_v45 = vpop.f32.mrb[2].mxu1 }
 0x111   :  { %v3132_v38 = vadd.f32 %v161_v37, %v93_v33  ;;  %v163_v39 = vpop.f32.mrb[3].mxu0  ;;  %v3143_v46 = vadd.f32 %v260_v45, %v3125_v32  ;;  %v262_v47 = vpop.f32.mrb[3].mxu1 }
 0x112   :  { %v3134_v41 = vadd.f32 %v163_v39, %v97_v36  ;;  %v3146_v48 = vadd.f32 %v262_v47, %v3129_v35 }
 0x116   :  { %v167_v49 = vpop.f32.mrb[4].mxu0 }
 0x117   :  { %v3148_v50 = vadd.f32 %v167_v49, %v93_v33  ;;  %v169_v51 = vpop.f32.mrb[5].mxu0 }
 0x118   :  { %v3150_v52 = vadd.f32 %v169_v51, %v97_v36  ;;  %v171_v53 = vpop.f32.mrb[6].mxu0  ;;  %v266_v56 = vpop.f32.mrb[4].mxu1 }
 0x119   :  { %v3152_v54 = vadd.f32 %v171_v53, %v93_v33  ;;  %v173_v55 = vpop.f32.mrb[7].mxu0  ;;  %v3157_v58 = vadd.f32 %v266_v56, %v3125_v32  ;;  %v268_v59 = vpop.f32.mrb[5].mxu1 }
 0x11a   :  { %v3154_v57 = vadd.f32 %v173_v55, %v97_v36  ;;  %v3160_v60 = vadd.f32 %v268_v59, %v3129_v35  ;;  %v270_v61 = vpop.f32.mrb[6].mxu1  ;;  %v158_v59 = vadd.f32 %v3122_v31, %v93_v33 }
 0x11b   :  { %v3163_v62 = vadd.f32 %v270_v61, %v3125_v32  ;;  %v272_v63 = vpop.f32.mrb[7].mxu1  ;;  %v160_v61 = vadd.f32 %v159_v34, %v97_v36 }
 0x11c   :  { %v3166_v1 = vadd.f32 %v272_v63, %v3129_v35 }
 0x11e   :  { %v177_v2 = vpop.f32.mrb[8].mxu0 }
 0x11f   :  { %v3168_v3 = vadd.f32 %v177_v2, %v93_v33  ;;  %v179_v4 = vpop.f32.mrb[9].mxu0 }
 0x120   :  { %v3170_v5 = vadd.f32 %v179_v4, %v97_v36  ;;  %v181_v6 = vpop.f32.mrb[10].mxu0  ;;  %v276_v11 = vpop.f32.mrb[8].mxu1 }
 0x121   :  { %v3172_v8 = vadd.f32 %v181_v6, %v93_v33  ;;  %v183_v10 = vpop.f32.mrb[11].mxu0  ;;  %v3177_v18 = vadd.f32 %v276_v11, %v3125_v32  ;;  %v278_v19 = vpop.f32.mrb[9].mxu1 }
 0x122   :  { %v3174_v15 = vadd.f32 %v183_v10, %v97_v36  ;;  %v3180_v21 = vadd.f32 %v278_v19, %v3129_v35  ;;  %v280_v22 = vpop.f32.mrb[10].mxu1 }
 0x123   :  { %v3183_v23 = vadd.f32 %v280_v22, %v3125_v32  ;;  %v282_v24 = vpop.f32.mrb[11].mxu1 }
 0x124   :  { %v3186_v25 = vadd.f32 %v282_v24, %v3129_v35 }
 0x126   :  { %v187_v26 = vpop.f32.mrb[12].mxu0 }
 0x127   :  { %v3188_v28 = vadd.f32 %v187_v26, %v93_v33  ;;  %v189_v29 = vpop.f32.mrb[13].mxu0 }
 0x128   :  { %v3190_v37 = vadd.f32 %v189_v29, %v97_v36  ;;  %v191_v39 = vpop.f32.mrb[14].mxu0  ;;  %v286_v45 = vpop.f32.mrb[12].mxu1 }
 0x129   :  { %v3192_v40 = vadd.f32 %v191_v39, %v93_v33  ;;  %v193_v43 = vpop.f32.mrb[15].mxu0  ;;  %v287_v49 = vadd.f32 %v286_v45, %v3125_v32  ;;  %v288_v51 = vpop.f32.mrb[13].mxu1 }
 0x12a   :  { %v3194_v47 = vadd.f32 %v193_v43, %v97_v36  ;;  %v289_v53 = vadd.f32 %v288_v51, %v3129_v35  ;;  %v290_v55 = vpop.f32.mrb[14].mxu1 }
 0x12b   :  { %v292_v56 = vpop.f32.mrb[15].mxu1  ;;  %v291_v2 = vadd.f32 %v290_v55, %v3125_v32 }
 0x12c   :  { %v293_v10 = vadd.f32 %v292_v56, %v3129_v35 }
 0x12e   :  { %v415_v63 = vpop.f32.mrb[16].mxu0 }
 0x12f   :  { %v416_v4 = vadd.f32 %v415_v63, %v158_v59  ;;  %v417_v6 = vpop.f32.mrb[17].mxu0 }
 0x130   :  { %v418_v11 = vadd.f32 %v417_v6, %v160_v61  ;;  %v419_v19 = vpop.f32.mrb[18].mxu0 }
 0x131   :  { %v425_v22 = vadd.f32 %v416_v4, %v291_v2  ;;  %v420_v24 = vpop.f32.mrb[19].mxu0 }
 0x132   :  { %v426_v26 = vadd.f32 %v418_v11, %v293_v10 }
 0x133   :  { %v2420_v29 = vmul.f32 -1.442695, %v425_v22 }
 0x134   :  { %v2421_v32 = vmul.f32 -1.442695, %v426_v26 }
 0x135   :  { %2652 = vpow2.f32 %v2420_v29 }
 0x136   :  { %2654 = vtanh.f32 %v426_v26 }
 0x13f   :  { %v2653_v39 = vpop.eup %2652 }
 0x140   :  { %v433_v43 = vadd.f32 1.0, %v2653_v39  ;;  %v2655_v31 = vpop.eup %2654 }
 0x142   :  { %2656 = vrcp.f32 %v433_v43 }
 0x143   :  { %2658 = vpow2.f32 %v2421_v32 }
 0x14c   :  { %v2657_v33 = vpop.eup %2656 }
 0x14d   :  { %v441_v34 = vmul.f32 %v2657_v33, %v2655_v31  ;;  %v2659_v35 = vpop.eup %2658  ;;  %v440_v45 = vmul.f32 0.0, %v2657_v33 }
 0x14e   :  { %v434_v36 = vadd.f32 1.0, %v2659_v35 }
 0x14f   :  { %443 = vrot.lane.b32.xlu0 %v441_v34, %s2920_s2 }
 0x150   :  { %2660 = vrcp.f32 %v434_v36 }
 0x15a   :  { %v2661_v56 = vpop.eup %2660 }
 0x1c1   :  { %v444_v51 = vpop.permute.xlu0 %443 }
 0x1c2   :  { %v446_v55 = vadd.f32 %v444_v51, %v440_v45 }
 0x1c4   :  { %2662 = vtanh.f32 %v446_v55 }
 0x1ce   :  { %v2663_v59 = vpop.eup %2662 }
 0x1cf   :  { %v3202_v61 = vmul.f32 %v2663_v59, %v2661_v56 }
 0x1d1   :  { %v460_v63 = vpack.c.bf16 %v3202_v61, %v3202_v61 }
 0x1d3   :  { %465 = vrot.lane.b32.xlu0 %v460_v63, %s2920_s2 }
 0x245   :  { %v466_v2 = vpop.permute.xlu0 %465 }
 0x246   :  { %2422 = vmatmul.mubr.msk.bf16.vlgmr.msra.gmra.mrb[16].mxu1 %vm377_vm1, %v466_v2 }
 0x247   :  { %649 = vmatpush1.bf16.msra.mxu1 %v3036_v9  ;;  %680 = vmatprep.mubr.bf16.mxu1 %v2919_v0 }
 0x248   :  { %650 = vmatprep.subr.bf16.mxu1 %v3046_v12 }
 0x24b   :  { %651 = vmatpush1.bf16.msra.mxu1 %v3050_v13 }
 0x24c   :  { %652 = vmatprep.subr.bf16.mxu1 %v3053_v14 }
 0x24f   :  { %653 = vmatpush1.bf16.msra.mxu1 %v3058_v16 }
 0x250   :  { %654 = vmatprep.subr.bf16.mxu1 %v3060_v17 }
 0x253   :  { %655 = vmatpush1.bf16.msra.mxu1 %v3072_v20 }
 0x254   :  { %826 = vmatprep.subr.bf16.mxu1 %v3034_v7 }
 0x319   :  { %v504_v4 = vpop.f32.mrb[16].mxu1 }
 0x31a   :  { %v505_v6 = vadd.f32 %v504_v4, %v3132_v38  ;;  %v506_v10 = vpop.f32.mrb[17].mxu1 }
 0x31b   :  { %v507_v11 = vadd.f32 %v506_v10, %v3134_v41  ;;  %v508_v19 = vpop.f32.mrb[18].mxu1 }
 0x31c   :  { %v514_v22 = vadd.f32 %v505_v6, %v287_v49  ;;  %v509_v24 = vpop.f32.mrb[19].mxu1 }
 0x31d   :  { %v515_v26 = vadd.f32 %v507_v11, %v289_v53 }
 0x31e   :  { %v2423_v29 = vmul.f32 -1.442695, %v514_v22 }
 0x31f   :  { %v2424_v32 = vmul.f32 -1.442695, %v515_v26 }
 0x320   :  { %2664 = vpow2.f32 %v2423_v29 }
 0x321   :  { %2666 = vtanh.f32 %v515_v26 }
 0x32a   :  { %v2665_v39 = vpop.eup %2664 }
 0x32b   :  { %v522_v43 = vadd.f32 1.0, %v2665_v39  ;;  %v2667_v31 = vpop.eup %2666 }
 0x32d   :  { %2668 = vrcp.f32 %v522_v43 }
 0x32e   :  { %2670 = vpow2.f32 %v2424_v32 }
 0x337   :  { %v2669_v33 = vpop.eup %2668 }
 0x338   :  { %v530_v34 = vmul.f32 %v2669_v33, %v2667_v31  ;;  %v2671_v38 = vpop.eup %2670  ;;  %v529_v41 = vmul.f32 %v2669_v33, %v446_v55 }
 0x339   :  { %v523_v35 = vadd.f32 1.0, %v2671_v38 }
 0x33a   :  { %532 = vrot.lane.b32.xlu1 %v530_v34, %s2920_s2 }
 0x33b   :  { %2672 = vrcp.f32 %v523_v35 }
 0x345   :  { %v2673_v53 = vpop.eup %2672 }
 0x3ac   :  { %v533_v36 = vpop.permute.xlu1 %532 }
 0x3ad   :  { %v535_v49 = vadd.f32 %v533_v36, %v529_v41 }
 0x3af   :  { %2674 = vtanh.f32 %v535_v49 }
 0x3b9   :  { %v2675_v45 = vpop.eup %2674 }
 0x3ba   :  { %v3220_v51 = vmul.f32 %v2675_v45, %v2673_v53 }
 0x3bc   :  { %v549_v56 = vpack.c.bf16 %v3220_v51, %v3220_v51 }
 0x3be   :  { %554 = vrot.lane.b32.xlu1 %v549_v56, %s2920_s2 }
 0x430   :  { %v555_v59 = vpop.permute.xlu1 %554 }
 0x431   :  { %2425 = vmatmul.mubr.msk.bf16.vlgmr.msra.gmra.mrb[20].mxu0 %vm377_vm1, %v555_v59 }
 0x432   :  { %738 = vmatpush1.bf16.msra.mxu0 %v3036_v9  ;;  %769 = vmatprep.mubr.bf16.mxu0 %v2919_v0 }
 0x433   :  { %739 = vmatprep.subr.bf16.mxu0 %v3046_v12 }
 0x436   :  { %740 = vmatpush1.bf16.msra.mxu0 %v3050_v13 }
 0x437   :  { %741 = vmatprep.subr.bf16.mxu0 %v3053_v14 }
 0x43a   :  { %742 = vmatpush1.bf16.msra.mxu0 %v3058_v16 }
 0x43b   :  { %743 = vmatprep.subr.bf16.mxu0 %v3060_v17 }
 0x43e   :  { %744 = vmatpush1.bf16.msra.mxu0 %v3072_v20 }
 0x43f   :  { %915 = vmatprep.subr.bf16.mxu0 %v3034_v7 }
 0x504   :  { %v593_v55 = vpop.f32.mrb[20].mxu0 }
 0x505   :  { %v594_v63 = vadd.f32 %v593_v55, %v3148_v50  ;;  %v595_v2 = vpop.f32.mrb[21].mxu0 }
 0x506   :  { %v596_v4 = vadd.f32 %v595_v2, %v3150_v52  ;;  %v597_v6 = vpop.f32.mrb[22].mxu0 }
 0x507   :  { %v603_v10 = vadd.f32 %v594_v63, %v3183_v23  ;;  %v598_v11 = vpop.f32.mrb[23].mxu0 }
 0x508   :  { %v604_v19 = vadd.f32 %v596_v4, %v3186_v25 }
 0x509   :  { %v2426_v22 = vmul.f32 -1.442695, %v603_v10 }
 0x50a   :  { %v2427_v50 = vmul.f32 -1.442695, %v604_v19 }
 0x50b   :  { %2676 = vpow2.f32 %v2426_v22 }
 0x50c   :  { %2678 = vtanh.f32 %v604_v19 }
 0x515   :  { %v2677_v24 = vpop.eup %2676 }
 0x516   :  { %v611_v26 = vadd.f32 1.0, %v2677_v24  ;;  %v2679_v29 = vpop.eup %2678 }
 0x518   :  { %2680 = vrcp.f32 %v611_v26 }
 0x519   :  { %2682 = vpow2.f32 %v2427_v50 }
 0x522   :  { %v2681_v39 = vpop.eup %2680 }
 0x523   :  { %v619_v43 = vmul.f32 %v2681_v39, %v2679_v29  ;;  %v2683_v52 = vpop.eup %2682  ;;  %v618_v33 = vmul.f32 %v2681_v39, %v535_v49 }
 0x524   :  { %v612_v31 = vadd.f32 1.0, %v2683_v52 }
 0x525   :  { %621 = vrot.lane.b32.xlu0 %v619_v43, %s2920_s2 }
 0x526   :  { %2684 = vrcp.f32 %v612_v31 }
 0x530   :  { %v2685_v25 = vpop.eup %2684 }
 0x597   :  { %v622_v23 = vpop.permute.xlu0 %621 }
 0x598   :  { %v624_v34 = vadd.f32 %v622_v23, %v618_v33 }
 0x59a   :  { %2686 = vtanh.f32 %v624_v34 }
 0x5a4   :  { %v2687_v32 = vpop.eup %2686 }
 0x5a5   :  { %v3240_v38 = vmul.f32 %v2687_v32, %v2685_v25 }
 0x5a7   :  { %v638_v35 = vpack.c.bf16 %v3240_v38, %v3240_v38 }
 0x5a9   :  { %643 = vrot.lane.b32.xlu1 %v638_v35, %s2920_s2 }
 0x61b   :  { %v644_v41 = vpop.permute.xlu1 %643 }
 0x61c   :  { %2428 = vmatmul.mubr.msk.bf16.vlgmr.msra.gmra.mrb[20].mxu1 %vm377_vm1, %v644_v41 }
 0x61d   :  { %827 = vmatpush1.bf16.msra.mxu1 %v3036_v9  ;;  %858 = vmatprep.mubr.bf16.mxu1 %v2919_v0 }
 0x61e   :  { %828 = vmatprep.subr.bf16.mxu1 %v3046_v12 }
 0x621   :  { %829 = vmatpush1.bf16.msra.mxu1 %v3050_v13 }
 0x622   :  { %830 = vmatprep.subr.bf16.mxu1 %v3053_v14 }
 0x625   :  { %831 = vmatpush1.bf16.msra.mxu1 %v3058_v16 }
 0x626   :  { %832 = vmatprep.subr.bf16.mxu1 %v3060_v17 }
 0x629   :  { %833 = vmatpush1.bf16.msra.mxu1 %v3072_v20 }
 0x62a   :  { %1004 = vmatprep.subr.bf16.mxu1 %v3034_v7 }
 0x6ef   :  { %v682_v36 = vpop.f32.mrb[20].mxu1 }
 0x6f0   :  { %v683_v49 = vadd.f32 %v682_v36, %v3152_v54  ;;  %v684_v53 = vpop.f32.mrb[21].mxu1 }
 0x6f1   :  { %v685_v45 = vadd.f32 %v684_v53, %v3154_v57  ;;  %v686_v56 = vpop.f32.mrb[22].mxu1 }
 0x6f2   :  { %v692_v59 = vadd.f32 %v683_v49, %v3177_v18  ;;  %v687_v55 = vpop.f32.mrb[23].mxu1 }
 0x6f3   :  { %v693_v63 = vadd.f32 %v685_v45, %v3180_v21 }
 0x6f4   :  { %v2429_v2 = vmul.f32 -1.442695, %v692_v59 }
 0x6f5   :  { %v2430_v54 = vmul.f32 -1.442695, %v693_v63 }
 0x6f6   :  { %2688 = vpow2.f32 %v2429_v2 }
 0x6f7   :  { %2690 = vtanh.f32 %v693_v63 }
 0x700   :  { %v2689_v4 = vpop.eup %2688 }
 0x701   :  { %v700_v6 = vadd.f32 1.0, %v2689_v4  ;;  %v2691_v10 = vpop.eup %2690 }
 0x703   :  { %2692 = vrcp.f32 %v700_v6 }
 0x704   :  { %2694 = vpow2.f32 %v2430_v54 }
 0x70d   :  { %v2693_v7 = vpop.eup %2692 }
 0x70e   :  { %v708_v11 = vmul.f32 %v2693_v7, %v2691_v10  ;;  %v2695_v57 = vpop.eup %2694  ;;  %v707_v22 = vmul.f32 %v2693_v7, %v624_v34 }
 0x70f   :  { %v701_v19 = vadd.f32 1.0, %v2695_v57 }
 0x710   :  { %710 = vrot.lane.b32.xlu0 %v708_v11, %s2920_s2 }
 0x711   :  { %2696 = vrcp.f32 %v701_v19 }
 0x71b   :  { %v2697_v21 = vpop.eup %2696 }
 0x782   :  { %v711_v18 = vpop.permute.xlu0 %710 }
 0x783   :  { %v713_v24 = vadd.f32 %v711_v18, %v707_v22 }
 0x785   :  { %2698 = vtanh.f32 %v713_v24 }
 0x78f   :  { %v2699_v26 = vpop.eup %2698 }
 0x790   :  { %v3260_v29 = vmul.f32 %v2699_v26, %v2697_v21 }
 0x792   :  { %v727_v39 = vpack.c.bf16 %v3260_v29, %v3260_v29 }
 0x794   :  { %732 = vrot.lane.b32.xlu1 %v727_v39, %s2920_s2 }
 0x806   :  { %v733_v43 = vpop.permute.xlu1 %732 }
 0x807   :  { %2431 = vmatmul.mubr.msk.bf16.vlgmr.msra.gmra.mrb[24].mxu0 %vm377_vm1, %v733_v43 }
 0x808   :  { %916 = vmatpush1.bf16.msra.mxu0 %v3036_v9  ;;  %947 = vmatprep.mubr.bf16.mxu0 %v2919_v0 }
 0x809   :  { %917 = vmatprep.subr.bf16.mxu0 %v3046_v12 }
 0x80c   :  { %918 = vmatpush1.bf16.msra.mxu0 %v3050_v13 }
 0x80d   :  { %919 = vmatprep.subr.bf16.mxu0 %v3053_v14 }
 0x810   :  { %920 = vmatpush1.bf16.msra.mxu0 %v3058_v16 }
 0x811   :  { %921 = vmatprep.subr.bf16.mxu0 %v3060_v17 }
 0x814   :  { %922 = vmatpush1.bf16.msra.mxu0 %v3072_v20 }
 0x8da   :  { %v771_v50 = vpop.f32.mrb[24].mxu0 }
 0x8db   :  { %v772_v52 = vadd.f32 %v771_v50, %v3168_v3  ;;  %v773_v31 = vpop.f32.mrb[25].mxu0 }
 0x8dc   :  { %v774_v33 = vadd.f32 %v773_v31, %v3170_v5  ;;  %v775_v23 = vpop.f32.mrb[26].mxu0 }
 0x8dd   :  { %v781_v34 = vadd.f32 %v772_v52, %v3163_v62  ;;  %v776_v25 = vpop.f32.mrb[27].mxu0 }
 0x8de   :  { %v782_v32 = vadd.f32 %v774_v33, %v3166_v1 }
 0x8df   :  { %v2432_v35 = vmul.f32 -1.442695, %v781_v34 }
 0x8e0   :  { %v2433_v3 = vmul.f32 -1.442695, %v782_v32 }
 0x8e1   :  { %2700 = vpow2.f32 %v2432_v35 }
 0x8e2   :  { %2702 = vtanh.f32 %v782_v32 }
 0x8eb   :  { %v2701_v41 = vpop.eup %2700 }
 0x8ec   :  { %v789_v36 = vadd.f32 1.0, %v2701_v41  ;;  %v2703_v49 = vpop.eup %2702 }
 0x8ee   :  { %2704 = vrcp.f32 %v789_v36 }
 0x8ef   :  { %2706 = vpow2.f32 %v2433_v3 }
 0x8f8   :  { %v2705_v53 = vpop.eup %2704 }
 0x8f9   :  { %v797_v45 = vmul.f32 %v2705_v53, %v2703_v49  ;;  %v2707_v5 = vpop.eup %2706  ;;  %v796_v59 = vmul.f32 %v2705_v53, %v713_v24 }
 0x8fa   :  { %v790_v56 = vadd.f32 1.0, %v2707_v5 }
 0x8fb   :  { %799 = vrot.lane.b32.xlu0 %v797_v45, %s2920_s2 }
 0x8fc   :  { %2708 = vrcp.f32 %v790_v56 }
 0x906   :  { %v2709_v1 = vpop.eup %2708 }
 0x96d   :  { %v800_v62 = vpop.permute.xlu0 %799 }
 0x96e   :  { %v802_v55 = vadd.f32 %v800_v62, %v796_v59 }
 0x970   :  { %2710 = vtanh.f32 %v802_v55 }
 0x97a   :  { %v2711_v63 = vpop.eup %2710 }
 0x97b   :  { %v3279_v2 = vmul.f32 %v2711_v63, %v2709_v1 }
 0x97d   :  { %v816_v4 = vpack.c.bf16 %v3279_v2, %v3279_v2 }
 0x97f   :  { %821 = vrot.lane.b32.xlu1 %v816_v4, %s2920_s2 }
 0x9f1   :  { %v822_v6 = vpop.permute.xlu1 %821 }
 0x9f2   :  { %2434 = vmatmul.mubr.msk.bf16.vlgmr.msra.gmra.mrb[24].mxu1 %vm377_vm1, %v822_v6 }
 0x9f3   :  { %1005 = vmatpush1.bf16.msra.mxu1 %v3036_v9  ;;  %1036 = vmatprep.mubr.bf16.mxu1 %v2919_v0 }
 0x9f4   :  { %1006 = vmatprep.subr.bf16.mxu1 %v3046_v12 }
 0x9f7   :  { %1007 = vmatpush1.bf16.msra.mxu1 %v3050_v13 }
 0x9f8   :  { %1008 = vmatprep.subr.bf16.mxu1 %v3053_v14 }
 0x9fb   :  { %1009 = vmatpush1.bf16.msra.mxu1 %v3058_v16 }
 0x9fc   :  { %1010 = vmatprep.subr.bf16.mxu1 %v3060_v17 }
 0x9ff   :  { %1011 = vmatpush1.bf16.msra.mxu1 %v3072_v20 }
 0xac5   :  { %v860_v10 = vpop.f32.mrb[24].mxu1 }
 0xac6   :  { %v861_v7 = vadd.f32 %v860_v10, %v3172_v8  ;;  %v862_v11 = vpop.f32.mrb[25].mxu1 }
 0xac7   :  { %v863_v9 = vadd.f32 %v862_v11, %v3174_v15  ;;  %v864_v54 = vpop.f32.mrb[26].mxu1 }
 0xac8   :  { %v870_v57 = vadd.f32 %v861_v7, %v3157_v58  ;;  %v865_v12 = vpop.f32.mrb[27].mxu1 }
 0xac9   :  { %v871_v13 = vadd.f32 %v863_v9, %v3160_v60 }
 0xaca   :  { %v2435_v19 = vmul.f32 -1.442695, %v870_v57 }
 0xacb   :  { %v2436_v8 = vmul.f32 -1.442695, %v871_v13 }
 0xacc   :  { %2712 = vpow2.f32 %v2435_v19 }
 0xacd   :  { %2714 = vtanh.f32 %v871_v13 }
 0xad6   :  { %v2713_v14 = vpop.eup %2712 }
 0xad7   :  { %v878_v16 = vadd.f32 1.0, %v2713_v14  ;;  %v2715_v17 = vpop.eup %2714 }
 0xad9   :  { %2716 = vrcp.f32 %v878_v16 }
 0xada   :  { %2718 = vpow2.f32 %v2436_v8 }
 0xae3   :  { %v2717_v20 = vpop.eup %2716 }
 0xae4   :  { %v886_v22 = vmul.f32 %v2717_v20, %v2715_v17  ;;  %v2719_v15 = vpop.eup %2718  ;;  %v885_v24 = vmul.f32 %v2717_v20, %v802_v55 }
 0xae5   :  { %v879_v18 = vadd.f32 1.0, %v2719_v15 }
 0xae6   :  { %888 = vrot.lane.b32.xlu0 %v886_v22, %s2920_s2 }
 0xae7   :  { %2720 = vrcp.f32 %v879_v18 }
 0xaf1   :  { %v2721_v60 = vpop.eup %2720 }
 0xb58   :  { %v889_v58 = vpop.permute.xlu0 %888 }
 0xb59   :  { %v891_v21 = vadd.f32 %v889_v58, %v885_v24 }
 0xb5b   :  { %2722 = vtanh.f32 %v891_v21 }
 0xb65   :  { %v2723_v26 = vpop.eup %2722 }
 0xb66   :  { %v3298_v39 = vmul.f32 %v2723_v26, %v2721_v60  ;;  %v2614_v60 = vld [vmem:[%s3688_s4 + $0x24] ss:$8 sps:$4 sm:$0xff]   ;;  %v2615_v26 = vld [vmem:[%s3688_s4 + $0x60] ss:$8 sps:$4 sm:$0xff]  }
 0xb67   :  { %1146 = vmatprep.subr.bf16.mxu0 %v2614_v60 }
 0xb68   :  { %v905_v43 = vpack.c.bf16 %v3298_v39, %v3298_v39 }
 0xb6a   :  { %910 = vrot.lane.b32.xlu1 %v905_v43, %s2920_s2  ;;  %v2617_v43 = vld [vmem:[%s3688_s4 + $0x64] ss:$8 sps:$4 sm:$0xff]  }
 0xb6b   :  { %1382 = vmatprep.subr.bf16.mxu1 %v2617_v43 }
 0xbdc   :  { %v911_v50 = vpop.permute.xlu1 %910 }
 0xbdd   :  { %2437 = vmatmul.mubr.msk.bf16.vlgmr.msra.gmra.mrb[28].mxu0 %vm377_vm1, %v911_v50  ;;  %v2618_v50 = vld [vmem:[%s3688_s4 + $0x30] ss:$8 sps:$4 sm:$0xff]  }
 0xbde   :  { %1178 = vmatprep.mubr.bf16.mxu0 %v2919_v0 }
 0xcb0   :  { %v949_v52 = vpop.f32.mrb[28].mxu0 }
 0xcb1   :  { %v950_v31 = vadd.f32 %v949_v52, %v3188_v28  ;;  %v951_v33 = vpop.f32.mrb[29].mxu0  ;;  %v2620_v52 = vld [vmem:[%s3688_s4 + $0x34] ss:$8 sps:$4 sm:$0xff]  }
 0xcb2   :  { %v952_v23 = vadd.f32 %v951_v33, %v3190_v37  ;;  %v953_v34 = vpop.f32.mrb[30].mxu0  ;;  %v2623_v33 = vld [vmem:[%s3688_s4 + $0x74] ss:$8 sps:$4 sm:$0xff]  }
 0xcb3   :  { %v959_v25 = vadd.f32 %v950_v31, %v3143_v46  ;;  %v954_v32 = vpop.f32.mrb[31].mxu0  ;;  %v2621_v31 = vld [vmem:[%s3688_s4 + $0x70] ss:$8 sps:$4 sm:$0xff]  }
 0xcb4   :  { %v960_v35 = vadd.f32 %v952_v23, %v3146_v48 }
 0xcb5   :  { %v2438_v41 = vmul.f32 -1.442695, %v959_v25  ;;  %v2626_v25 = vld [vmem:[%s3688_s4 + $0x4] ss:$8 sps:$4 sm:$0xff]  }
 0xcb6   :  { %v2439_v28 = vmul.f32 -1.442695, %v960_v35 }
 0xcb7   :  { %2724 = vpow2.f32 %v2438_v41 }
 0xcb8   :  { %2726 = vtanh.f32 %v960_v35  ;;  %v2629_v35 = vld [vmem:[%s3688_s4 + $0x44] ss:$8 sps:$4 sm:$0xff]  }
 0xcc1   :  { %v2725_v36 = vpop.eup %2724 }
 0xcc2   :  { %v967_v49 = vadd.f32 1.0, %v2725_v36  ;;  %v2727_v53 = vpop.eup %2726 }
 0xcc4   :  { %2728 = vrcp.f32 %v967_v49 }
 0xcc5   :  { %2730 = vpow2.f32 %v2439_v28  ;;  %v2635_v28 = vld [vmem:[%s3688_s4 + $0x54] ss:$8 sps:$4 sm:$0xff]  }
 0xcce   :  { %v2729_v45 = vpop.eup %2728 }
 0xccf   :  { %v975_v3 = vmul.f32 %v2729_v45, %v2727_v53  ;;  %v2731_v37 = vpop.eup %2730  ;;  %v974_v56 = vmul.f32 %v2729_v45, %v891_v21 }
 0xcd0   :  { %v968_v5 = vadd.f32 1.0, %v2731_v37 }
 0xcd1   :  { %977 = vrot.lane.b32.xlu0 %v975_v3, %s2920_s2  ;;  %v2632_v3 = vld [vmem:[%s3688_s4 + $0x14] ss:$8 sps:$4 sm:$0xff]  }
 0xcd2   :  { %2732 = vrcp.f32 %v968_v5  ;;  %v2630_v5 = vld [vmem:[%s3688_s4 + $0x10] ss:$8 sps:$4 sm:$0xff]  }
 0xcdc   :  { %v2733_v48 = vpop.eup %2732 }
 0xd43   :  { %v978_v46 = vpop.permute.xlu0 %977 }
 0xd44   :  { %v980_v59 = vadd.f32 %v978_v46, %v974_v56  ;;  %v2633_v56 = vld [vmem:[%s3688_s4 + $0x50] ss:$8 sps:$4 sm:$0xff]   ;;  %v3410_v46 = vld [vmem:[#allocation10 + $0x4] ss:$8 sps:$4 sm:$0xff]  }
 0xd46   :  { %2734 = vtanh.f32 %v980_v59 }
 0xd50   :  { %v2735_v62 = vpop.eup %2734 }
 0xd51   :  { %v982_v55 = vmul.f32 %v2735_v62, %v2733_v48 }
 0xd53   :  { %v994_v1 = vpack.c.bf16 %v982_v55, %v982_v55 }
 0xd55   :  { %999 = vrot.lane.b32.xlu1 %v994_v1, %s2920_s2 }
 0xd59   :  { %989 = vrot.lane.b32.xlu1 %v982_v55, %s2921_s23 }
 0xd5d   :  { %811 = vrot.lane.b32.xlu1 %v3279_v2, %s2921_s23 }
 0xd61   :  { %633 = vrot.lane.b32.xlu1 %v3240_v38, %s2921_s23 }
 0xd65   :  { %455 = vrot.lane.b32.xlu1 %v3202_v61, %s2921_s23 }
 0xd69   :  { %450 = vrot.lane.b32.xlu1 %v3202_v61, %s2920_s2 }
 0xd6d   :  { %628 = vrot.lane.b32.xlu1 %v3240_v38, %s2920_s2 }
 0xd71   :  { %806 = vrot.lane.b32.xlu1 %v3279_v2, %s2920_s2 }
 0xd75   :  { %984 = vrot.lane.b32.xlu1 %v982_v55, %s2920_s2 }
 0xdc7   :  { %v1000_v63 = vpop.permute.xlu1 %999 }
 0xdc8   :  { %2440 = vmatmul.mubr.msk.bf16.vlgmr.msra.gmra.mrb[28].mxu1 %vm377_vm1, %v1000_v63 }
 0xdc9   :  { %1414 = vmatprep.mubr.bf16.mxu1 %v2919_v0  ;;  %1383 = vmatpush1.bf16.msra.mxu1 %v2615_v26 }
 0xdca   :  { %1384 = vmatprep.subr.bf16.mxu1 %v2623_v33 }
 0xdcb   :  { %v990_v4 = vpop.permute.xlu1 %989 }
 0xdcc   :  { %993 = vst.msk [vmem:[#allocation5 + $0x8] sm:$0xff] %vm453_vm2, %v990_v4 }
 0xdcd   :  { %1385 = vmatpush1.bf16.msra.mxu1 %v2621_v31 }
 0xdce   :  { %1475 = vmatprep.subr.bf16.mxu1 %v2629_v35 }
 0xdcf   :  { %v812_v6 = vpop.permute.xlu1 %811 }
 0xdd0   :  { %815 = vst.msk [vmem:[#allocation5 + $0x18] sm:$0xff] %vm453_vm2, %v812_v6 }
 0xdd3   :  { %v634_v61 = vpop.permute.xlu1 %633  ;;  %v1094_v45 = vld [vmem:[#allocation5 + $0x8] sm:$0xff] }
 0xdd4   :  { %637 = vst.msk [vmem:[#allocation5 + $0x28] sm:$0xff] %vm453_vm2, %v634_v61 }
 0xdd7   :  { %v456_v38 = vpop.permute.xlu1 %455  ;;  %v1096_v62 = vld [vmem:[#allocation5 + $0x18] sm:$0xff] }
 0xdd8   :  { %459 = vst.msk [vmem:[#allocation5 + $0x38] sm:$0xff] %vm453_vm2, %v456_v38 }
 0xddb   :  { %v451_v2 = vpop.permute.xlu1 %450  ;;  %v1098_v6 = vld [vmem:[#allocation5 + $0x28] sm:$0xff] }
 0xddc   :  { %454 = vst.msk [vmem:[#allocation4] sm:$0xff] %vm453_vm2, %v451_v2 }
 0xddf   :  { %v629_v10 = vpop.permute.xlu1 %628 }
 0xde0   :  { %632 = vst.msk [vmem:[#allocation4 + $0x10] sm:$0xff] %vm453_vm2, %v629_v10  ;;  %v1100_v10 = vld [vmem:[#allocation5 + $0x38] sm:$0xff] }
 0xde3   :  { %v807_v7 = vpop.permute.xlu1 %806 }
 0xde4   :  { %810 = vst.msk [vmem:[#allocation4 + $0x20] sm:$0xff] %vm453_vm2, %v807_v7 }
 0xde7   :  { %v985_v11 = vpop.permute.xlu1 %984 }
 0xde8   :  { %988 = vst.msk [vmem:[#allocation4 + $0x30] sm:$0xff] %vm453_vm2, %v985_v11 }
 0xe9b   :  { %v1038_v9 = vpop.f32.mrb[28].mxu1 }
 0xe9c   :  { %v1039_v54 = vadd.f32 %v1038_v9, %v3192_v40  ;;  %v1040_v57 = vpop.f32.mrb[29].mxu1  ;;  %v1081_v9 = vld [vmem:[#allocation4] sm:$0xff] }
 0xe9d   :  { %v1041_v12 = vadd.f32 %v1040_v57, %v3194_v47  ;;  %v1042_v13 = vpop.f32.mrb[30].mxu1 }
 0xe9e   :  { %v1047_v19 = vadd.f32 %v1039_v54, %v3137_v42  ;;  %v1043_v14 = vpop.f32.mrb[31].mxu1  ;;  %v3430_v54 = vld [vmem:[#allocation10] ss:$8 sps:$4 sm:$0xff]   ;;  %v3438_v13 = vld [vmem:[#allocation10 + $0x10] ss:$8 sps:$4 sm:$0xff]  }
 0xe9f   :  { %v1048_v16 = vadd.f32 %v1041_v12, %v3140_v44  ;;  %v2612_v44 = vld [vmem:[%s3688_s4 + $0x20] ss:$8 sps:$4 sm:$0xff]   ;;  %v3432_v12 = vld [vmem:[#allocation10 + $0x14] ss:$8 sps:$4 sm:$0xff]  }
 0xea0   :  { %v2441_v17 = vmul.f32 -1.442695, %v1047_v19  ;;  %1147 = vmatpush1.bf16.msra.mxu0 %v2612_v44  ;;  %v3442_v19 = vld [vmem:[#allocation10 + $0x24] ss:$8 sps:$4 sm:$0xff]   ;;  %v1324_v44 = vld [vmem:[%s3689_s5] sm:$0x3] }
 0xea1   :  { %v2442_v40 = vmul.f32 -1.442695, %v1048_v16  ;;  %1148 = vmatprep.subr.bf16.mxu0 %v2620_v52 }
 0xea2   :  { %2736 = vpow2.f32 %v2441_v17 }
 0xea3   :  { %2738 = vtanh.f32 %v1048_v16  ;;  %v1083_v16 = vld [vmem:[#allocation4 + $0x10] sm:$0xff] }
 0xea4   :  { %1149 = vmatpush1.bf16.msra.mxu0 %v2618_v50  ;;  %v1329_v50 = vrot.slane %v1324_v44, %v3112_v27 }
 0xea5   :  { %1251 = vmatprep.subr.bf16.mxu0 %v2626_v25 }
 0xeac   :  { %v2737_v20 = vpop.eup %2736 }
 0xead   :  { %v1055_v22 = vadd.f32 1.0, %v2737_v20  ;;  %v2739_v8 = vpop.eup %2738  ;;  %v3448_v20 = vld [vmem:[#allocation10 + $0x20] ss:$8 sps:$4 sm:$0xff]  }
 0xeaf   :  { %2740 = vrcp.f32 %v1055_v22  ;;  %v3450_v22 = vld [vmem:[#allocation10 + $0x34] ss:$8 sps:$4 sm:$0xff]  }
 0xeb0   :  { %2742 = vpow2.f32 %v2442_v40 }
 0xeb9   :  { %v2741_v15 = vpop.eup %2740 }
 0xeba   :  { %v1063_v18 = vmul.f32 %v2741_v15, %v2739_v8  ;;  %v2743_v47 = vpop.eup %2742  ;;  %v1062_v58 = vmul.f32 %v2741_v15, %v980_v59  ;;  %v3458_v8 = vld [vmem:[#allocation10 + $0x30] ss:$8 sps:$4 sm:$0xff]  }
 0xebb   :  { %v1056_v24 = vadd.f32 1.0, %v2743_v47 }
 0xebc   :  { %1065 = vrot.lane.b32.xlu0 %v1063_v18, %s2920_s2  ;;  %v1085_v18 = vld [vmem:[#allocation4 + $0x20] sm:$0xff] }
 0xebd   :  { %2744 = vrcp.f32 %v1056_v24  ;;  %v1087_v24 = vld [vmem:[#allocation4 + $0x30] sm:$0xff] }
 0xec7   :  { %v2745_v23 = vpop.eup %2744 }
 0xf2e   :  { %v1066_v42 = vpop.permute.xlu0 %1065 }
 0xf2f   :  { %v1068_v21 = vadd.f32 %v1066_v42, %v1062_v58  ;;  %v2487_v42 = vld [vmem:[%s3689_s5 + $0x2] sm:$0x3] }
 0xf30   :  { %v3496_v60 = vrot.slane %v2487_v42, %v3120_v30 }
 0xf31   :  { %2746 = vtanh.f32 %v1068_v21  ;;  %v3490_v21 = vrot.slane %v2487_v42, %v3112_v27 }
 0xf3b   :  { %v2747_v34 = vpop.eup %2746 }
 0xf3c   :  { %v1070_v32 = vmul.f32 %v2747_v34, %v2745_v23  ;;  %v1333_v23 = vrot.slane %v1324_v44, %v3120_v30 }
 0xf3e   :  { %1077 = vrot.lane.b32.xlu0 %v1070_v32, %s2921_s23 }
 0xf42   :  { %900 = vrot.lane.b32.xlu0 %v3298_v39, %s2921_s23 }
 0xf46   :  { %722 = vrot.lane.b32.xlu0 %v3260_v29, %s2921_s23 }
 0xf4a   :  { %544 = vrot.lane.b32.xlu0 %v3220_v51, %s2921_s23 }
 0xf4e   :  { %539 = vrot.lane.b32.xlu0 %v3220_v51, %s2920_s2  ;;  %v2624_v51 = vld [vmem:[%s3688_s4] ss:$8 sps:$4 sm:$0xff]  }
 0xf52   :  { %717 = vrot.lane.b32.xlu0 %v3260_v29, %s2920_s2 }
 0xf56   :  { %895 = vrot.lane.b32.xlu0 %v3298_v39, %s2920_s2  ;;  %v2627_v39 = vld [vmem:[%s3688_s4 + $0x40] ss:$8 sps:$4 sm:$0xff]  }
 0xf5a   :  { %1072 = vrot.lane.b32.xlu0 %v1070_v32, %s2920_s2 }
 0xfb0   :  { %v1078_v41 = vpop.permute.xlu0 %1077 }
 0xfb1   :  { %1080 = vst.msk [vmem:[#allocation5] sm:$0xff] %vm453_vm2, %v1078_v41 }
 0xfb4   :  { %v901_v36 = vpop.permute.xlu0 %900 }
 0xfb5   :  { %904 = vst.msk [vmem:[#allocation5 + $0x10] sm:$0xff] %vm453_vm2, %v901_v36 }
 0xfb8   :  { %v723_v49 = vpop.permute.xlu0 %722  ;;  %v1093_v53 = vld [vmem:[#allocation5] sm:$0xff] }
 0xfb9   :  { %726 = vst.msk [vmem:[#allocation5 + $0x20] sm:$0xff] %vm453_vm2, %v723_v49  ;;  %v1101_v29 = vpack.c.bf16 %v1094_v45, %v1093_v53 }
 0xfbb   :  { %2451 = vmatmul.mubr.msk.bf16.vlgmr.msra.gmra.mrb[32].mxu0 %vm453_vm2, %v1101_v29  ;;  %2475 = vmatmul.mubr.msk.bf16.vlgmr.msra.gmra.mrb[32].mxu1 %vm453_vm2, %v1101_v29 }
 0xfbc   :  { %v545_v37 = vpop.permute.xlu0 %544  ;;  %1252 = vmatpush1.bf16.msra.mxu0 %v2624_v51  ;;  %1188 = vmatprep.mubr.bf16.mxu0 %v2919_v0  ;;  %v1095_v59 = vld [vmem:[#allocation5 + $0x10] sm:$0xff] }
 0xfbd   :  { %548 = vst.msk [vmem:[#allocation5 + $0x30] sm:$0xff] %vm453_vm2, %v545_v37  ;;  %1424 = vmatprep.mubr.bf16.mxu1 %v2919_v0  ;;  %1476 = vmatpush1.bf16.msra.mxu1 %v2627_v39  ;;  %v1102_v55 = vpack.c.bf16 %v1096_v62, %v1095_v59 }
 0xfbe   :  { %1253 = vmatprep.subr.bf16.mxu0 %v2632_v3  ;;  %1477 = vmatprep.subr.bf16.mxu1 %v2635_v28 }
 0xfc0   :  { %v540_v48 = vpop.permute.xlu0 %539  ;;  %1254 = vmatpush1.bf16.msra.mxu0 %v2630_v5  ;;  %v1097_v63 = vld [vmem:[#allocation5 + $0x20] sm:$0xff] }
 0xfc1   :  { %543 = vst.msk [vmem:[#allocation4 + $0x8] sm:$0xff] %vm453_vm2, %v540_v48  ;;  %1478 = vmatpush1.bf16.msra.mxu1 %v2633_v56  ;;  %1659 = vmatprep.subr.bf16.mxu0 %v3410_v46  ;;  %v1103_v61 = vpack.c.bf16 %v1098_v6, %v1097_v63 }
 0xfc2   :  { %1735 = vmatprep.subr.bf16.mxu1 %v3410_v46 }
 0xfc3   :  { %2452 = vmatmul.mubr.msk.bf16.gmra.mrb[36].mxu0 %vm453_vm2, %v1102_v55  ;;  %2476 = vmatmul.mubr.msk.bf16.gmra.mrb[36].mxu1 %vm453_vm2, %v1102_v55 }
 0xfc4   :  { %v718_v1 = vpop.permute.xlu0 %717  ;;  %1198 = vmatprep.mubr.bf16.mxu0 %v2919_v0  ;;  %1434 = vmatprep.mubr.bf16.mxu1 %v2919_v0  ;;  %v1099_v2 = vld [vmem:[#allocation5 + $0x30] sm:$0xff] }
 0xfc5   :  { %721 = vst.msk [vmem:[#allocation4 + $0x18] sm:$0xff] %vm453_vm2, %v718_v1  ;;  %v1104_v7 = vpack.c.bf16 %v1100_v10, %v1099_v2 }
 0xfc8   :  { %v896_v4 = vpop.permute.xlu0 %895  ;;  %v1082_v11 = vld [vmem:[#allocation4 + $0x8] sm:$0xff] }
 0xfc9   :  { %899 = vst.msk [vmem:[#allocation4 + $0x28] sm:$0xff] %vm453_vm2, %v896_v4  ;;  %v1089_v57 = vpack.c.bf16 %v1082_v11, %v1081_v9 }
 0xfcb   :  { %2453 = vmatmul.mubr.msk.bf16.gmra.mrb[40].mxu0 %vm453_vm2, %v1103_v61  ;;  %2477 = vmatmul.mubr.msk.bf16.gmra.mrb[40].mxu1 %vm453_vm2, %v1103_v61 }
 0xfcc   :  { %v1073_v38 = vpop.permute.xlu0 %1072  ;;  %1208 = vmatprep.mubr.bf16.mxu0 %v2919_v0  ;;  %1444 = vmatprep.mubr.bf16.mxu1 %v2919_v0  ;;  %v1084_v14 = vld [vmem:[#allocation4 + $0x18] sm:$0xff] }
 0xfcd   :  { %1076 = vst.msk [vmem:[#allocation4 + $0x38] sm:$0xff] %vm453_vm2, %v1073_v38  ;;  %v1090_v17 = vpack.c.bf16 %v1084_v14, %v1083_v16 }
 0xfd0   :  { %v1086_v15 = vld [vmem:[#allocation4 + $0x28] sm:$0xff] }
 0xfd1   :  { %v1091_v40 = vpack.c.bf16 %v1086_v15, %v1085_v18 }
 0xfd3   :  { %2454 = vmatmul.mubr.msk.bf16.gmra.mrb[44].mxu0 %vm453_vm2, %v1104_v7  ;;  %2478 = vmatmul.mubr.msk.bf16.gmra.mrb[44].mxu1 %vm453_vm2, %v1104_v7 }
 0xfd4   :  { %1283 = vmatprep.mubr.bf16.mxu0 %v2919_v0  ;;  %1507 = vmatprep.mubr.bf16.mxu1 %v2919_v0  ;;  %v1088_v47 = vld [vmem:[#allocation4 + $0x38] sm:$0xff] }
 0xfd5   :  { %v1092_v58 = vpack.c.bf16 %v1088_v47, %v1087_v24 }
 0xfdb   :  { %2459 = vmatmul.mubr.msk.bf16.vlgmr.msra.gmra.mrb[32].mxu0 %vm453_vm2, %v1089_v57  ;;  %2483 = vmatmul.mubr.msk.bf16.vlgmr.msra.gmra.mrb[32].mxu1 %vm453_vm2, %v1089_v57 }
 0xfdc   :  { %1660 = vmatpush1.bf16.msra.mxu0 %v3430_v54  ;;  %1293 = vmatprep.mubr.bf16.mxu0 %v2919_v0 }
 0xfdd   :  { %1517 = vmatprep.mubr.bf16.mxu1 %v2919_v0  ;;  %1661 = vmatprep.subr.bf16.mxu0 %v3432_v12 }
 0xfde   :  { %1736 = vmatpush1.bf16.msra.mxu1 %v3430_v54 }
 0xfdf   :  { %1737 = vmatprep.subr.bf16.mxu1 %v3432_v12 }
 0xfe0   :  { %1662 = vmatpush1.bf16.msra.mxu0 %v3438_v13 }
 0xfe1   :  { %1663 = vmatprep.subr.bf16.mxu0 %v3442_v19 }
 0xfe2   :  { %1738 = vmatpush1.bf16.msra.mxu1 %v3438_v13 }
 0xfe3   :  { %2460 = vmatmul.mubr.msk.bf16.gmra.mrb[36].mxu0 %vm453_vm2, %v1090_v17  ;;  %2484 = vmatmul.mubr.msk.bf16.gmra.mrb[36].mxu1 %vm453_vm2, %v1090_v17 }
 0xfe4   :  { %1303 = vmatprep.mubr.bf16.mxu0 %v2919_v0  ;;  %1527 = vmatprep.mubr.bf16.mxu1 %v2919_v0 }
 0xfe5   :  { %1664 = vmatpush1.bf16.msra.mxu0 %v3448_v20  ;;  %1739 = vmatprep.subr.bf16.mxu1 %v3442_v19 }
 0xfe6   :  { %1665 = vmatprep.subr.bf16.mxu0 %v3450_v22  ;;  %1740 = vmatpush1.bf16.msra.mxu1 %v3448_v20 }
 0xfe7   :  { %1741 = vmatprep.subr.bf16.mxu1 %v3450_v22 }
 0xfe9   :  { %1666 = vmatpush1.bf16.msra.mxu0 %v3458_v8 }
 0xfea   :  { %1742 = vmatpush1.bf16.msra.mxu1 %v3458_v8  ;;  %1811 = vmatprep.subr.bf16.mxu0 %v3410_v46 }
 0xfeb   :  { %2461 = vmatmul.mubr.msk.bf16.gmra.mrb[40].mxu0 %vm453_vm2, %v1091_v40  ;;  %2485 = vmatmul.mubr.msk.bf16.gmra.mrb[40].mxu1 %vm453_vm2, %v1091_v40 }
 0xfec   :  { %1313 = vmatprep.mubr.bf16.mxu0 %v2919_v0  ;;  %1537 = vmatprep.mubr.bf16.mxu1 %v2919_v0 }
 0xfed   :  { %1887 = vmatprep.subr.bf16.mxu1 %v3410_v46 }
 0xff3   :  { %2462 = vmatmul.mubr.msk.bf16.gmra.mrb[44].mxu0 %vm453_vm2, %v1092_v58  ;;  %2486 = vmatmul.mubr.msk.bf16.gmra.mrb[44].mxu1 %vm453_vm2, %v1092_v58 }
 0xff4   :  { %1691 = vmatprep.mubr.bf16.mxu0 %v2919_v0  ;;  %1767 = vmatprep.mubr.bf16.mxu1 %v2919_v0 }
 0xffb   :  { %1692 = vmatmul.mubr.bf16.vlgmr.msra.gmra.mrb[48].mxu0 %v2919_v0 }
 0xffc   :  { %1812 = vmatpush1.bf16.msra.mxu0 %v3430_v54  ;;  %1843 = vmatprep.mubr.bf16.mxu0 %v2919_v0 }
 0xffd   :  { %1813 = vmatprep.subr.bf16.mxu0 %v3432_v12 }
0x1000   :  { %1814 = vmatpush1.bf16.msra.mxu0 %v3438_v13 }
0x1001   :  { %1815 = vmatprep.subr.bf16.mxu0 %v3442_v19 }
0x1004   :  { %1816 = vmatpush1.bf16.msra.mxu0 %v3448_v20 }
0x1005   :  { %1817 = vmatprep.subr.bf16.mxu0 %v3450_v22 }
0x1008   :  { %1818 = vmatpush1.bf16.msra.mxu0 %v3458_v8 }
0x1009   :  { %1963 = vmatprep.subr.bf16.mxu0 %v3410_v46 }
0x10ae   :  { %v1285_v26 = vpop.f32.mrb[32].mxu0  ;;  %v1509_v43 = vpop.f32.mrb[32].mxu1 }
0x10af   :  { %v3500_v52 = vadd.f32 %v3490_v21, %v1509_v43  ;;  %v1287_v31 = vpop.f32.mrb[33].mxu0  ;;  %v1511_v33 = vpop.f32.mrb[33].mxu1 }
0x10b0   :  { %v3504_v34 = vadd.f32 %v3496_v60, %v1511_v33  ;;  %v1289_v25 = vpop.f32.mrb[34].mxu0  ;;  %v1513_v32 = vpop.f32.mrb[34].mxu1 }
0x10b1   :  { %v3506_v35 = vadd.f32 %v1329_v50, %v1289_v25  ;;  %v3509_v41 = vadd.f32 %v3490_v21, %v1513_v32  ;;  %v1291_v36 = vpop.f32.mrb[35].mxu0  ;;  %v1515_v49 = vpop.f32.mrb[35].mxu1 }
0x10b2   :  { %v3511_v27 = vadd.f32 %v1333_v23, %v1291_v36  ;;  %v3514_v53 = vadd.f32 %v3496_v60, %v1515_v49 }
0x10b6   :  { %v1295_v45 = vpop.f32.mrb[36].mxu0  ;;  %v1519_v51 = vpop.f32.mrb[36].mxu1 }
0x10b7   :  { %v3516_v30 = vadd.f32 %v1329_v50, %v1295_v45  ;;  %v3519_v29 = vadd.f32 %v3490_v21, %v1519_v51  ;;  %v1297_v39 = vpop.f32.mrb[37].mxu0  ;;  %v1521_v3 = vpop.f32.mrb[37].mxu1 }
0x10b8   :  { %v3521_v28 = vadd.f32 %v1333_v23, %v1297_v39  ;;  %v3524_v37 = vadd.f32 %v3496_v60, %v1521_v3  ;;  %v1299_v5 = vpop.f32.mrb[38].mxu0  ;;  %v1523_v56 = vpop.f32.mrb[38].mxu1  ;;  %v1336_v3 = vadd.f32 %v1329_v50, %v1285_v26 }
0x10b9   :  { %v3526_v59 = vadd.f32 %v1329_v50, %v1299_v5  ;;  %v3529_v48 = vadd.f32 %v3490_v21, %v1523_v56  ;;  %v1301_v62 = vpop.f32.mrb[39].mxu0  ;;  %v1525_v55 = vpop.f32.mrb[39].mxu1  ;;  %v1337_v5 = vadd.f32 %v1333_v23, %v1287_v31 }
0x10ba   :  { %v3531_v1 = vadd.f32 %v1333_v23, %v1301_v62  ;;  %v3534_v63 = vadd.f32 %v3496_v60, %v1525_v55 }
0x10be   :  { %v1305_v4 = vpop.f32.mrb[40].mxu0  ;;  %v1529_v6 = vpop.f32.mrb[40].mxu1 }
0x10bf   :  { %v3536_v61 = vadd.f32 %v1329_v50, %v1305_v4  ;;  %v3539_v38 = vadd.f32 %v3490_v21, %v1529_v6  ;;  %v1307_v2 = vpop.f32.mrb[41].mxu0  ;;  %v1531_v10 = vpop.f32.mrb[41].mxu1 }
0x10c0   :  { %v3541_v7 = vadd.f32 %v1333_v23, %v1307_v2  ;;  %v3544_v11 = vadd.f32 %v3496_v60, %v1531_v10  ;;  %v1309_v9 = vpop.f32.mrb[42].mxu0  ;;  %v1533_v57 = vpop.f32.mrb[42].mxu1 }
0x10c1   :  { %v3546_v14 = vadd.f32 %v1329_v50, %v1309_v9  ;;  %v3549_v16 = vadd.f32 %v3490_v21, %v1533_v57  ;;  %v1311_v17 = vpop.f32.mrb[43].mxu0  ;;  %v1535_v15 = vpop.f32.mrb[43].mxu1 }
0x10c2   :  { %v3551_v18 = vadd.f32 %v1333_v23, %v1311_v17  ;;  %v3554_v40 = vadd.f32 %v3496_v60, %v1535_v15 }
0x10c6   :  { %v1315_v47 = vpop.f32.mrb[44].mxu0  ;;  %v1539_v24 = vpop.f32.mrb[44].mxu1 }
0x10c7   :  { %v3556_v58 = vadd.f32 %v1329_v50, %v1315_v47  ;;  %v3559_v42 = vadd.f32 %v3490_v21, %v1539_v24  ;;  %v1317_v44 = vpop.f32.mrb[45].mxu0  ;;  %v1541_v43 = vpop.f32.mrb[45].mxu1 }
0x10c8   :  { %v3561_v33 = vadd.f32 %v1333_v23, %v1317_v44  ;;  %v1574_v25 = vadd.f32 %v3496_v60, %v1541_v43  ;;  %v1319_v32 = vpop.f32.mrb[46].mxu0  ;;  %v1543_v36 = vpop.f32.mrb[46].mxu1 }
0x10c9   :  { %v3564_v49 = vadd.f32 %v1329_v50, %v1319_v32  ;;  %v1321_v45 = vpop.f32.mrb[47].mxu0  ;;  %v1545_v51 = vpop.f32.mrb[47].mxu1  ;;  %v1575_v62 = vadd.f32 %v3490_v21, %v1543_v36 }
0x10ca   :  { %v3566_v39 = vadd.f32 %v1333_v23, %v1321_v45  ;;  %v1576_v6 = vadd.f32 %v3496_v60, %v1545_v51 }
0x10ce   :  { %v1693_v56 = vpop.f32.mrb[48].mxu0 }
0x10cf   :  { %v1694_v55 = vadd.f32 %v1693_v56, %v1336_v3  ;;  %v1695_v4 = vpop.f32.mrb[49].mxu0 }
0x10d0   :  { %v1696_v2 = vadd.f32 %v1695_v4, %v1337_v5  ;;  %v1697_v10 = vpop.f32.mrb[50].mxu0 }
0x10d1   :  { %v1702_v9 = vadd.f32 %v1694_v55, %v1575_v62  ;;  %v1698_v57 = vpop.f32.mrb[51].mxu0 }
0x10d2   :  { %v1703_v17 = vadd.f32 %v1696_v2, %v1576_v6 }
0x10d3   :  { %v2496_v15 = vmul.f32 -1.442695, %v1702_v9 }
0x10d4   :  { %v2497_v21 = vmul.f32 -1.442695, %v1703_v17 }
0x10d5   :  { %2748 = vpow2.f32 %v2496_v15 }
0x10d6   :  { %2750 = vtanh.f32 %v1703_v17 }
0x10df   :  { %v2749_v47 = vpop.eup %2748 }
0x10e0   :  { %v1710_v24 = vadd.f32 1.0, %v2749_v47  ;;  %v2751_v26 = vpop.eup %2750 }
0x10e2   :  { %2752 = vrcp.f32 %v1710_v24 }
0x10e3   :  { %2754 = vpow2.f32 %v2497_v21 }
0x10ec   :  { %v2753_v50 = vpop.eup %2752 }
0x10ed   :  { %v1718_v31 = vmul.f32 %v2753_v50, %v2751_v26  ;;  %v2755_v23 = vpop.eup %2754  ;;  %v1717_v44 = vmul.f32 0.0, %v2753_v50 }
0x10ee   :  { %v1711_v60 = vadd.f32 1.0, %v2755_v23 }
0x10ef   :  { %1720 = vrot.lane.b32.xlu1 %v1718_v31, %s2920_s2 }
0x10f0   :  { %2756 = vrcp.f32 %v1711_v60 }
0x10fa   :  { %v2757_v36 = vpop.eup %2756 }
0x1161   :  { %v1721_v43 = vpop.permute.xlu1 %1720 }
0x1162   :  { %v1723_v32 = vadd.f32 %v1721_v43, %v1717_v44 }
0x1164   :  { %2758 = vtanh.f32 %v1723_v32 }
0x116e   :  { %v2759_v45 = vpop.eup %2758 }
0x116f   :  { %v1725_v51 = vmul.f32 %v2759_v45, %v2757_v36 }
0x1171   :  { %v1726_v3 = vpack.c.bf16 %v1725_v51, %v1725_v51 }
0x1173   :  { %1730 = vrot.lane.b32.xlu0 %v1726_v3, %s2920_s2 }
0x11e5   :  { %v1731_v5 = vpop.permute.xlu0 %1730 }
0x11e6   :  { %2498 = vmatmul.mubr.msk.bf16.vlgmr.msra.gmra.mrb[48].mxu1 %vm377_vm1, %v1731_v5 }
0x11e7   :  { %1888 = vmatpush1.bf16.msra.mxu1 %v3430_v54  ;;  %1919 = vmatprep.mubr.bf16.mxu1 %v2919_v0 }
0x11e8   :  { %1889 = vmatprep.subr.bf16.mxu1 %v3432_v12 }
0x11eb   :  { %1890 = vmatpush1.bf16.msra.mxu1 %v3438_v13 }
0x11ec   :  { %1891 = vmatprep.subr.bf16.mxu1 %v3442_v19 }
0x11ef   :  { %1892 = vmatpush1.bf16.msra.mxu1 %v3448_v20 }
0x11f0   :  { %1893 = vmatprep.subr.bf16.mxu1 %v3450_v22 }
0x11f3   :  { %1894 = vmatpush1.bf16.msra.mxu1 %v3458_v8 }
0x11f4   :  { %2039 = vmatprep.subr.bf16.mxu1 %v3410_v46 }
0x12b9   :  { %v1769_v56 = vpop.f32.mrb[48].mxu1 }
0x12ba   :  { %v1770_v62 = vadd.f32 %v1769_v56, %v3506_v35  ;;  %v1771_v55 = vpop.f32.mrb[49].mxu1 }
0x12bb   :  { %v1772_v4 = vadd.f32 %v1771_v55, %v3511_v27  ;;  %v1773_v6 = vpop.f32.mrb[50].mxu1 }
0x12bc   :  { %v1778_v2 = vadd.f32 %v1770_v62, %v3559_v42  ;;  %v1774_v10 = vpop.f32.mrb[51].mxu1 }
0x12bd   :  { %v1779_v9 = vadd.f32 %v1772_v4, %v1574_v25 }
0x12be   :  { %v2499_v57 = vmul.f32 -1.442695, %v1778_v2 }
0x12bf   :  { %v2500_v35 = vmul.f32 -1.442695, %v1779_v9 }
0x12c0   :  { %2760 = vpow2.f32 %v2499_v57 }
0x12c1   :  { %2762 = vtanh.f32 %v1779_v9 }
0x12ca   :  { %v2761_v17 = vpop.eup %2760 }
0x12cb   :  { %v1786_v15 = vadd.f32 1.0, %v2761_v17  ;;  %v2763_v47 = vpop.eup %2762 }
0x12cd   :  { %2764 = vrcp.f32 %v1786_v15 }
0x12ce   :  { %2766 = vpow2.f32 %v2500_v35 }
0x12d7   :  { %v2765_v24 = vpop.eup %2764 }
0x12d8   :  { %v1794_v26 = vmul.f32 %v2765_v24, %v2763_v47  ;;  %v2767_v50 = vpop.eup %2766  ;;  %v1793_v31 = vmul.f32 %v2765_v24, %v1723_v32 }
0x12d9   :  { %v1787_v27 = vadd.f32 1.0, %v2767_v50 }
0x12da   :  { %1796 = vrot.lane.b32.xlu1 %v1794_v26, %s2920_s2 }
0x12db   :  { %2768 = vrcp.f32 %v1787_v27 }
0x12e5   :  { %v2769_v25 = vpop.eup %2768 }
0x134c   :  { %v1797_v21 = vpop.permute.xlu1 %1796 }
0x134d   :  { %v1799_v42 = vadd.f32 %v1797_v21, %v1793_v31 }
0x134f   :  { %2770 = vtanh.f32 %v1799_v42 }
0x1359   :  { %v2771_v23 = vpop.eup %2770 }
0x135a   :  { %v1801_v60 = vmul.f32 %v2771_v23, %v2769_v25 }
0x135c   :  { %v1802_v44 = vpack.c.bf16 %v1801_v60, %v1801_v60 }
0x135e   :  { %1806 = vrot.lane.b32.xlu0 %v1802_v44, %s2920_s2 }
0x13d0   :  { %v1807_v43 = vpop.permute.xlu0 %1806 }
0x13d1   :  { %2501 = vmatmul.mubr.msk.bf16.vlgmr.msra.gmra.mrb[52].mxu0 %vm377_vm1, %v1807_v43 }
0x13d2   :  { %1964 = vmatpush1.bf16.msra.mxu0 %v3430_v54  ;;  %1995 = vmatprep.mubr.bf16.mxu0 %v2919_v0 }
0x13d3   :  { %1965 = vmatprep.subr.bf16.mxu0 %v3432_v12 }
0x13d6   :  { %1966 = vmatpush1.bf16.msra.mxu0 %v3438_v13 }
0x13d7   :  { %1967 = vmatprep.subr.bf16.mxu0 %v3442_v19 }
0x13da   :  { %1968 = vmatpush1.bf16.msra.mxu0 %v3448_v20 }
0x13db   :  { %1969 = vmatprep.subr.bf16.mxu0 %v3450_v22 }
0x13de   :  { %1970 = vmatpush1.bf16.msra.mxu0 %v3458_v8 }
0x13df   :  { %2115 = vmatprep.subr.bf16.mxu0 %v3410_v46 }
0x14a4   :  { %v1845_v32 = vpop.f32.mrb[52].mxu0 }
0x14a5   :  { %v1846_v36 = vadd.f32 %v1845_v32, %v3516_v30  ;;  %v1847_v45 = vpop.f32.mrb[53].mxu0 }
0x14a6   :  { %v1848_v51 = vadd.f32 %v1847_v45, %v3521_v28  ;;  %v1849_v3 = vpop.f32.mrb[54].mxu0 }
0x14a7   :  { %v1854_v5 = vadd.f32 %v1846_v36, %v3549_v16  ;;  %v1850_v56 = vpop.f32.mrb[55].mxu0 }
0x14a8   :  { %v1855_v62 = vadd.f32 %v1848_v51, %v3554_v40 }
0x14a9   :  { %v2502_v55 = vmul.f32 -1.442695, %v1854_v5 }
0x14aa   :  { %v2503_v30 = vmul.f32 -1.442695, %v1855_v62 }
0x14ab   :  { %2772 = vpow2.f32 %v2502_v55 }
0x14ac   :  { %2774 = vtanh.f32 %v1855_v62 }
0x14b5   :  { %v2773_v4 = vpop.eup %2772 }
0x14b6   :  { %v1862_v6 = vadd.f32 1.0, %v2773_v4  ;;  %v2775_v2 = vpop.eup %2774 }
0x14b8   :  { %2776 = vrcp.f32 %v1862_v6 }
0x14b9   :  { %2778 = vpow2.f32 %v2503_v30 }
0x14c2   :  { %v2777_v10 = vpop.eup %2776 }
0x14c3   :  { %v1870_v9 = vmul.f32 %v2777_v10, %v2775_v2  ;;  %v2779_v28 = vpop.eup %2778  ;;  %v1869_v17 = vmul.f32 %v2777_v10, %v1799_v42 }
0x14c4   :  { %v1863_v57 = vadd.f32 1.0, %v2779_v28 }
0x14c5   :  { %1872 = vrot.lane.b32.xlu1 %v1870_v9, %s2920_s2 }
0x14c6   :  { %2780 = vrcp.f32 %v1863_v57 }
0x14d0   :  { %v2781_v40 = vpop.eup %2780 }
0x1537   :  { %v1873_v16 = vpop.permute.xlu1 %1872 }
0x1538   :  { %v1875_v15 = vadd.f32 %v1873_v16, %v1869_v17 }
0x153a   :  { %2782 = vtanh.f32 %v1875_v15 }
0x1544   :  { %v2783_v47 = vpop.eup %2782 }
0x1545   :  { %v1877_v24 = vmul.f32 %v2783_v47, %v2781_v40 }
0x1547   :  { %v1878_v26 = vpack.c.bf16 %v1877_v24, %v1877_v24 }
0x1549   :  { %1882 = vrot.lane.b32.xlu0 %v1878_v26, %s2920_s2 }
0x15bb   :  { %v1883_v35 = vpop.permute.xlu0 %1882 }
0x15bc   :  { %2504 = vmatmul.mubr.msk.bf16.vlgmr.msra.gmra.mrb[52].mxu1 %vm377_vm1, %v1883_v35 }
0x15bd   :  { %2040 = vmatpush1.bf16.msra.mxu1 %v3430_v54  ;;  %2071 = vmatprep.mubr.bf16.mxu1 %v2919_v0 }
0x15be   :  { %2041 = vmatprep.subr.bf16.mxu1 %v3432_v12 }
0x15c1   :  { %2042 = vmatpush1.bf16.msra.mxu1 %v3438_v13 }
0x15c2   :  { %2043 = vmatprep.subr.bf16.mxu1 %v3442_v19 }
0x15c5   :  { %2044 = vmatpush1.bf16.msra.mxu1 %v3448_v20 }
0x15c6   :  { %2045 = vmatprep.subr.bf16.mxu1 %v3450_v22 }
0x15c9   :  { %2046 = vmatpush1.bf16.msra.mxu1 %v3458_v8 }
0x15ca   :  { %2191 = vmatprep.subr.bf16.mxu1 %v3410_v46 }
0x168f   :  { %v1921_v50 = vpop.f32.mrb[52].mxu1 }
0x1690   :  { %v1922_v27 = vadd.f32 %v1921_v50, %v3526_v59  ;;  %v1923_v31 = vpop.f32.mrb[53].mxu1 }
0x1691   :  { %v1924_v21 = vadd.f32 %v1923_v31, %v3531_v1  ;;  %v1925_v42 = vpop.f32.mrb[54].mxu1 }
0x1692   :  { %v1930_v25 = vadd.f32 %v1922_v27, %v3539_v38  ;;  %v1926_v23 = vpop.f32.mrb[55].mxu1 }
0x1693   :  { %v1931_v60 = vadd.f32 %v1924_v21, %v3544_v11 }
0x1694   :  { %v2505_v44 = vmul.f32 -1.442695, %v1930_v25 }
0x1695   :  { %v2506_v59 = vmul.f32 -1.442695, %v1931_v60 }
0x1696   :  { %2784 = vpow2.f32 %v2505_v44 }
0x1697   :  { %2786 = vtanh.f32 %v1931_v60 }
0x16a0   :  { %v2785_v43 = vpop.eup %2784 }
0x16a1   :  { %v1938_v32 = vadd.f32 1.0, %v2785_v43  ;;  %v2787_v36 = vpop.eup %2786 }
0x16a3   :  { %2788 = vrcp.f32 %v1938_v32 }
0x16a4   :  { %2790 = vpow2.f32 %v2506_v59 }
0x16ad   :  { %v2789_v46 = vpop.eup %2788 }
0x16ae   :  { %v1946_v45 = vmul.f32 %v2789_v46, %v2787_v36  ;;  %v2791_v1 = vpop.eup %2790  ;;  %v1945_v3 = vmul.f32 %v2789_v46, %v1875_v15 }
0x16af   :  { %v1939_v51 = vadd.f32 1.0, %v2791_v1 }
0x16b0   :  { %1948 = vrot.lane.b32.xlu1 %v1946_v45, %s2920_s2 }
0x16b1   :  { %2792 = vrcp.f32 %v1939_v51 }
0x16bb   :  { %v2793_v11 = vpop.eup %2792 }
0x1722   :  { %v1949_v38 = vpop.permute.xlu1 %1948 }
0x1723   :  { %v1951_v5 = vadd.f32 %v1949_v38, %v1945_v3 }
0x1725   :  { %2794 = vtanh.f32 %v1951_v5 }
0x172f   :  { %v2795_v56 = vpop.eup %2794 }
0x1730   :  { %v1953_v62 = vmul.f32 %v2795_v56, %v2793_v11 }
0x1732   :  { %v1954_v55 = vpack.c.bf16 %v1953_v62, %v1953_v62 }
0x1734   :  { %1958 = vrot.lane.b32.xlu0 %v1954_v55, %s2920_s2 }
0x17a6   :  { %v1959_v4 = vpop.permute.xlu0 %1958 }
0x17a7   :  { %2507 = vmatmul.mubr.msk.bf16.vlgmr.msra.gmra.mrb[56].mxu0 %vm377_vm1, %v1959_v4 }
0x17a8   :  { %2116 = vmatpush1.bf16.msra.mxu0 %v3430_v54  ;;  %2147 = vmatprep.mubr.bf16.mxu0 %v2919_v0 }
0x17a9   :  { %2117 = vmatprep.subr.bf16.mxu0 %v3432_v12 }
0x17ac   :  { %2118 = vmatpush1.bf16.msra.mxu0 %v3438_v13 }
0x17ad   :  { %2119 = vmatprep.subr.bf16.mxu0 %v3442_v19 }
0x17b0   :  { %2120 = vmatpush1.bf16.msra.mxu0 %v3448_v20 }
0x17b1   :  { %2121 = vmatprep.subr.bf16.mxu0 %v3450_v22 }
0x17b4   :  { %2122 = vmatpush1.bf16.msra.mxu0 %v3458_v8 }
0x187a   :  { %v1997_v6 = vpop.f32.mrb[56].mxu0 }
0x187b   :  { %v1998_v2 = vadd.f32 %v1997_v6, %v3536_v61  ;;  %v1999_v10 = vpop.f32.mrb[57].mxu0 }
0x187c   :  { %v2000_v9 = vadd.f32 %v1999_v10, %v3541_v7  ;;  %v2001_v30 = vpop.f32.mrb[58].mxu0 }
0x187d   :  { %v2006_v28 = vadd.f32 %v1998_v2, %v3529_v48  ;;  %v2002_v57 = vpop.f32.mrb[59].mxu0 }
0x187e   :  { %v2007_v17 = vadd.f32 %v2000_v9, %v3534_v63 }
0x187f   :  { %v2508_v16 = vmul.f32 -1.442695, %v2006_v28 }
0x1880   :  { %v2509_v61 = vmul.f32 -1.442695, %v2007_v17 }
0x1881   :  { %2796 = vpow2.f32 %v2508_v16 }
0x1882   :  { %2798 = vtanh.f32 %v2007_v17 }
0x188b   :  { %v2797_v15 = vpop.eup %2796 }
0x188c   :  { %v2014_v40 = vadd.f32 1.0, %v2797_v15  ;;  %v2799_v47 = vpop.eup %2798 }
0x188e   :  { %2800 = vrcp.f32 %v2014_v40 }
0x188f   :  { %2802 = vpow2.f32 %v2509_v61 }
0x1898   :  { %v2801_v24 = vpop.eup %2800 }
0x1899   :  { %v2022_v26 = vmul.f32 %v2801_v24, %v2799_v47  ;;  %v2803_v7 = vpop.eup %2802  ;;  %v2021_v50 = vmul.f32 %v2801_v24, %v1951_v5 }
0x189a   :  { %v2015_v35 = vadd.f32 1.0, %v2803_v7 }
0x189b   :  { %2024 = vrot.lane.b32.xlu1 %v2022_v26, %s2920_s2 }
0x189c   :  { %2804 = vrcp.f32 %v2015_v35 }
0x18a6   :  { %v2805_v63 = vpop.eup %2804 }
0x190d   :  { %v2025_v48 = vpop.permute.xlu1 %2024 }
0x190e   :  { %v2027_v27 = vadd.f32 %v2025_v48, %v2021_v50 }
0x1910   :  { %2806 = vtanh.f32 %v2027_v27 }
0x191a   :  { %v2807_v31 = vpop.eup %2806 }
0x191b   :  { %v2029_v21 = vmul.f32 %v2807_v31, %v2805_v63 }
0x191d   :  { %v2030_v42 = vpack.c.bf16 %v2029_v21, %v2029_v21 }
0x191f   :  { %2034 = vrot.lane.b32.xlu0 %v2030_v42, %s2920_s2 }
0x1991   :  { %v2035_v25 = vpop.permute.xlu0 %2034 }
0x1992   :  { %2510 = vmatmul.mubr.msk.bf16.vlgmr.msra.gmra.mrb[56].mxu1 %vm377_vm1, %v2035_v25 }
0x1993   :  { %2192 = vmatpush1.bf16.msra.mxu1 %v3430_v54  ;;  %2223 = vmatprep.mubr.bf16.mxu1 %v2919_v0 }
0x1994   :  { %2193 = vmatprep.subr.bf16.mxu1 %v3432_v12 }
0x1997   :  { %2194 = vmatpush1.bf16.msra.mxu1 %v3438_v13 }
0x1998   :  { %2195 = vmatprep.subr.bf16.mxu1 %v3442_v19 }
0x199b   :  { %2196 = vmatpush1.bf16.msra.mxu1 %v3448_v20 }
0x199c   :  { %2197 = vmatprep.subr.bf16.mxu1 %v3450_v22 }
0x199f   :  { %2198 = vmatpush1.bf16.msra.mxu1 %v3458_v8 }
0x1a65   :  { %v2073_v23 = vpop.f32.mrb[56].mxu1 }
0x1a66   :  { %v2074_v60 = vadd.f32 %v2073_v23, %v3546_v14  ;;  %v2075_v44 = vpop.f32.mrb[57].mxu1 }
0x1a67   :  { %v2076_v54 = vadd.f32 %v2075_v44, %v3551_v18  ;;  %v2077_v43 = vpop.f32.mrb[58].mxu1 }
0x1a68   :  { %v2082_v0 = vadd.f32 %v2074_v60, %v3519_v29  ;;  %v2078_v12 = vpop.f32.mrb[59].mxu1  ;;  %v2651_v43 = vld [vmem:[%s3691_s7 + $0x8] sm:$0xff]  }
0x1a69   :  { %v2083_v13 = vadd.f32 %v2076_v54, %v3524_v37 }
0x1a6a   :  { %v2511_v32 = vmul.f32 -1.442695, %v2082_v0 }
0x1a6b   :  { %v2512_v14 = vmul.f32 -1.442695, %v2083_v13 }
0x1a6c   :  { %2808 = vpow2.f32 %v2511_v32 }
0x1a6d   :  { %2810 = vtanh.f32 %v2083_v13 }
0x1a76   :  { %v2809_v19 = vpop.eup %2808 }
0x1a77   :  { %v2090_v20 = vadd.f32 1.0, %v2809_v19  ;;  %v2811_v22 = vpop.eup %2810 }
0x1a79   :  { %2812 = vrcp.f32 %v2090_v20 }
0x1a7a   :  { %2814 = vpow2.f32 %v2512_v14 }
0x1a83   :  { %v2813_v8 = vpop.eup %2812 }
0x1a84   :  { %v2098_v36 = vmul.f32 %v2813_v8, %v2811_v22  ;;  %v2815_v18 = vpop.eup %2814  ;;  %v2097_v45 = vmul.f32 %v2813_v8, %v2027_v27 }
0x1a85   :  { %v2091_v46 = vadd.f32 1.0, %v2815_v18 }
0x1a86   :  { %2100 = vrot.lane.b32.xlu1 %v2098_v36, %s2920_s2 }
0x1a87   :  { %2816 = vrcp.f32 %v2091_v46 }
0x1a91   :  { %v2817_v37 = vpop.eup %2816 }
0x1af8   :  { %v2101_v29 = vpop.permute.xlu1 %2100 }
0x1af9   :  { %v2103_v59 = vadd.f32 %v2101_v29, %v2097_v45 }
0x1afb   :  { %2818 = vtanh.f32 %v2103_v59 }
0x1b05   :  { %v2819_v1 = vpop.eup %2818 }
0x1b06   :  { %v2105_v51 = vmul.f32 %v2819_v1, %v2817_v37 }
0x1b08   :  { %v2106_v3 = vpack.c.bf16 %v2105_v51, %v2105_v51 }
0x1b0a   :  { %2110 = vrot.lane.b32.xlu0 %v2106_v3, %s2920_s2 }
0x1b7c   :  { %v2111_v38 = vpop.permute.xlu0 %2110 }
0x1b7d   :  { %2513 = vmatmul.mubr.msk.bf16.vlgmr.msra.gmra.mrb[60].mxu0 %vm377_vm1, %v2111_v38 }
0x1c50   :  { %v2149_v5 = vpop.f32.mrb[60].mxu0 }
0x1c51   :  { %v2150_v11 = vadd.f32 %v2149_v5, %v3556_v58  ;;  %v2151_v56 = vpop.f32.mrb[61].mxu0 }
0x1c52   :  { %v2152_v62 = vadd.f32 %v2151_v56, %v3561_v33  ;;  %v2153_v55 = vpop.f32.mrb[62].mxu0 }
0x1c53   :  { %v2158_v4 = vadd.f32 %v2150_v11, %v3509_v41  ;;  %v2154_v6 = vpop.f32.mrb[63].mxu0 }
0x1c54   :  { %v2159_v2 = vadd.f32 %v2152_v62, %v3514_v53 }
0x1c55   :  { %v2514_v10 = vmul.f32 -1.442695, %v2158_v4 }
0x1c56   :  { %v2515_v58 = vmul.f32 -1.442695, %v2159_v2 }
0x1c57   :  { %2820 = vpow2.f32 %v2514_v10 }
0x1c58   :  { %2822 = vtanh.f32 %v2159_v2 }
0x1c61   :  { %v2821_v9 = vpop.eup %2820 }
0x1c62   :  { %v2166_v30 = vadd.f32 1.0, %v2821_v9  ;;  %v2823_v28 = vpop.eup %2822 }
0x1c64   :  { %2824 = vrcp.f32 %v2166_v30 }
0x1c65   :  { %2826 = vpow2.f32 %v2515_v58 }
0x1c6e   :  { %v2825_v57 = vpop.eup %2824 }
0x1c6f   :  { %v2174_v17 = vmul.f32 %v2825_v57, %v2823_v28  ;;  %v2827_v33 = vpop.eup %2826  ;;  %v2173_v15 = vmul.f32 %v2825_v57, %v2103_v59  ;;  %v2529_v59 = vld [vmem:[%s3692_s8] ss:$0 sm:$0xff] }
0x1c70   :  { %v2167_v16 = vadd.f32 1.0, %v2827_v33 }
0x1c71   :  { %2176 = vrot.lane.b32.xlu1 %v2174_v17, %s2920_s2 }
0x1c72   :  { %2828 = vrcp.f32 %v2167_v16 }
0x1c7c   :  { %v2829_v53 = vpop.eup %2828 }
0x1ce3   :  { %v2177_v41 = vpop.permute.xlu1 %2176 }
0x1ce4   :  { %v2179_v40 = vadd.f32 %v2177_v41, %v2173_v15 }
0x1ce6   :  { %2830 = vtanh.f32 %v2179_v40 }
0x1cf0   :  { %v2831_v47 = vpop.eup %2830 }
0x1cf1   :  { %v2181_v24 = vmul.f32 %v2831_v47, %v2829_v53 }
0x1cf3   :  { %v2182_v26 = vpack.c.bf16 %v2181_v24, %v2181_v24 }
0x1cf5   :  { %2186 = vrot.lane.b32.xlu0 %v2182_v26, %s2920_s2 }
0x1d67   :  { %v2187_v61 = vpop.permute.xlu0 %2186 }
0x1d68   :  { %2516 = vmatmul.mubr.msk.bf16.vlgmr.msra.gmra.mrb[60].mxu1 %vm377_vm1, %v2187_v61 }
0x1e3b   :  { %v2225_v7 = vpop.f32.mrb[60].mxu1 }
0x1e3c   :  { %v2226_v35 = vadd.f32 %v2225_v7, %v3564_v49  ;;  %v2227_v50 = vpop.f32.mrb[61].mxu1  ;;  %v2648_v49 = vld [vmem:[%s3691_s7 + $0x10] sm:$0xff]  }
0x1e3d   :  { %v2228_v48 = vadd.f32 %v2227_v50, %v3566_v39  ;;  %v2229_v27 = vpop.f32.mrb[62].mxu1  ;;  %v2650_v39 = vld [vmem:[%s3691_s7 + $0x18] sm:$0xff]  }
0x1e3e   :  { %v2234_v63 = vadd.f32 %v2226_v35, %v3500_v52  ;;  %v2230_v31 = vpop.f32.mrb[63].mxu1  ;;  %v2649_v52 = vld [vmem:[%s3691_s7] sm:$0xff]  }
0x1e3f   :  { %v2235_v21 = vadd.f32 %v2228_v48, %v3504_v34  ;;  %v2922_v34 = vmov 0.0  }
0x1e40   :  { %v2517_v42 = vmul.f32 -1.442695, %v2234_v63  ;;  %2536 = vmatprep.subr.bf16.mxu0 %v2922_v34  ;;  %2544 = vmatprep.subr.bf16.mxu1 %v2922_v34 }
0x1e41   :  { %2537 = vmatpush3.bf16.msra.mxu0 %v2648_v49  ;;  %2545 = vmatpush3.bf16.msra.mxu1 %v2649_v52  ;;  %v2518_v0 = vmul.f32 -1.442695, %v2235_v21 }
0x1e42   :  { %2832 = vpow2.f32 %v2517_v42  ;;  %2538 = vmatprep.subr.bf16.mxu0 %v2922_v34  ;;  %2546 = vmatprep.subr.bf16.mxu1 %v2922_v34 }
0x1e43   :  { %2834 = vtanh.f32 %v2235_v21  ;;  %2540 = vmatprep.mubr.msk.bf16.mxu0 %vm2923_vm3, %v2922_v34  ;;  %2548 = vmatprep.mubr.msk.bf16.mxu1 %vm2923_vm3, %v2922_v34 }
0x1e45   :  { %2539 = vmatpush3.bf16.msra.mxu0 %v2650_v39  ;;  %2547 = vmatpush3.bf16.msra.mxu1 %v2651_v43 }
0x1e4c   :  { %v2833_v25 = vpop.eup %2832 }
0x1e4d   :  { %v2242_v23 = vadd.f32 1.0, %v2833_v25  ;;  %v2835_v60 = vpop.eup %2834 }
0x1e4f   :  { %2836 = vrcp.f32 %v2242_v23 }
0x1e50   :  { %2838 = vpow2.f32 %v2518_v0 }
0x1e59   :  { %v2837_v44 = vpop.eup %2836 }
0x1e5a   :  { %v2250_v54 = vmul.f32 %v2837_v44, %v2835_v60  ;;  %v2839_v12 = vpop.eup %2838  ;;  %v2249_v32 = vmul.f32 %v2837_v44, %v2179_v40 }
0x1e5b   :  { %v2243_v13 = vadd.f32 1.0, %v2839_v12 }
0x1e5c   :  { %2252 = vrot.lane.b32.xlu1 %v2250_v54, %s2920_s2 }
0x1e5d   :  { %2840 = vrcp.f32 %v2243_v13 }
0x1e67   :  { %v2841_v22 = vpop.eup %2840 }
0x1ece   :  { %v2253_v19 = vpop.permute.xlu1 %2252 }
0x1ecf   :  { %v2255_v20 = vadd.f32 %v2253_v19, %v2249_v32 }
0x1ed1   :  { %2842 = vtanh.f32 %v2255_v20 }
0x1edb   :  { %v2843_v8 = vpop.eup %2842 }
0x1edc   :  { %v2257_v36 = vmul.f32 %v2843_v8, %v2841_v22 }
0x1ede   :  { %v2258_v14 = vpack.c.bf16 %v2257_v36, %v2257_v36 }
0x1ee0   :  { %2326 = vrot.lane.b32.xlu1 %v2258_v14, %s2920_s2  ;;  %2269 = vrot.lane.b32.xlu0 %v2258_v14, %s2921_s23 }
0x1f52   :  { %v2327_v18 = vpop.permute.xlu1 %2326  ;;  %v2270_v46 = vpop.permute.xlu0 %2269 }
0x1f53   :  { %2541 = vmatmul.mubr.msk.bf16.vlgmr.msra.gmra.mrb[64].mxu0 %vm453_vm2, %v2270_v46  ;;  %2549 = vmatmul.mubr.msk.bf16.vlgmr.msra.gmra.mrb[64].mxu1 %vm453_vm2, %v2327_v18 }
0x2026   :  { %v2320_v45 = vpop.f32.mrb[64].mxu0  ;;  %v2377_v29 = vpop.f32.mrb[64].mxu1 }
0x2027   :  { %v2378_v37 = vadd.f32 %v2377_v29, %v2320_v45  ;;  %v2542_v1 = vpop.f32.mrb[65].mxu0  ;;  %v2550_v51 = vpop.f32.mrb[65].mxu1 }
0x2028   :  { %v2323_v3 = vpop.f32.mrb[66].mxu0  ;;  %v2380_v38 = vpop.f32.mrb[66].mxu1 }
0x2029   :  { %v2390_v5 = vadd.f32 %v2529_v59, %v2378_v37  ;;  %v2543_v11 = vpop.f32.mrb[67].mxu0  ;;  %v2551_v56 = vpop.f32.mrb[67].mxu1 }
0x202b   :  { %2392 = vst.msk [vmem:[%s3693_s9] sm:$0xff] %vm2391_vm4, %v2390_v5 }
0x202c   :  { %2397 = vsyncpa [#allocation7], 1 }
0x202d   :  { %2398 = vsyncpa [#allocation9], 1 }

</bundles_post_ra>
